<compile_context>
chip_gen: v5e
topology: v5e:2x2
jax: 0.10.0
libtpu: 0.0.40
codegen_flags: <defaults>
</compile_context>

<pallas_src>
import functools

import jax
import jax.numpy as jnp
from jax import lax
from jax.experimental import pallas as pl
from jax.experimental.pallas import tpu as pltpu

BN_EPS = 1e-5
LEAKY_SLOPE = 0.1
LANE = 128
SUBLANE = 8


def _round_up(x, m):
    return (x + m - 1) // m * m


def _vmem_limit_bytes():
    """Generation-aware scoped-VMEM limit (~3/4 of physical: v7x 64 MiB -> 48,
    v5e/v6e 128 MiB -> 96).  Falls back to a safe 32 MiB."""
    try:
        cap = int(pltpu.get_tpu_info().vmem_capacity_bytes)
        return min(cap * 3 // 4, 100 * 1024 * 1024)
    except Exception:
        return 32 * 1024 * 1024


def _conv_tile(x_ref, w_ref, row_tile, *, tile_h, wo, kh_sz, kw_sz, stride):
    """f32 conv tile (tile_h*wo, coutp) for output rows
    [row_tile*tile_h, (row_tile+1)*tile_h) of the current image.

    x_ref: (hp, wp, cinp)            bf16 padded image (resident in VMEM).
    w_ref: (kh_sz*kw_sz, cinp, coutp) bf16 weights     (resident in VMEM).
    """
    cinp = x_ref.shape[-1]
    coutp = w_ref.shape[-1]
    r0 = row_tile * tile_h * stride
    acc = jnp.zeros((tile_h * wo, coutp), jnp.float32)
    for kh in range(kh_sz):
        for kw in range(kw_sz):
            if stride == 1:
                win = x_ref[pl.ds(r0 + kh, tile_h), pl.ds(kw, wo), :]
            else:
                win = x_ref[pl.ds(r0 + kh, tile_h, stride=stride),
                            pl.ds(kw, wo, stride=stride), :]
            lhs = win.reshape(tile_h * wo, cinp)
            acc = acc + jnp.dot(lhs, w_ref[kh * kw_sz + kw],
                                preferred_element_type=jnp.float32)
    return acc


def _stats_kernel(x_ref, w_ref, stats_ref, *, tile_h, wo, ho, kh_sz, kw_sz,
                  stride):
    """Pass 1: fused conv tile + per-tile per-channel sum / sum-of-squares.

    stats_ref block is (8, coutp): row 0 = sum, row 1 = sumsq, rows 2..7 zero
    (kept 8-sublane dense so the output store is unmasked).
    """
    j = pl.program_id(1)
    coutp = w_ref.shape[-1]
    y = _conv_tile(x_ref, w_ref, j, tile_h=tile_h, wo=wo,
                   kh_sz=kh_sz, kw_sz=kw_sz, stride=stride)
    # Mask output rows past the true Ho (remainder row tile of an image).
    valid_rows = jnp.minimum(tile_h, ho - j * tile_h) * wo
    row_ids = lax.broadcasted_iota(jnp.int32, (tile_h * wo, 1), 0)
    ym = jnp.where(row_ids < valid_rows, y, 0.0)
    s = jnp.sum(ym, axis=0, keepdims=True)
    ss = jnp.sum(ym * ym, axis=0, keepdims=True)
    stats_ref[...] = jnp.concatenate(
        [s, ss, jnp.zeros((6, coutp), jnp.float32)], axis=0)


def _apply_kernel(x_ref, w_ref, scale_ref, shift_ref, out_ref, *, tile_h, wo,
                  kh_sz, kw_sz, stride):
    """Pass 2: fused conv tile + folded BN affine (one FMA) + LeakyReLU."""
    j = pl.program_id(1)
    coutp = w_ref.shape[-1]
    y = _conv_tile(x_ref, w_ref, j, tile_h=tile_h, wo=wo,
                   kh_sz=kh_sz, kw_sz=kw_sz, stride=stride)
    z = y * scale_ref[...] + shift_ref[...]
    z = jnp.maximum(z, LEAKY_SLOPE * z)          # LeakyReLU(0.1), single VPU op
    out_ref[...] = z.reshape(tile_h, wo, coutp).astype(out_ref.dtype)


@functools.partial(jax.jit, static_argnames=("stride", "padding", "tile_h"))
def cnn_block_forward(x_nchw, conv_w, gamma, beta, *, stride=1, padding=1,
                      tile_h=None):
    """x_nchw: (N, C_in, H, W);  conv_w: (C_out, C_in, KH, KW) (PyTorch layout).
    Returns LeakyReLU(BatchNorm(Conv(x))) in NCHW, bfloat16."""
    n, c_in, h, w = x_nchw.shape
    c_out, _, kh_sz, kw_sz = conv_w.shape

    ho = (h + 2 * padding - kh_sz) // stride + 1
    wo = (w + 2 * padding - kw_sz) // stride + 1

    vmem_limit = _vmem_limit_bytes()

    if tile_h is None:
        # ~1-2K flattened rows per tile to amortize the ~0.35us per-step
        # overhead; smaller tiles on the 64 MiB-VMEM v7x.
        target_rows = 2048 if vmem_limit >= 64 * 1024 * 1024 else 1024
        tile_h = max(1, target_rows // max(wo, 1))
    tile_h = max(1, min(int(tile_h), ho))
    num_row_tiles = pl.cdiv(ho, tile_h)
    hop = num_row_tiles * tile_h              # padded output rows per image

    # Lane / sublane friendly channel padding (done on the SMALL input, not on
    # a 9x patch matrix).  TODO(synk): round coutp to 256 for Cout>=256 on the
    # 2x256^2-MXU chips (v6e/v7x), gated by chip generation.
    cinp = _round_up(c_in, SUBLANE)
    coutp = _round_up(c_out, LANE)

    # Spatial padding: conv padding + enough extra rows so every row tile's
    # input window (incl. halo) stays in-bounds.
    hp = max(h + 2 * padding, (hop - 1) * stride + kh_sz)
    wp = max(w + 2 * padding, (wo - 1) * stride + kw_sz)

    x_nhwc = jnp.transpose(x_nchw, (0, 2, 3, 1)).astype(jnp.bfloat16)
    x_p = jnp.pad(x_nhwc, ((0, 0),
                           (padding, hp - h - padding),
                           (padding, wp - w - padding),
                           (0, cinp - c_in)))

    # OIHW -> (KH, KW, Cin, Cout) -> (KH*KW, Cinp, Coutp), matching window order.
    w_t = jnp.transpose(conv_w, (2, 3, 1, 0)).astype(jnp.bfloat16)
    w_p = jnp.pad(w_t, ((0, 0), (0, 0), (0, cinp - c_in), (0, coutp - c_out)))
    w_p = w_p.reshape(kh_sz * kw_sz, cinp, coutp)

    n_tiles = n * num_row_tiles
    matmul_flops = 2 * n * hop * wo * (kh_sz * kw_sz * cinp) * coutp
    x_bytes = n * hp * wp * cinp * 2
    w_bytes = kh_sz * kw_sz * cinp * coutp * 2

    kern_kwargs = dict(tile_h=tile_h, wo=wo, kh_sz=kh_sz, kw_sz=kw_sz,
                       stride=stride)

    # Input: one whole padded image per grid step; index depends only on the
    # batch axis, so it is DMA'd once per image and reused across row tiles.
    x_spec = pl.BlockSpec((None, hp, wp, cinp), lambda i, j: (i, 0, 0, 0))
    # Weights / scale / shift have constant index_maps (loaded once, resident).
    # NOTE: single-buffering them (pipeline_mode=pl.Buffered(1)) would shave a
    # little VMEM, but they are tiny next to the per-image input block.
    w_spec = pl.BlockSpec((kh_sz * kw_sz, cinp, coutp), lambda i, j: (0, 0, 0))

    # ---- Pass 1: per-tile partial per-channel sum / sum-of-squares ---------
    stats = pl.pallas_call(
        functools.partial(_stats_kernel, ho=ho, **kern_kwargs),
        out_shape=jax.ShapeDtypeStruct((n_tiles, 8, coutp), jnp.float32),
        grid_spec=pltpu.PrefetchScalarGridSpec(
            num_scalar_prefetch=0,
            grid=(n, num_row_tiles),
            in_specs=[x_spec, w_spec],
            out_specs=pl.BlockSpec(
                (None, 8, coutp),
                lambda i, j: (i * num_row_tiles + j, 0, 0)),
        ),
        compiler_params=pltpu.CompilerParams(
            dimension_semantics=("parallel", "parallel"),
            vmem_limit_bytes=vmem_limit,
        ),
        cost_estimate=pl.CostEstimate(
            flops=matmul_flops, transcendentals=0,
            bytes_accessed=x_bytes + w_bytes + n_tiles * 8 * coutp * 4),
    )(x_p, w_p)

    # Fold BN (training-mode, biased variance) into per-channel scale / shift.
    # Partial sums are reduced here in f32 (masked padded rows contribute 0).
    r_count = jnp.float32(n * ho * wo)
    ch_sum = jnp.sum(stats[:, 0, :], axis=0)
    ch_sumsq = jnp.sum(stats[:, 1, :], axis=0)
    mean = ch_sum / r_count
    # TODO(synk): E[y^2]-mean^2 can cancel for |mean| >> std; use shifted sums
    #             if a layer exhibits it.
    var = jnp.maximum(ch_sumsq / r_count - mean * mean, 0.0)
    gamma_p = jnp.pad(gamma.astype(jnp.float32), (0, coutp - c_out),
                      constant_values=1.0)
    beta_p = jnp.pad(beta.astype(jnp.float32), (0, coutp - c_out))
    inv_std = lax.rsqrt(var + BN_EPS)
    scale_v = gamma_p * inv_std
    shift_v = beta_p - mean * scale_v
    scale = scale_v.reshape(1, coutp)
    shift = shift_v.reshape(1, coutp)

    # ---- Pass 2: conv (recomputed) + affine + LeakyReLU, bf16 output -------
    out_p = pl.pallas_call(
        functools.partial(_apply_kernel, **kern_kwargs),
        out_shape=jax.ShapeDtypeStruct((n, hop, wo, coutp), jnp.bfloat16),
        grid_spec=pltpu.PrefetchScalarGridSpec(
            num_scalar_prefetch=0,
            grid=(n, num_row_tiles),
            in_specs=[x_spec, w_spec,
                      pl.BlockSpec((1, coutp), lambda i, j: (0, 0)),
                      pl.BlockSpec((1, coutp), lambda i, j: (0, 0))],
            out_specs=pl.BlockSpec((None, tile_h, wo, coutp),
                                   lambda i, j: (i, j, 0, 0)),
        ),
        compiler_params=pltpu.CompilerParams(
            dimension_semantics=("parallel", "parallel"),
            vmem_limit_bytes=vmem_limit,
        ),
        cost_estimate=pl.CostEstimate(
            flops=matmul_flops + 3 * n * hop * wo * coutp, transcendentals=0,
            bytes_accessed=(x_bytes + w_bytes + 2 * coutp * 4
                            + n * hop * wo * coutp * 2)),
    )(x_p, w_p, scale, shift)

    # Strip padding: (N, Hop, Wo, Coutp) -> (N, Ho, Wo, Cout) -> NCHW.
    out = out_p[:, :ho, :, :c_out]
    return jnp.transpose(out, (0, 3, 1, 2))


def _reference_forward(x_nchw, conv_w, gamma, beta, *, stride=1, padding=1):
    """Pure-JAX f32 reference mimicking PyTorch semantics (training-mode BN)."""
    y = lax.conv_general_dilated(
        x_nchw.astype(jnp.float32), conv_w.astype(jnp.float32),
        window_strides=(stride, stride),
        padding=((padding, padding), (padding, padding)),
        dimension_numbers=("NCHW", "OIHW", "NCHW"),
    )
    mean = jnp.mean(y, axis=(0, 2, 3), keepdims=True)
    var = jnp.mean((y - mean) ** 2, axis=(0, 2, 3), keepdims=True)
    y_hat = (y - mean) * lax.rsqrt(var + BN_EPS)
    z = y_hat * gamma.reshape(1, -1, 1, 1) + beta.reshape(1, -1, 1, 1)
    return jnp.where(z > 0, z, LEAKY_SLOPE * z)


if __name__ == "__main__":
    # Module config: CNNBlock(in_channels=4, out_channels=8, kernel_size=3,
    #                         stride=1, padding=1)
    N, C_IN, H, W = 2, 4, 16, 16
    C_OUT, KH, KW = 8, 3, 3
    STRIDE, PADDING = 1, 1

    key = jax.random.PRNGKey(0)
    kx, kw_ = jax.random.split(key)
    x = jax.random.normal(kx, (N, C_IN, H, W), dtype=jnp.float32)

    # Deterministic parameter init (synthetic, Kaiming-like scale for conv).
    fan_in = C_IN * KH * KW
    conv_w = jax.random.normal(kw_, (C_OUT, C_IN, KH, KW),
                               dtype=jnp.float32) * (fan_in ** -0.5)
    gamma = jnp.ones((C_OUT,), dtype=jnp.float32)   # BatchNorm2d default weight
    beta = jnp.zeros((C_OUT,), dtype=jnp.float32)   # BatchNorm2d default bias

    # tile_h=8 -> grid (2 images, 2 row tiles) = 4 pipelined steps at toy size;
    # real layers should leave tile_h=None (auto, VMEM/generation-aware).
    out = cnn_block_forward(x, conv_w, gamma, beta,
                            stride=STRIDE, padding=PADDING, tile_h=8)
    out = jax.block_until_ready(out)

    ref = _reference_forward(x, conv_w, gamma, beta,
                             stride=STRIDE, padding=PADDING)
    assert out.shape == (N, C_OUT, H, W), out.shape
    # bf16 MXU inputs + bf16 output vs the f32 reference -> loose tolerance.
    assert jnp.allclose(out.astype(jnp.float32), ref, atol=3e-2, rtol=3e-2), \
        "mismatch vs reference"

    print("KERNEL_OK")
</pallas_src>

<mosaic_0001>
module attributes {stable_mosaic.version = 11 : i64} {
  func.func @_stats_kernel(%arg0: i32, %arg1: i32, %arg2: memref<1x18x18x8xbf16, #tpu.memory_space<vmem>>, %arg3: memref<9x8x128xbf16, #tpu.memory_space<vmem>>, %arg4: memref<1x8x128xf32, #tpu.memory_space<vmem>>) attributes {dimension_semantics = [#tpu.dimension_semantics<parallel>, #tpu.dimension_semantics<parallel>], iteration_bounds = array<i64: 2, 2>, scalar_prefetch = 0 : i64, scratch_operands = 0 : i64, tpu.core_type = #tpu.core_type<tc>, window_params = [{transform_indices = @transform_0, window_bounds = array<i64: 1, 18, 18, 8>}, {pipeline_mode = #tpu.pipeline_mode<synchronous>, transform_indices = @transform_1, window_bounds = array<i64: 9, 8, 128>}, {transform_indices = @transform_2, window_bounds = array<i64: 1, 8, 128>}]} {
    %c8_i32 = arith.constant 8 : i32
    %0 = arith.muli %arg1, %c8_i32 : i32
    %c1_i32 = arith.constant 1 : i32
    %1 = arith.muli %0, %c1_i32 : i32
    %cst = arith.constant 0.000000e+00 : f32
    %2 = vector.broadcast %cst : f32 to vector<128x128xf32>
    %c0_i32 = arith.constant 0 : i32
    %3 = arith.addi %1, %c0_i32 : i32
    %c0 = arith.constant 0 : index
    %4 = arith.index_cast %3 : i32 to index
    %c0_0 = arith.constant 0 : index
    %c0_1 = arith.constant 0 : index
    %5 = vector.load %arg2[%c0, %4, %c0_0, %c0_1] : memref<1x18x18x8xbf16, #tpu.memory_space<vmem>>, vector<1x8x16x8xbf16>
    %6 = vector.shape_cast %5 : vector<1x8x16x8xbf16> to vector<8x16x8xbf16>
    %7 = vector.shape_cast %6 : vector<8x16x8xbf16> to vector<128x8xbf16>
    %c0_2 = arith.constant 0 : index
    %c0_3 = arith.constant 0 : index
    %c0_4 = arith.constant 0 : index
    %8 = vector.load %arg3[%c0_2, %c0_3, %c0_4] : memref<9x8x128xbf16, #tpu.memory_space<vmem>>, vector<1x8x128xbf16>
    %9 = vector.shape_cast %8 : vector<1x8x128xbf16> to vector<8x128xbf16>
    %cst_5 = arith.constant dense<0.000000e+00> : vector<128x128xf32>
    %10 = tpu.matmul %7, %9, %cst_5 {dimension_numbers = #tpu.dot_dimension_numbers<[1], [0], [0], [1], [0, 0, 1, 1], [], []>} : vector<128x8xbf16>, vector<8x128xbf16>, vector<128x128xf32> -> vector<128x128xf32>
    %11 = arith.addf %2, %10 : vector<128x128xf32>
    %c0_i32_6 = arith.constant 0 : i32
    %12 = arith.addi %1, %c0_i32_6 : i32
    %c0_7 = arith.constant 0 : index
    %13 = arith.index_cast %12 : i32 to index
    %c1 = arith.constant 1 : index
    %c0_8 = arith.constant 0 : index
    %14 = vector.load %arg2[%c0_7, %13, %c1, %c0_8] : memref<1x18x18x8xbf16, #tpu.memory_space<vmem>>, vector<1x8x16x8xbf16>
    %15 = vector.shape_cast %14 : vector<1x8x16x8xbf16> to vector<8x16x8xbf16>
    %16 = vector.shape_cast %15 : vector<8x16x8xbf16> to vector<128x8xbf16>
    %c1_9 = arith.constant 1 : index
    %c0_10 = arith.constant 0 : index
    %c0_11 = arith.constant 0 : index
    %17 = vector.load %arg3[%c1_9, %c0_10, %c0_11] : memref<9x8x128xbf16, #tpu.memory_space<vmem>>, vector<1x8x128xbf16>
    %18 = vector.shape_cast %17 : vector<1x8x128xbf16> to vector<8x128xbf16>
    %cst_12 = arith.constant dense<0.000000e+00> : vector<128x128xf32>
    %19 = tpu.matmul %16, %18, %cst_12 {dimension_numbers = #tpu.dot_dimension_numbers<[1], [0], [0], [1], [0, 0, 1, 1], [], []>} : vector<128x8xbf16>, vector<8x128xbf16>, vector<128x128xf32> -> vector<128x128xf32>
    %20 = arith.addf %11, %19 : vector<128x128xf32>
    %c0_i32_13 = arith.constant 0 : i32
    %21 = arith.addi %1, %c0_i32_13 : i32
    %c0_14 = arith.constant 0 : index
    %22 = arith.index_cast %21 : i32 to index
    %c2 = arith.constant 2 : index
    %c0_15 = arith.constant 0 : index
    %23 = vector.load %arg2[%c0_14, %22, %c2, %c0_15] : memref<1x18x18x8xbf16, #tpu.memory_space<vmem>>, vector<1x8x16x8xbf16>
    %24 = vector.shape_cast %23 : vector<1x8x16x8xbf16> to vector<8x16x8xbf16>
    %25 = vector.shape_cast %24 : vector<8x16x8xbf16> to vector<128x8xbf16>
    %c2_16 = arith.constant 2 : index
    %c0_17 = arith.constant 0 : index
    %c0_18 = arith.constant 0 : index
    %26 = vector.load %arg3[%c2_16, %c0_17, %c0_18] : memref<9x8x128xbf16, #tpu.memory_space<vmem>>, vector<1x8x128xbf16>
    %27 = vector.shape_cast %26 : vector<1x8x128xbf16> to vector<8x128xbf16>
    %cst_19 = arith.constant dense<0.000000e+00> : vector<128x128xf32>
    %28 = tpu.matmul %25, %27, %cst_19 {dimension_numbers = #tpu.dot_dimension_numbers<[1], [0], [0], [1], [0, 0, 1, 1], [], []>} : vector<128x8xbf16>, vector<8x128xbf16>, vector<128x128xf32> -> vector<128x128xf32>
    %29 = arith.addf %20, %28 : vector<128x128xf32>
    %c1_i32_20 = arith.constant 1 : i32
    %30 = arith.addi %1, %c1_i32_20 : i32
    %c0_21 = arith.constant 0 : index
    %31 = arith.index_cast %30 : i32 to index
    %c0_22 = arith.constant 0 : index
    %c0_23 = arith.constant 0 : index
    %32 = vector.load %arg2[%c0_21, %31, %c0_22, %c0_23] : memref<1x18x18x8xbf16, #tpu.memory_space<vmem>>, vector<1x8x16x8xbf16>
    %33 = vector.shape_cast %32 : vector<1x8x16x8xbf16> to vector<8x16x8xbf16>
    %34 = vector.shape_cast %33 : vector<8x16x8xbf16> to vector<128x8xbf16>
    %c3 = arith.constant 3 : index
    %c0_24 = arith.constant 0 : index
    %c0_25 = arith.constant 0 : index
    %35 = vector.load %arg3[%c3, %c0_24, %c0_25] : memref<9x8x128xbf16, #tpu.memory_space<vmem>>, vector<1x8x128xbf16>
    %36 = vector.shape_cast %35 : vector<1x8x128xbf16> to vector<8x128xbf16>
    %cst_26 = arith.constant dense<0.000000e+00> : vector<128x128xf32>
    %37 = tpu.matmul %34, %36, %cst_26 {dimension_numbers = #tpu.dot_dimension_numbers<[1], [0], [0], [1], [0, 0, 1, 1], [], []>} : vector<128x8xbf16>, vector<8x128xbf16>, vector<128x128xf32> -> vector<128x128xf32>
    %38 = arith.addf %29, %37 : vector<128x128xf32>
    %c1_i32_27 = arith.constant 1 : i32
    %39 = arith.addi %1, %c1_i32_27 : i32
    %c0_28 = arith.constant 0 : index
    %40 = arith.index_cast %39 : i32 to index
    %c1_29 = arith.constant 1 : index
    %c0_30 = arith.constant 0 : index
    %41 = vector.load %arg2[%c0_28, %40, %c1_29, %c0_30] : memref<1x18x18x8xbf16, #tpu.memory_space<vmem>>, vector<1x8x16x8xbf16>
    %42 = vector.shape_cast %41 : vector<1x8x16x8xbf16> to vector<8x16x8xbf16>
    %43 = vector.shape_cast %42 : vector<8x16x8xbf16> to vector<128x8xbf16>
    %c4 = arith.constant 4 : index
    %c0_31 = arith.constant 0 : index
    %c0_32 = arith.constant 0 : index
    %44 = vector.load %arg3[%c4, %c0_31, %c0_32] : memref<9x8x128xbf16, #tpu.memory_space<vmem>>, vector<1x8x128xbf16>
    %45 = vector.shape_cast %44 : vector<1x8x128xbf16> to vector<8x128xbf16>
    %cst_33 = arith.constant dense<0.000000e+00> : vector<128x128xf32>
    %46 = tpu.matmul %43, %45, %cst_33 {dimension_numbers = #tpu.dot_dimension_numbers<[1], [0], [0], [1], [0, 0, 1, 1], [], []>} : vector<128x8xbf16>, vector<8x128xbf16>, vector<128x128xf32> -> vector<128x128xf32>
    %47 = arith.addf %38, %46 : vector<128x128xf32>
    %c1_i32_34 = arith.constant 1 : i32
    %48 = arith.addi %1, %c1_i32_34 : i32
    %c0_35 = arith.constant 0 : index
    %49 = arith.index_cast %48 : i32 to index
    %c2_36 = arith.constant 2 : index
    %c0_37 = arith.constant 0 : index
    %50 = vector.load %arg2[%c0_35, %49, %c2_36, %c0_37] : memref<1x18x18x8xbf16, #tpu.memory_space<vmem>>, vector<1x8x16x8xbf16>
    %51 = vector.shape_cast %50 : vector<1x8x16x8xbf16> to vector<8x16x8xbf16>
    %52 = vector.shape_cast %51 : vector<8x16x8xbf16> to vector<128x8xbf16>
    %c5 = arith.constant 5 : index
    %c0_38 = arith.constant 0 : index
    %c0_39 = arith.constant 0 : index
    %53 = vector.load %arg3[%c5, %c0_38, %c0_39] : memref<9x8x128xbf16, #tpu.memory_space<vmem>>, vector<1x8x128xbf16>
    %54 = vector.shape_cast %53 : vector<1x8x128xbf16> to vector<8x128xbf16>
    %cst_40 = arith.constant dense<0.000000e+00> : vector<128x128xf32>
    %55 = tpu.matmul %52, %54, %cst_40 {dimension_numbers = #tpu.dot_dimension_numbers<[1], [0], [0], [1], [0, 0, 1, 1], [], []>} : vector<128x8xbf16>, vector<8x128xbf16>, vector<128x128xf32> -> vector<128x128xf32>
    %56 = arith.addf %47, %55 : vector<128x128xf32>
    %c2_i32 = arith.constant 2 : i32
    %57 = arith.addi %1, %c2_i32 : i32
    %c0_41 = arith.constant 0 : index
    %58 = arith.index_cast %57 : i32 to index
    %c0_42 = arith.constant 0 : index
    %c0_43 = arith.constant 0 : index
    %59 = vector.load %arg2[%c0_41, %58, %c0_42, %c0_43] : memref<1x18x18x8xbf16, #tpu.memory_space<vmem>>, vector<1x8x16x8xbf16>
    %60 = vector.shape_cast %59 : vector<1x8x16x8xbf16> to vector<8x16x8xbf16>
    %61 = vector.shape_cast %60 : vector<8x16x8xbf16> to vector<128x8xbf16>
    %c6 = arith.constant 6 : index
    %c0_44 = arith.constant 0 : index
    %c0_45 = arith.constant 0 : index
    %62 = vector.load %arg3[%c6, %c0_44, %c0_45] : memref<9x8x128xbf16, #tpu.memory_space<vmem>>, vector<1x8x128xbf16>
    %63 = vector.shape_cast %62 : vector<1x8x128xbf16> to vector<8x128xbf16>
    %cst_46 = arith.constant dense<0.000000e+00> : vector<128x128xf32>
    %64 = tpu.matmul %61, %63, %cst_46 {dimension_numbers = #tpu.dot_dimension_numbers<[1], [0], [0], [1], [0, 0, 1, 1], [], []>} : vector<128x8xbf16>, vector<8x128xbf16>, vector<128x128xf32> -> vector<128x128xf32>
    %65 = arith.addf %56, %64 : vector<128x128xf32>
    %c2_i32_47 = arith.constant 2 : i32
    %66 = arith.addi %1, %c2_i32_47 : i32
    %c0_48 = arith.constant 0 : index
    %67 = arith.index_cast %66 : i32 to index
    %c1_49 = arith.constant 1 : index
    %c0_50 = arith.constant 0 : index
    %68 = vector.load %arg2[%c0_48, %67, %c1_49, %c0_50] : memref<1x18x18x8xbf16, #tpu.memory_space<vmem>>, vector<1x8x16x8xbf16>
    %69 = vector.shape_cast %68 : vector<1x8x16x8xbf16> to vector<8x16x8xbf16>
    %70 = vector.shape_cast %69 : vector<8x16x8xbf16> to vector<128x8xbf16>
    %c7 = arith.constant 7 : index
    %c0_51 = arith.constant 0 : index
    %c0_52 = arith.constant 0 : index
    %71 = vector.load %arg3[%c7, %c0_51, %c0_52] : memref<9x8x128xbf16, #tpu.memory_space<vmem>>, vector<1x8x128xbf16>
    %72 = vector.shape_cast %71 : vector<1x8x128xbf16> to vector<8x128xbf16>
    %cst_53 = arith.constant dense<0.000000e+00> : vector<128x128xf32>
    %73 = tpu.matmul %70, %72, %cst_53 {dimension_numbers = #tpu.dot_dimension_numbers<[1], [0], [0], [1], [0, 0, 1, 1], [], []>} : vector<128x8xbf16>, vector<8x128xbf16>, vector<128x128xf32> -> vector<128x128xf32>
    %74 = arith.addf %65, %73 : vector<128x128xf32>
    %c2_i32_54 = arith.constant 2 : i32
    %75 = arith.addi %1, %c2_i32_54 : i32
    %c0_55 = arith.constant 0 : index
    %76 = arith.index_cast %75 : i32 to index
    %c2_56 = arith.constant 2 : index
    %c0_57 = arith.constant 0 : index
    %77 = vector.load %arg2[%c0_55, %76, %c2_56, %c0_57] : memref<1x18x18x8xbf16, #tpu.memory_space<vmem>>, vector<1x8x16x8xbf16>
    %78 = vector.shape_cast %77 : vector<1x8x16x8xbf16> to vector<8x16x8xbf16>
    %79 = vector.shape_cast %78 : vector<8x16x8xbf16> to vector<128x8xbf16>
    %c8 = arith.constant 8 : index
    %c0_58 = arith.constant 0 : index
    %c0_59 = arith.constant 0 : index
    %80 = vector.load %arg3[%c8, %c0_58, %c0_59] : memref<9x8x128xbf16, #tpu.memory_space<vmem>>, vector<1x8x128xbf16>
    %81 = vector.shape_cast %80 : vector<1x8x128xbf16> to vector<8x128xbf16>
    %cst_60 = arith.constant dense<0.000000e+00> : vector<128x128xf32>
    %82 = tpu.matmul %79, %81, %cst_60 {dimension_numbers = #tpu.dot_dimension_numbers<[1], [0], [0], [1], [0, 0, 1, 1], [], []>} : vector<128x8xbf16>, vector<8x128xbf16>, vector<128x128xf32> -> vector<128x128xf32>
    %83 = arith.addf %74, %82 : vector<128x128xf32>
    %c8_i32_61 = arith.constant 8 : i32
    %84 = arith.muli %arg1, %c8_i32_61 : i32
    %c16_i32 = arith.constant 16 : i32
    %85 = arith.subi %c16_i32, %84 : i32
    %c8_i32_62 = arith.constant 8 : i32
    %86 = arith.minsi %c8_i32_62, %85 : i32
    %c16_i32_63 = arith.constant 16 : i32
    %87 = arith.muli %86, %c16_i32_63 : i32
    %88 = tpu.iota {dimensions = array<i32: 0>} : vector<128x1xi32>
    %89 = vector.broadcast %87 : i32 to vector<128x1xi32>
    %90 = arith.cmpi slt, %88, %89 : vector<128x1xi32>
    %cst_64 = arith.constant 0.000000e+00 : f32
    %91 = vector.shape_cast %90 : vector<128x1xi1> to vector<128x1xi1>
    %92 = vector.broadcast %91 : vector<128x1xi1> to vector<128x128xi1>
    %93 = vector.broadcast %cst_64 : f32 to vector<128x128xf32>
    %94 = arith.select %92, %83, %93 : vector<128x128xi1>, vector<128x128xf32>
    %cst_65 = arith.constant dense<0.000000e+00> : vector<128xf32>
    %95 = vector.multi_reduction <add>, %94, %cst_65 [0] : vector<128x128xf32> to vector<128xf32>
    %96 = vector.shape_cast %95 : vector<128xf32> to vector<1x128xf32>
    %97 = arith.mulf %94, %94 : vector<128x128xf32>
    %cst_66 = arith.constant dense<0.000000e+00> : vector<128xf32>
    %98 = vector.multi_reduction <add>, %97, %cst_66 [0] : vector<128x128xf32> to vector<128xf32>
    %99 = vector.shape_cast %98 : vector<128xf32> to vector<1x128xf32>
    %cst_67 = arith.constant 0.000000e+00 : f32
    %100 = vector.broadcast %cst_67 : f32 to vector<6x128xf32>
    %101 = tpu.concatenate %96, %99, %100 in 0 : vector<1x128xf32>, vector<1x128xf32>, vector<6x128xf32> -> vector<8x128xf32>
    %c0_68 = arith.constant 0 : index
    %c0_69 = arith.constant 0 : index
    %c0_70 = arith.constant 0 : index
    %102 = vector.load %arg4[%c0_68, %c0_69, %c0_70] : memref<1x8x128xf32, #tpu.memory_space<vmem>>, vector<1x8x128xf32>
    %103 = vector.shape_cast %102 : vector<1x8x128xf32> to vector<8x128xf32>
    %104 = vector.shape_cast %101 : vector<8x128xf32> to vector<1x8x128xf32>
    tpu.vector_store %arg4[%c0_68, %c0_69, %c0_70], %104 {strides = array<i32>} : memref<1x8x128xf32, #tpu.memory_space<vmem>>, vector<1x8x128xf32>,
    return
  }
  func.func @transform_0(%arg0: i32, %arg1: i32) -> (i32, i32, i32, i32) {
    %c0_i32 = arith.constant 0 : i32
    %c0_i32_0 = arith.constant 0 : i32
    %c0_i32_1 = arith.constant 0 : i32
    %c0_i32_2 = arith.constant 0 : i32
    return %arg0, %c0_i32, %c0_i32_0, %c0_i32_1 : i32, i32, i32, i32
  }
  func.func @transform_1(%arg0: i32, %arg1: i32) -> (i32, i32, i32) {
    %c0_i32 = arith.constant 0 : i32
    %c0_i32_0 = arith.constant 0 : i32
    %c0_i32_1 = arith.constant 0 : i32
    %c0_i32_2 = arith.constant 0 : i32
    return %c0_i32, %c0_i32_0, %c0_i32_1 : i32, i32, i32
  }
  func.func @transform_2(%arg0: i32, %arg1: i32) -> (i32, i32, i32) {
    %c2_i32 = arith.constant 2 : i32
    %0 = arith.muli %arg0, %c2_i32 : i32
    %1 = arith.addi %0, %arg1 : i32
    %c0_i32 = arith.constant 0 : i32
    %c0_i32_0 = arith.constant 0 : i32
    %c0_i32_1 = arith.constant 0 : i32
    return %1, %c0_i32, %c0_i32_0 : i32, i32, i32
  }
}

module attributes {stable_mosaic.version = 11 : i64} {
  func.func @_apply_kernel(%arg0: i32, %arg1: i32, %arg2: memref<1x18x18x8xbf16, #tpu.memory_space<vmem>>, %arg3: memref<9x8x128xbf16, #tpu.memory_space<vmem>>, %arg4: memref<1x128xf32, #tpu.memory_space<vmem>>, %arg5: memref<1x128xf32, #tpu.memory_space<vmem>>, %arg6: memref<1x8x16x128xbf16, #tpu.memory_space<vmem>>) attributes {dimension_semantics = [#tpu.dimension_semantics<parallel>, #tpu.dimension_semantics<parallel>], iteration_bounds = array<i64: 2, 2>, scalar_prefetch = 0 : i64, scratch_operands = 0 : i64, tpu.core_type = #tpu.core_type<tc>, window_params = [{transform_indices = @transform_0, window_bounds = array<i64: 1, 18, 18, 8>}, {pipeline_mode = #tpu.pipeline_mode<synchronous>, transform_indices = @transform_1, window_bounds = array<i64: 9, 8, 128>}, {pipeline_mode = #tpu.pipeline_mode<synchronous>, transform_indices = @transform_2, window_bounds = array<i64: 1, 128>}, {pipeline_mode = #tpu.pipeline_mode<synchronous>, transform_indices = @transform_3, window_bounds = array<i64: 1, 128>}, {transform_indices = @transform_4, window_bounds = array<i64: 1, 8, 16, 128>}]} {
    %c8_i32 = arith.constant 8 : i32
    %0 = arith.muli %arg1, %c8_i32 : i32
    %c1_i32 = arith.constant 1 : i32
    %1 = arith.muli %0, %c1_i32 : i32
    %cst = arith.constant 0.000000e+00 : f32
    %2 = vector.broadcast %cst : f32 to vector<128x128xf32>
    %c0_i32 = arith.constant 0 : i32
    %3 = arith.addi %1, %c0_i32 : i32
    %c0 = arith.constant 0 : index
    %4 = arith.index_cast %3 : i32 to index
    %c0_0 = arith.constant 0 : index
    %c0_1 = arith.constant 0 : index
    %5 = vector.load %arg2[%c0, %4, %c0_0, %c0_1] : memref<1x18x18x8xbf16, #tpu.memory_space<vmem>>, vector<1x8x16x8xbf16>
    %6 = vector.shape_cast %5 : vector<1x8x16x8xbf16> to vector<8x16x8xbf16>
    %7 = vector.shape_cast %6 : vector<8x16x8xbf16> to vector<128x8xbf16>
    %c0_2 = arith.constant 0 : index
    %c0_3 = arith.constant 0 : index
    %c0_4 = arith.constant 0 : index
    %8 = vector.load %arg3[%c0_2, %c0_3, %c0_4] : memref<9x8x128xbf16, #tpu.memory_space<vmem>>, vector<1x8x128xbf16>
    %9 = vector.shape_cast %8 : vector<1x8x128xbf16> to vector<8x128xbf16>
    %cst_5 = arith.constant dense<0.000000e+00> : vector<128x128xf32>
    %10 = tpu.matmul %7, %9, %cst_5 {dimension_numbers = #tpu.dot_dimension_numbers<[1], [0], [0], [1], [0, 0, 1, 1], [], []>} : vector<128x8xbf16>, vector<8x128xbf16>, vector<128x128xf32> -> vector<128x128xf32>
    %11 = arith.addf %2, %10 : vector<128x128xf32>
    %c0_i32_6 = arith.constant 0 : i32
    %12 = arith.addi %1, %c0_i32_6 : i32
    %c0_7 = arith.constant 0 : index
    %13 = arith.index_cast %12 : i32 to index
    %c1 = arith.constant 1 : index
    %c0_8 = arith.constant 0 : index
    %14 = vector.load %arg2[%c0_7, %13, %c1, %c0_8] : memref<1x18x18x8xbf16, #tpu.memory_space<vmem>>, vector<1x8x16x8xbf16>
    %15 = vector.shape_cast %14 : vector<1x8x16x8xbf16> to vector<8x16x8xbf16>
    %16 = vector.shape_cast %15 : vector<8x16x8xbf16> to vector<128x8xbf16>
    %c1_9 = arith.constant 1 : index
    %c0_10 = arith.constant 0 : index
    %c0_11 = arith.constant 0 : index
    %17 = vector.load %arg3[%c1_9, %c0_10, %c0_11] : memref<9x8x128xbf16, #tpu.memory_space<vmem>>, vector<1x8x128xbf16>
    %18 = vector.shape_cast %17 : vector<1x8x128xbf16> to vector<8x128xbf16>
    %cst_12 = arith.constant dense<0.000000e+00> : vector<128x128xf32>
    %19 = tpu.matmul %16, %18, %cst_12 {dimension_numbers = #tpu.dot_dimension_numbers<[1], [0], [0], [1], [0, 0, 1, 1], [], []>} : vector<128x8xbf16>, vector<8x128xbf16>, vector<128x128xf32> -> vector<128x128xf32>
    %20 = arith.addf %11, %19 : vector<128x128xf32>
    %c0_i32_13 = arith.constant 0 : i32
    %21 = arith.addi %1, %c0_i32_13 : i32
    %c0_14 = arith.constant 0 : index
    %22 = arith.index_cast %21 : i32 to index
    %c2 = arith.constant 2 : index
    %c0_15 = arith.constant 0 : index
    %23 = vector.load %arg2[%c0_14, %22, %c2, %c0_15] : memref<1x18x18x8xbf16, #tpu.memory_space<vmem>>, vector<1x8x16x8xbf16>
    %24 = vector.shape_cast %23 : vector<1x8x16x8xbf16> to vector<8x16x8xbf16>
    %25 = vector.shape_cast %24 : vector<8x16x8xbf16> to vector<128x8xbf16>
    %c2_16 = arith.constant 2 : index
    %c0_17 = arith.constant 0 : index
    %c0_18 = arith.constant 0 : index
    %26 = vector.load %arg3[%c2_16, %c0_17, %c0_18] : memref<9x8x128xbf16, #tpu.memory_space<vmem>>, vector<1x8x128xbf16>
    %27 = vector.shape_cast %26 : vector<1x8x128xbf16> to vector<8x128xbf16>
    %cst_19 = arith.constant dense<0.000000e+00> : vector<128x128xf32>
    %28 = tpu.matmul %25, %27, %cst_19 {dimension_numbers = #tpu.dot_dimension_numbers<[1], [0], [0], [1], [0, 0, 1, 1], [], []>} : vector<128x8xbf16>, vector<8x128xbf16>, vector<128x128xf32> -> vector<128x128xf32>
    %29 = arith.addf %20, %28 : vector<128x128xf32>
    %c1_i32_20 = arith.constant 1 : i32
    %30 = arith.addi %1, %c1_i32_20 : i32
    %c0_21 = arith.constant 0 : index
    %31 = arith.index_cast %30 : i32 to index
    %c0_22 = arith.constant 0 : index
    %c0_23 = arith.constant 0 : index
    %32 = vector.load %arg2[%c0_21, %31, %c0_22, %c0_23] : memref<1x18x18x8xbf16, #tpu.memory_space<vmem>>, vector<1x8x16x8xbf16>
    %33 = vector.shape_cast %32 : vector<1x8x16x8xbf16> to vector<8x16x8xbf16>
    %34 = vector.shape_cast %33 : vector<8x16x8xbf16> to vector<128x8xbf16>
    %c3 = arith.constant 3 : index
    %c0_24 = arith.constant 0 : index
    %c0_25 = arith.constant 0 : index
    %35 = vector.load %arg3[%c3, %c0_24, %c0_25] : memref<9x8x128xbf16, #tpu.memory_space<vmem>>, vector<1x8x128xbf16>
    %36 = vector.shape_cast %35 : vector<1x8x128xbf16> to vector<8x128xbf16>
    %cst_26 = arith.constant dense<0.000000e+00> : vector<128x128xf32>
    %37 = tpu.matmul %34, %36, %cst_26 {dimension_numbers = #tpu.dot_dimension_numbers<[1], [0], [0], [1], [0, 0, 1, 1], [], []>} : vector<128x8xbf16>, vector<8x128xbf16>, vector<128x128xf32> -> vector<128x128xf32>
    %38 = arith.addf %29, %37 : vector<128x128xf32>
    %c1_i32_27 = arith.constant 1 : i32
    %39 = arith.addi %1, %c1_i32_27 : i32
    %c0_28 = arith.constant 0 : index
    %40 = arith.index_cast %39 : i32 to index
    %c1_29 = arith.constant 1 : index
    %c0_30 = arith.constant 0 : index
    %41 = vector.load %arg2[%c0_28, %40, %c1_29, %c0_30] : memref<1x18x18x8xbf16, #tpu.memory_space<vmem>>, vector<1x8x16x8xbf16>
    %42 = vector.shape_cast %41 : vector<1x8x16x8xbf16> to vector<8x16x8xbf16>
    %43 = vector.shape_cast %42 : vector<8x16x8xbf16> to vector<128x8xbf16>
    %c4 = arith.constant 4 : index
    %c0_31 = arith.constant 0 : index
    %c0_32 = arith.constant 0 : index
    %44 = vector.load %arg3[%c4, %c0_31, %c0_32] : memref<9x8x128xbf16, #tpu.memory_space<vmem>>, vector<1x8x128xbf16>
    %45 = vector.shape_cast %44 : vector<1x8x128xbf16> to vector<8x128xbf16>
    %cst_33 = arith.constant dense<0.000000e+00> : vector<128x128xf32>
    %46 = tpu.matmul %43, %45, %cst_33 {dimension_numbers = #tpu.dot_dimension_numbers<[1], [0], [0], [1], [0, 0, 1, 1], [], []>} : vector<128x8xbf16>, vector<8x128xbf16>, vector<128x128xf32> -> vector<128x128xf32>
    %47 = arith.addf %38, %46 : vector<128x128xf32>
    %c1_i32_34 = arith.constant 1 : i32
    %48 = arith.addi %1, %c1_i32_34 : i32
    %c0_35 = arith.constant 0 : index
    %49 = arith.index_cast %48 : i32 to index
    %c2_36 = arith.constant 2 : index
    %c0_37 = arith.constant 0 : index
    %50 = vector.load %arg2[%c0_35, %49, %c2_36, %c0_37] : memref<1x18x18x8xbf16, #tpu.memory_space<vmem>>, vector<1x8x16x8xbf16>
    %51 = vector.shape_cast %50 : vector<1x8x16x8xbf16> to vector<8x16x8xbf16>
    %52 = vector.shape_cast %51 : vector<8x16x8xbf16> to vector<128x8xbf16>
    %c5 = arith.constant 5 : index
    %c0_38 = arith.constant 0 : index
    %c0_39 = arith.constant 0 : index
    %53 = vector.load %arg3[%c5, %c0_38, %c0_39] : memref<9x8x128xbf16, #tpu.memory_space<vmem>>, vector<1x8x128xbf16>
    %54 = vector.shape_cast %53 : vector<1x8x128xbf16> to vector<8x128xbf16>
    %cst_40 = arith.constant dense<0.000000e+00> : vector<128x128xf32>
    %55 = tpu.matmul %52, %54, %cst_40 {dimension_numbers = #tpu.dot_dimension_numbers<[1], [0], [0], [1], [0, 0, 1, 1], [], []>} : vector<128x8xbf16>, vector<8x128xbf16>, vector<128x128xf32> -> vector<128x128xf32>
    %56 = arith.addf %47, %55 : vector<128x128xf32>
    %c2_i32 = arith.constant 2 : i32
    %57 = arith.addi %1, %c2_i32 : i32
    %c0_41 = arith.constant 0 : index
    %58 = arith.index_cast %57 : i32 to index
    %c0_42 = arith.constant 0 : index
    %c0_43 = arith.constant 0 : index
    %59 = vector.load %arg2[%c0_41, %58, %c0_42, %c0_43] : memref<1x18x18x8xbf16, #tpu.memory_space<vmem>>, vector<1x8x16x8xbf16>
    %60 = vector.shape_cast %59 : vector<1x8x16x8xbf16> to vector<8x16x8xbf16>
    %61 = vector.shape_cast %60 : vector<8x16x8xbf16> to vector<128x8xbf16>
    %c6 = arith.constant 6 : index
    %c0_44 = arith.constant 0 : index
    %c0_45 = arith.constant 0 : index
    %62 = vector.load %arg3[%c6, %c0_44, %c0_45] : memref<9x8x128xbf16, #tpu.memory_space<vmem>>, vector<1x8x128xbf16>
    %63 = vector.shape_cast %62 : vector<1x8x128xbf16> to vector<8x128xbf16>
    %cst_46 = arith.constant dense<0.000000e+00> : vector<128x128xf32>
    %64 = tpu.matmul %61, %63, %cst_46 {dimension_numbers = #tpu.dot_dimension_numbers<[1], [0], [0], [1], [0, 0, 1, 1], [], []>} : vector<128x8xbf16>, vector<8x128xbf16>, vector<128x128xf32> -> vector<128x128xf32>
    %65 = arith.addf %56, %64 : vector<128x128xf32>
    %c2_i32_47 = arith.constant 2 : i32
    %66 = arith.addi %1, %c2_i32_47 : i32
    %c0_48 = arith.constant 0 : index
    %67 = arith.index_cast %66 : i32 to index
    %c1_49 = arith.constant 1 : index
    %c0_50 = arith.constant 0 : index
    %68 = vector.load %arg2[%c0_48, %67, %c1_49, %c0_50] : memref<1x18x18x8xbf16, #tpu.memory_space<vmem>>, vector<1x8x16x8xbf16>
    %69 = vector.shape_cast %68 : vector<1x8x16x8xbf16> to vector<8x16x8xbf16>
    %70 = vector.shape_cast %69 : vector<8x16x8xbf16> to vector<128x8xbf16>
    %c7 = arith.constant 7 : index
    %c0_51 = arith.constant 0 : index
    %c0_52 = arith.constant 0 : index
    %71 = vector.load %arg3[%c7, %c0_51, %c0_52] : memref<9x8x128xbf16, #tpu.memory_space<vmem>>, vector<1x8x128xbf16>
    %72 = vector.shape_cast %71 : vector<1x8x128xbf16> to vector<8x128xbf16>
    %cst_53 = arith.constant dense<0.000000e+00> : vector<128x128xf32>
    %73 = tpu.matmul %70, %72, %cst_53 {dimension_numbers = #tpu.dot_dimension_numbers<[1], [0], [0], [1], [0, 0, 1, 1], [], []>} : vector<128x8xbf16>, vector<8x128xbf16>, vector<128x128xf32> -> vector<128x128xf32>
    %74 = arith.addf %65, %73 : vector<128x128xf32>
    %c2_i32_54 = arith.constant 2 : i32
    %75 = arith.addi %1, %c2_i32_54 : i32
    %c0_55 = arith.constant 0 : index
    %76 = arith.index_cast %75 : i32 to index
    %c2_56 = arith.constant 2 : index
    %c0_57 = arith.constant 0 : index
    %77 = vector.load %arg2[%c0_55, %76, %c2_56, %c0_57] : memref<1x18x18x8xbf16, #tpu.memory_space<vmem>>, vector<1x8x16x8xbf16>
    %78 = vector.shape_cast %77 : vector<1x8x16x8xbf16> to vector<8x16x8xbf16>
    %79 = vector.shape_cast %78 : vector<8x16x8xbf16> to vector<128x8xbf16>
    %c8 = arith.constant 8 : index
    %c0_58 = arith.constant 0 : index
    %c0_59 = arith.constant 0 : index
    %80 = vector.load %arg3[%c8, %c0_58, %c0_59] : memref<9x8x128xbf16, #tpu.memory_space<vmem>>, vector<1x8x128xbf16>
    %81 = vector.shape_cast %80 : vector<1x8x128xbf16> to vector<8x128xbf16>
    %cst_60 = arith.constant dense<0.000000e+00> : vector<128x128xf32>
    %82 = tpu.matmul %79, %81, %cst_60 {dimension_numbers = #tpu.dot_dimension_numbers<[1], [0], [0], [1], [0, 0, 1, 1], [], []>} : vector<128x8xbf16>, vector<8x128xbf16>, vector<128x128xf32> -> vector<128x128xf32>
    %83 = arith.addf %74, %82 : vector<128x128xf32>
    %c0_61 = arith.constant 0 : index
    %c0_62 = arith.constant 0 : index
    %84 = vector.load %arg4[%c0_61, %c0_62] : memref<1x128xf32, #tpu.memory_space<vmem>>, vector<1x128xf32>
    %85 = vector.broadcast %84 : vector<1x128xf32> to vector<128x128xf32>
    %86 = arith.mulf %83, %85 : vector<128x128xf32>
    %c0_63 = arith.constant 0 : index
    %c0_64 = arith.constant 0 : index
    %87 = vector.load %arg5[%c0_63, %c0_64] : memref<1x128xf32, #tpu.memory_space<vmem>>, vector<1x128xf32>
    %88 = vector.broadcast %87 : vector<1x128xf32> to vector<128x128xf32>
    %89 = arith.addf %86, %88 : vector<128x128xf32>
    %cst_65 = arith.constant 1.000000e-01 : f32
    %90 = vector.broadcast %cst_65 : f32 to vector<128x128xf32>
    %91 = arith.mulf %90, %89 : vector<128x128xf32>
    %92 = arith.maximumf %89, %91 : vector<128x128xf32>
    %93 = vector.shape_cast %92 : vector<128x128xf32> to vector<8x16x128xf32>
    %94 = arith.truncf %93 : vector<8x16x128xf32> to vector<8x16x128xbf16>
    %c0_66 = arith.constant 0 : index
    %c0_67 = arith.constant 0 : index
    %c0_68 = arith.constant 0 : index
    %c0_69 = arith.constant 0 : index
    %95 = vector.load %arg6[%c0_66, %c0_67, %c0_68, %c0_69] : memref<1x8x16x128xbf16, #tpu.memory_space<vmem>>, vector<1x8x16x128xbf16>
    %96 = vector.shape_cast %95 : vector<1x8x16x128xbf16> to vector<8x16x128xbf16>
    %97 = vector.shape_cast %94 : vector<8x16x128xbf16> to vector<1x8x16x128xbf16>
    tpu.vector_store %arg6[%c0_66, %c0_67, %c0_68, %c0_69], %97 {strides = array<i32>} : memref<1x8x16x128xbf16, #tpu.memory_space<vmem>>, vector<1x8x16x128xbf16>,
    return
  }
  func.func @transform_0(%arg0: i32, %arg1: i32) -> (i32, i32, i32, i32) {
    %c0_i32 = arith.constant 0 : i32
    %c0_i32_0 = arith.constant 0 : i32
    %c0_i32_1 = arith.constant 0 : i32
    %c0_i32_2 = arith.constant 0 : i32
    return %arg0, %c0_i32, %c0_i32_0, %c0_i32_1 : i32, i32, i32, i32
  }
  func.func @transform_1(%arg0: i32, %arg1: i32) -> (i32, i32, i32) {
    %c0_i32 = arith.constant 0 : i32
    %c0_i32_0 = arith.constant 0 : i32
    %c0_i32_1 = arith.constant 0 : i32
    %c0_i32_2 = arith.constant 0 : i32
    return %c0_i32, %c0_i32_0, %c0_i32_1 : i32, i32, i32
  }
  func.func @transform_2(%arg0: i32, %arg1: i32) -> (i32, i32) {
    %c0_i32 = arith.constant 0 : i32
    %c0_i32_0 = arith.constant 0 : i32
    %c0_i32_1 = arith.constant 0 : i32
    return %c0_i32, %c0_i32_0 : i32, i32
  }
  func.func @transform_3(%arg0: i32, %arg1: i32) -> (i32, i32) {
    %c0_i32 = arith.constant 0 : i32
    %c0_i32_0 = arith.constant 0 : i32
    %c0_i32_1 = arith.constant 0 : i32
    return %c0_i32, %c0_i32_0 : i32, i32
  }
  func.func @transform_4(%arg0: i32, %arg1: i32) -> (i32, i32, i32, i32) {
    %c0_i32 = arith.constant 0 : i32
    %c0_i32_0 = arith.constant 0 : i32
    %c0_i32_1 = arith.constant 0 : i32
    return %arg0, %arg1, %c0_i32, %c0_i32_0 : i32, i32, i32, i32
  }
}

</mosaic_0001>

<bundles_post_ra>
// kernel: cnn_block_forward.3
= control target key start
LH: loop header
LB: loop body
LE: loop exit
PB: predicated region body
PF: predicated region fallthrough
CT: control target
= control target key end

     0   :  { %s2959_s15 = smov 0   ;;  %s2961_s16 = smov 0   ;;  %s3805_s0 = inlined_call_operand.vmem [shape: bf16[2,18,18,8], index: 0, kind: input, shape index: {}]   ;;  %s3806_s1 = inlined_call_operand.vmem [shape: bf16[9,8,128], index: 1, kind: input, shape index: {}]   ;;  %s3807_s2 = inlined_call_operand.vmem [shape: f32[1,128], index: 2, kind: input, shape index: {}]   ;;  %s3808_s3 = inlined_call_operand.vmem [shape: f32[1,128], index: 3, kind: input, shape index: {}]   ;;  %s3809_s4 = inlined_call_operand.vmem [shape: bf16[2,16,16,128], index: 4, kind: output, shape index: {}]  }
   0x1   :  { %s2963_s17 = smov 0   ;;  %s2965_s18 = smov 0  }
   0x2   :  { %s2967_s19 = smov 0  }
   0x3 LB: > { %s23_s20 = sadd.s32 1, %s2924_s17  ;;  %s26_s21 = sadd.s32 1, %s2928_s18  ;;  %s2932_s19 = sphi %s2967_s19, %s14_s19   ;;  %s2928_s18 = sphi %s2965_s18, %s3817_s18   ;;  %s2924_s17 = sphi %s2963_s17, %s3816_s17   ;;  %s2920_s16 = sphi %s2961_s16, %s3815_s16   ;;  %s2916_s15 = sphi %s2959_s15, %s3814_s15  }
   0x4   : > { %p24_p0 = scmp.ge.s32.totalorder %s23_s20, 2  ;;  %p2465_p1 = scmp.ge.s32.totalorder %s2932_s19, 1 }
   0x5   : > { %p176_p2 = scmp.lt.s32.totalorder %s2932_s19, 5 }
   0x6   : > { %s3819_s20 = smov (%p24_p0, %s23_s20), 0  ;;  %s3821_s21 = smov (!%p24_p0, %s26_s21), %s2928_s18 }
   0x7   : > { %p177_p3 = pnand %p2465_p1, %p176_p2  ;;  %p28_p4 = scmp.ge.s32.totalorder %s3821_s21, 2 }
   0x8   : > { %p207_p5 = scmp.lt.s32.totalorder (!%p177_p3), %s2920_s16, 1  ;;  %s2776_s26 = smul.u32 (!%p177_p3), 96, %s2916_s15 }
   0x9   : > { %s3823_s21 = smov (%p28_p4, %s3821_s21), 0  ;;  %180 = sbr.rel (%p177_p3) target bundleno = 472 (0x1d8), region = 36 }
   0xe   : > { %v2474_v0 = vld [vmem:[%s3806_s1 + $0x4] sm:$0xf]  ;;  %vm499_vm0 = vcmask 1043456   ;;  %s3825_s16 = smov (!%p207_p5, %s2920_s16), 1  ;;  %v2531_v2 = vld [vmem:[%s3806_s1 + $0x8] sm:$0xf] }
   0xf   : > { %v501_v1 = vsel %vm499_vm0, %v2474_v0, 0  ;;  %v802_v3 = vsel %vm499_vm0, %v2531_v2, 0  ;;  %s2851_s27 = smul.u32 216, %s3825_s16  ;;  %v2558_v4 = vld [vmem:[%s3806_s1 + $0xc] sm:$0xf]  ;;  %vm474_vm3 = vcmask 64512  }
  0x10   : > { %2848 = vmatpush.bf16.msra.mxu1 %v501_v1  ;;  %2849 = vmatpush.bf16.msra.mxu2 %v501_v1  ;;  %v244_v5 = vld [vmem:[%s3806_s1] sm:$0xf]  ;;  %v956_v6 = vsel %vm499_vm0, %v2558_v4, 0  ;;  %v2623_v8 = vld [vmem:[%s3806_s1 + $0x10] sm:$0xf]  ;;  %vm692_vm5 = vcmask 1042432  }
  0x11   : > { %2850 = vmatpush.bf16.msra.mxu3 %v501_v1  ;;  %510 = vmatpush.bf16.msra.mxu0 %v501_v1  ;;  %v617_v7 = vsel %vm499_vm0, %v244_v5, 0  ;;  %s211_s10 = scalar_lea.vmem %s3805_s0, %s2851_s27  ;;  %v1290_v9 = vsel %vm499_vm0, %v2623_v8, 0  ;;  %vm253_vm1 = vsmask.f32 3328  ;;  %vm254_vm2 = vsmask.f32 7440 }
  0x12   : > { %s3018_s11 = scalar_lea.vmem %s211_s10, %s2776_s26  ;;  %vm3046_vm4 = vmor %vm253_vm1, %vm254_vm2  ;;  %vm693_vm6 = vcmask 1046532   ;;  %s2467_s27 = sshll.u32 %s2916_s15, 3 }
  0x13   : > { %v232_v10 = vld [vmem:[%s3018_s11 + $0x18] sm:$0xf]  ;;  %v3022_v11 = vld [vmem:[%s3018_s11 + $0x1c] sm:$0xf]  ;;  %v3025_v12 = vld [vmem:[%s3018_s11 + $0x20] sm:$0x1] }
  0x14   : > { %811 = vmatpush.bf16.msrb.mxu2 %v802_v3  ;;  %626 = vmatpush.bf16.msrb.mxu1 %v617_v7  ;;  %v305_v13 = vshrl.u32 %v232_v10, 16  ;;  %v308_v14 = vshll.u32 %v232_v10, 16  ;;  %v314_v15 = vshll.u32 %v3022_v11, 16  ;;  %v318_v16 = vshrl.u32 %v3022_v11, 16  ;;  %v236_v17 = vld [vmem:[%s3018_s11 + $0x30] sm:$0xf]  ;;  %vm3154_vm7 = vmor %vm692_vm5, %vm693_vm6 }
  0x15   : > { %965 = vmatpush.bf16.msrb.mxu3 %v956_v6  ;;  %1299 = vmatpush.bf16.msrb.mxu0 %v1290_v9  ;;  %v324_v18 = vshll.u32 %v3025_v12, 16  ;;  %v3032_v19 = vld [vmem:[%s3018_s11 + $0x34] sm:$0xf]  ;;  %v3035_v20 = vld [vmem:[%s3018_s11 + $0x38] sm:$0x1]  ;;  %v353_v21 = vshrl.u32 %v236_v17, 16 }
  0x16   : > { %v307_v22 = vrot.slane %v305_v13, 4  ;;  %v310_v23 = vrot.slane %v308_v14, 5  ;;  %v316_v24 = vrot.slane %v314_v15, 5  ;;  %v320_v25 = vrot.slane %v318_v16, 4  ;;  %v240_v26 = vld [vmem:[%s3018_s11 + $0x48] sm:$0xf] }
  0x17   : > { %v326_v27 = vrot.slane %v324_v18, 5  ;;  %v355_v28 = vrot.slane %v353_v21, 4  ;;  %v356_v29 = vshll.u32 %v236_v17, 16  ;;  %v362_v30 = vshll.u32 %v3032_v19, 16  ;;  %v3042_v35 = vld [vmem:[%s3018_s11 + $0x4c] sm:$0xf] }
  0x18   : > { %v311_v31 = vor.u32 %v310_v23, %v307_v22  ;;  %v321_v32 = vor.u32 %v320_v25, %v316_v24  ;;  %v366_v33 = vshrl.u32 %v3032_v19, 16  ;;  %v372_v34 = vshll.u32 %v3035_v20, 16  ;;  %v3051_v46 = vld [vmem:[%s3018_s11 + $0x50] sm:$0x1]  ;;  %v228_v54 = vld [vmem:[%s3018_s11] sm:$0xf] }
  0x19   : > { %v358_v37 = vrot.slane %v356_v29, 5  ;;  %v364_v38 = vrot.slane %v362_v30, 5  ;;  %v401_v39 = vshrl.u32 %v240_v26, 16  ;;  %v404_v40 = vshll.u32 %v240_v26, 16  ;;  %v3064_v2 = vld [vmem:[%s3018_s11 + $0x4] sm:$0xf] }
  0x1a   : > { %v312_v41 = vrot.slane %v311_v31, 4  ;;  %v322_v42 = vrot.slane %v321_v32, 4  ;;  %v368_v43 = vrot.slane %v366_v33, 4  ;;  %v374_v44 = vrot.slane %v372_v34, 5  ;;  %v3069_v8 = vld [vmem:[%s3018_s11 + $0x8] sm:$0x1] }
  0x1b   : > { %v359_v45 = vor.u32 %v358_v37, %v355_v28  ;;  %v403_v47 = vrot.slane %v401_v39, 4  ;;  %v406_v48 = vrot.slane %v404_v40, 5  ;;  %v410_v49 = vshll.u32 %v3042_v35, 16  ;;  %v234_v15 = vld [vmem:[%s3018_s11 + $0x24] sm:$0xf]  ;;  %p215_p6 = scmp.lt.s32.totalorder %s2467_s27, 15 }
  0x1c   : > { %v317_v50 = vsel %vm3046_vm4, %v312_v41, %v316_v24  ;;  %v327_v51 = vsel %vm3046_vm4, %v322_v42, %v326_v27  ;;  %v369_v52 = vor.u32 %v368_v43, %v364_v38  ;;  %v414_v53 = vshrl.u32 %v3042_v35, 16  ;;  %v3080_v26 = vld [vmem:[%s3018_s11 + $0x28] sm:$0xf]  ;;  %v3085_v30 = vld [vmem:[%s3018_s11 + $0x2c] sm:$0x1]  ;;  %s2469_s6 = sshll.u32 %s3825_s16, 5 }
  0x1d   : > { %v454_v55 = vunpack.c.l.b16 %v317_v50  ;;  %v455_v56 = vunpack.c.l.b16 %v327_v51  ;;  %v360_v57 = vrot.slane %v359_v45, 4  ;;  %v407_v58 = vor.u32 %v406_v48, %v403_v47  ;;  %v3093_v51 = vld [vmem:[%s3018_s11 + $0x40] sm:$0xf]  ;;  %s3827_s27 = smov (!%p215_p6, %s2467_s27), 15 }
  0x1e   : > { %v370_v59 = vrot.slane %v369_v52, 4  ;;  %v412_v60 = vrot.slane %v410_v49, 5  ;;  %v416_v61 = vrot.slane %v414_v53, 4  ;;  %v420_v62 = vshll.u32 %v3051_v46, 16  ;;  %s2468_s15 = sshll.u32 %s3827_s27, 1 }
  0x1f   : > { %v468_v63 = vpack.c.b16 %v455_v56, %v454_v55  ;;  %v365_v0 = vsel %vm3046_vm4, %v360_v57, %v364_v38  ;;  %v408_v1 = vrot.slane %v407_v58, 4  ;;  %v257_v3 = vshrl.u32 %v228_v54, 16  ;;  %v238_v38 = vld [vmem:[%s3018_s11 + $0x3c] sm:$0xf]  ;;  %v3099_v56 = vld [vmem:[%s3018_s11 + $0x44] sm:$0x1]  ;;  %s219_s7 = sadd.s32 %s2469_s6, %s2468_s15 }
  0x20   : > { %v375_v4 = vsel %vm3046_vm4, %v370_v59, %v374_v44  ;;  %v458_v5 = vunpack.c.l.b16 %v365_v0  ;;  %v417_v6 = vor.u32 %v416_v61, %v412_v60  ;;  %v422_v7 = vrot.slane %v420_v62, 5  ;;  %v242_v58 = vld [vmem:[%s3018_s11 + $0x54] sm:$0xf]  ;;  %s2470_s8 = sshll.u32 %s219_s7, 2 }
  0x21   : > { %2477 = vmatmul.msk.bf16.vlgmr.msra.gmra.mxu1 %vm474_vm3, %v468_v63  ;;  %v459_v9 = vunpack.c.l.b16 %v375_v4  ;;  %v413_v10 = vsel %vm3046_vm4, %v408_v1, %v412_v60  ;;  %v259_v13 = vrot.slane %v257_v3, 4  ;;  %v260_v14 = vshll.u32 %v228_v54, 16  ;;  %s3740_s10 = scalar_lea.vmem %s3809_s4, %s2470_s8 }
  0x22   : > { %v418_v16 = vrot.slane %v417_v6, 4  ;;  %v462_v17 = vunpack.c.l.b16 %v413_v10  ;;  %v266_v18 = vshll.u32 %v3064_v2, 16  ;;  %v270_v21 = vshrl.u32 %v3064_v2, 16 }
  0x23   : > { %v470_v22 = vpack.c.b16 %v459_v9, %v458_v5  ;;  %v262_v23 = vrot.slane %v260_v14, 5  ;;  %v276_v24 = vshll.u32 %v3069_v8, 16  ;;  %v700_v25 = vrot.slane %v3069_v8, 5 }
  0x24   : > { %v423_v27 = vsel %vm3046_vm4, %v418_v16, %v422_v7  ;;  %v268_v28 = vrot.slane %v266_v18, 5  ;;  %v272_v29 = vrot.slane %v270_v21, 4  ;;  %v329_v31 = vshrl.u32 %v234_v15, 16  ;;  %v3113_v16 = vld [vmem:[%s3018_s11 + $0x5c] sm:$0x1] }
  0x25   : > { %2479 = vmatmul.msk.bf16.vlgmr.msra.gmra.mxu2 %vm474_vm3, %v470_v22  ;;  %v463_v32 = vunpack.c.l.b16 %v423_v27  ;;  %v263_v33 = vor.u32 %v262_v23, %v259_v13  ;;  %v278_v34 = vrot.slane %v276_v24, 5  ;;  %v332_v37 = vshll.u32 %v234_v15, 16  ;;  %v3110_v15 = vld [vmem:[%s3018_s11 + $0x58] sm:$0xf]  ;;  %v230_v23 = vld [vmem:[%s3018_s11 + $0xc] sm:$0xf] }
  0x26   : > { %v273_v39 = vor.u32 %v272_v29, %v268_v28  ;;  %v331_v40 = vrot.slane %v329_v31, 4  ;;  %v338_v41 = vshll.u32 %v3080_v26, 16  ;;  %v342_v42 = vshrl.u32 %v3080_v26, 16 }
  0x27   : > { %v472_v43 = vpack.c.b16 %v463_v32, %v462_v17  ;;  %v264_v44 = vrot.slane %v263_v33, 4  ;;  %v334_v45 = vrot.slane %v332_v37, 5  ;;  %v348_v47 = vshll.u32 %v3085_v30, 16 }
  0x28   : > { %v274_v48 = vrot.slane %v273_v39, 4  ;;  %v340_v49 = vrot.slane %v338_v41, 5  ;;  %v344_v50 = vrot.slane %v342_v42, 4  ;;  %v377_v52 = vshrl.u32 %v238_v38, 16 }
  0x29   : > { %2481 = vmatmul.msk.bf16.vlgmr.msra.gmra.mxu3 %vm474_vm3, %v472_v43  ;;  %v269_v53 = vsel %vm3046_vm4, %v264_v44, %v268_v28  ;;  %v335_v54 = vor.u32 %v334_v45, %v331_v40  ;;  %v350_v55 = vrot.slane %v348_v47, 5  ;;  %v380_v57 = vshll.u32 %v238_v38, 16  ;;  %v3125_v40 = vld [vmem:[%s3018_s11 + $0x10] sm:$0xf]  ;;  %v3128_v47 = vld [vmem:[%s3018_s11 + $0x14] sm:$0x1] }
  0x2a   : > { %v279_v59 = vsel %vm3046_vm4, %v274_v48, %v278_v34  ;;  %v450_v60 = vunpack.c.l.b16 %v269_v53  ;;  %v345_v61 = vor.u32 %v344_v50, %v340_v49  ;;  %v379_v62 = vrot.slane %v377_v52, 4 }
  0x2b   : > { %v451_v63 = vunpack.c.l.b16 %v279_v59  ;;  %v336_v0 = vrot.slane %v335_v54, 4  ;;  %v382_v1 = vrot.slane %v380_v57, 5  ;;  %v386_v3 = vshll.u32 %v3093_v51, 16 }
  0x2c   : > { %v346_v4 = vrot.slane %v345_v61, 4  ;;  %v390_v5 = vshrl.u32 %v3093_v51, 16  ;;  %v396_v6 = vshll.u32 %v3099_v56, 16  ;;  %v425_v7 = vshrl.u32 %v242_v58, 16 }
  0x2d   : > { %v466_v9 = vpack.c.b16 %v451_v63, %v450_v60  ;;  %v341_v10 = vsel %vm3046_vm4, %v336_v0, %v340_v49  ;;  %v383_v13 = vor.u32 %v382_v1, %v379_v62  ;;  %v388_v14 = vrot.slane %v386_v3, 5  ;;  %v668_v1 = vld [vmem:[%s3018_s11] sm:$0xe] }
  0x2e   : > { %v351_v17 = vsel %vm3046_vm4, %v346_v4, %v350_v55  ;;  %v456_v18 = vunpack.c.l.b16 %v341_v10  ;;  %v392_v21 = vrot.slane %v390_v5, 4  ;;  %v398_v22 = vrot.slane %v396_v6, 5 }
  0x2f   : > { %2475 = vmatmul.msk.bf16.vlgmr.msra.gmra.mxu0 %vm474_vm3, %v466_v9  ;;  %v457_v24 = vunpack.c.l.b16 %v351_v17  ;;  %v384_v27 = vrot.slane %v383_v13, 4  ;;  %v427_v28 = vrot.slane %v425_v7, 4  ;;  %v428_v29 = vshll.u32 %v242_v58, 16  ;;  %v2675_v7 = vld [vmem:[%s3806_s1 + $0x18] sm:$0xf] }
  0x30   : > { %v393_v31 = vor.u32 %v392_v21, %v388_v14  ;;  %v434_v32 = vshll.u32 %v3110_v15, 16  ;;  %v438_v33 = vshrl.u32 %v3110_v15, 16  ;;  %v444_v34 = vshll.u32 %v3113_v16, 16  ;;  %v2599_v9 = vld [vmem:[%s3018_s11 + $0xc] sm:$0xf] }
  0x31   : > { %v469_v37 = vpack.c.b16 %v457_v24, %v456_v18  ;;  %v389_v38 = vsel %vm3046_vm4, %v384_v27, %v388_v14  ;;  %v430_v39 = vrot.slane %v428_v29, 5  ;;  %v281_v41 = vshrl.u32 %v230_v23, 16  ;;  %v3149_v27 = vld [vmem:[%s3018_s11 + $0x10] sm:$0xf] }
  0x32   : > { %v394_v42 = vrot.slane %v393_v31, 4  ;;  %v460_v43 = vunpack.c.l.b16 %v389_v38  ;;  %v436_v44 = vrot.slane %v434_v32, 5  ;;  %v440_v45 = vrot.slane %v438_v33, 4 }
  0x33   : > { %2478 = vmatmul.msk.bf16.gmra.mxu1 %vm474_vm3, %v469_v37  ;;  %v431_v48 = vor.u32 %v430_v39, %v427_v28  ;;  %v446_v49 = vrot.slane %v444_v34, 5  ;;  %v283_v50 = vrot.slane %v281_v41, 4  ;;  %v284_v52 = vshll.u32 %v230_v23, 16  ;;  %v3159_v37 = vld [vmem:[%s3018_s11 + $0x14] sm:$0x1] }
  0x34   : > { %v399_v53 = vsel %vm3046_vm4, %v394_v42, %v398_v22  ;;  %v441_v54 = vor.u32 %v440_v45, %v436_v44  ;;  %v290_v55 = vshll.u32 %v3125_v40, 16  ;;  %v294_v57 = vshrl.u32 %v3125_v40, 16  ;;  %v2740_v41 = vld [vmem:[%s3806_s1 + $0x1c] sm:$0xf]  ;;  %v2648_v45 = vld [vmem:[%s3806_s1 + $0x14] sm:$0xf] }
  0x35   : > { %v461_v58 = vunpack.c.l.b16 %v399_v53  ;;  %v432_v59 = vrot.slane %v431_v48, 4  ;;  %v286_v60 = vrot.slane %v284_v52, 5  ;;  %v300_v61 = vshll.u32 %v3128_v47, 16  ;;  %v2765_v53 = vld [vmem:[%s3806_s1 + $0x20] sm:$0xf] }
  0x36   : > { %v442_v62 = vrot.slane %v441_v54, 4  ;;  %v292_v63 = vrot.slane %v290_v55, 5  ;;  %v296_v0 = vrot.slane %v294_v57, 4  ;;  %v2523_v21 = vrot.slane %v668_v1, 9  ;;  %v2777_v55 = vld [vmem:[%s3018_s11] sm:$0xff] }
  0x37   : > { %v471_v3 = vpack.c.b16 %v461_v58, %v460_v43  ;;  %v437_v4 = vsel %vm3046_vm4, %v432_v59, %v436_v44  ;;  %v287_v5 = vor.u32 %v286_v60, %v283_v50  ;;  %v302_v6 = vrot.slane %v300_v61, 5 }
  0x38   : > { %v447_v10 = vsel %vm3046_vm4, %v442_v62, %v446_v49  ;;  %v464_v13 = vunpack.c.l.b16 %v437_v4  ;;  %v297_v14 = vor.u32 %v296_v0, %v292_v63  ;;  %v697_v22 = vrot.slane %v3064_v2, 5  ;;  %v3190_v4 = vld [vmem:[%s3018_s11 + $0x1c] sm:$0xf] }
  0x39   : > { %2480 = vmatmul.msk.bf16.gmra.mxu2 %vm474_vm3, %v471_v3  ;;  %v465_v17 = vunpack.c.l.b16 %v447_v10  ;;  %v288_v18 = vrot.slane %v287_v5, 4  ;;  %v1650_v24 = vsel %vm499_vm0, %v2675_v7, 0  ;;  %v1048_v28 = vshrl.u32 %v2599_v9, 16  ;;  %v2602_v3 = vld [vmem:[%s3018_s11 + $0x18] sm:$0xf] }
  0x3a   : > { %v298_v23 = vrot.slane %v297_v14, 4  ;;  %v1051_v29 = vshll.u32 %v2599_v9, 16  ;;  %v699_v34 = vrot.slane %v697_v22, 4  ;;  %1659 = vmatpush.bf16.msra.mxu2 %v1650_v24  ;;  %v1057_v44 = vshll.u32 %v3149_v27, 16  ;;  %v670_v5 = vld [vmem:[%s3018_s11 + $0x18] sm:$0xe] }
  0x3b   : > { %v473_v31 = vpack.c.b16 %v465_v17, %v464_v13  ;;  %v293_v32 = vsel %vm3046_vm4, %v288_v18, %v292_v63  ;;  %v1050_v39 = vrot.slane %v1048_v28, 4  ;;  %v698_v48 = vsel %vm3154_vm7, %v2523_v21, %v697_v22  ;;  %v669_v7 = vld [vmem:[%s3018_s11 + $0xc] sm:$0xe] }
  0x3c   : > { %v303_v2 = vsel %vm3046_vm4, %v298_v23, %v302_v6  ;;  %v452_v38 = vunpack.c.l.b16 %v293_v32  ;;  %v1053_v43 = vrot.slane %v1051_v29, 5  ;;  %v701_v49 = vsel %vm3154_vm7, %v699_v34, %v700_v25  ;;  %v2785_v34 = vld [vmem:[%s3018_s11 + $0xc] sm:$0xff] }
  0x3d   : > { %2482 = vmatmul.msk.bf16.gmra.mxu3 %vm474_vm3, %v473_v31  ;;  %v453_v42 = vunpack.c.l.b16 %v303_v2  ;;  %v1061_v50 = vshrl.u32 %v3149_v27, 16  ;;  %v1067_v52 = vshll.u32 %v3159_v37, 16  ;;  %v1059_v58 = vrot.slane %v1057_v44, 5 }
  0x3e   : > { %v1054_v57 = vor.u32 %v1053_v43, %v1050_v39  ;;  %v1984_v59 = vsel %vm499_vm0, %v2740_v41, 0  ;;  %v1496_v25 = vsel %vm499_vm0, %v2648_v45, 0  ;;  %v753_v60 = vunpack.c.l.b16 %v698_v48 }
  0x3f   : > { %v467_v54 = vpack.c.b16 %v453_v42, %v452_v38  ;;  %v1063_v8 = vrot.slane %v1061_v50, 4  ;;  %1993 = vmatpush.bf16.msra.mxu3 %v1984_v59  ;;  %v754_v61 = vunpack.c.l.b16 %v701_v49  ;;  %1505 = vmatpush.bf16.msra.mxu1 %v1496_v25  ;;  %v2190_v63 = vsel %vm499_vm0, %v2765_v53, 0 }
  0x40   : > { %v1055_v62 = vrot.slane %v1054_v57, 4  ;;  %v1069_v1 = vrot.slane %v1067_v52, 5  ;;  %2199 = vmatpush.bf16.msra.mxu0 %v2190_v63  ;;  %v704_v9 = vrot.slane %v3125_v40, 5  ;;  %v1072_v14 = vshrl.u32 %v2602_v3, 16  ;;  %v671_v63 = vld [vmem:[%s3018_s11 + $0x24] sm:$0xe] }
  0x41   : > { %2476 = vmatmul.msk.bf16.gmra.mxu0 %vm474_vm3, %v467_v54  ;;  %v1064_v0 = vor.u32 %v1063_v8, %v1059_v58  ;;  %v769_v10 = vpack.c.b16 %v754_v61, %v753_v60  ;;  %v1075_v17 = vshll.u32 %v2602_v3, 16  ;;  %v1081_v21 = vshll.u32 %v3190_v4, 16  ;;  %v2605_v61 = vld [vmem:[%s3018_s11 + $0x24] sm:$0xf] }
  0x42   : > { %v1060_v13 = vsel %vm3046_vm4, %v1055_v62, %v1059_v58  ;;  %v1085_v22 = vshrl.u32 %v3190_v4, 16  ;;  %v2525_v23 = vrot.slane %v670_v5, 9  ;;  %v2524_v24 = vrot.slane %v669_v7, 9  ;;  %v3224_v62 = vld [vmem:[%s3018_s11 + $0x28] sm:$0xf] }
  0x43   : > { %2515 = vmatmul.msk.bf16.vlgmr.msrb.gmra.mxu1 %vm474_vm3, %v2777_v55  ;;  %v1065_v6 = vrot.slane %v1064_v0, 4  ;;  %v711_v28 = vrot.slane %v3022_v11, 5  ;;  %v1241_v40 = vunpack.c.l.b16 %v1060_v13  ;;  %v706_v29 = vrot.slane %v704_v9, 4  ;;  %v3209_v11 = vld [vmem:[%s3018_s11 + $0x20] sm:$0x1]  ;;  %v2778_v55 = vld [vmem:[%s3018_s11 + $0xc] sm:$0xff] }
  0x44   : > { %v707_v31 = vrot.slane %v3128_v47, 5  ;;  %v714_v32 = vrot.slane %v3025_v12, 5  ;;  %v1074_v38 = vrot.slane %v1072_v14, 4  ;;  %v1077_v39 = vrot.slane %v1075_v17, 5 }
  0x45   : > { %v1070_v18 = vsel %vm3046_vm4, %v1065_v6, %v1069_v1  ;;  %v712_v41 = vsel %vm3154_vm7, %v2525_v23, %v711_v28  ;;  %v1083_v42 = vrot.slane %v1081_v21, 5  ;;  %v1087_v43 = vrot.slane %v1085_v22, 4  ;;  %v2786_v22 = vld [vmem:[%s3018_s11 + $0x18] sm:$0xff] }
  0x46   : > { %v1242_v2 = vunpack.c.l.b16 %v1070_v18  ;;  %v713_v44 = vrot.slane %v711_v28, 4  ;;  %v757_v45 = vunpack.c.l.b16 %v712_v41  ;;  %v705_v47 = vsel %vm3154_vm7, %v2524_v24, %v704_v9 }
  0x47   : > { %v708_v49 = vsel %vm3154_vm7, %v706_v29, %v707_v31  ;;  %v1078_v50 = vor.u32 %v1077_v39, %v1074_v38  ;;  %v1088_v53 = vor.u32 %v1087_v43, %v1083_v42  ;;  %v1091_v54 = vshll.u32 %v3209_v11, 16  ;;  %v2608_v43 = vld [vmem:[%s3018_s11 + $0x30] sm:$0xf] }
  0x48   : > { %v715_v12 = vsel %vm3154_vm7, %v713_v44, %v714_v32  ;;  %v1257_v48 = vpack.c.b16 %v1242_v2, %v1241_v40  ;;  %v755_v58 = vunpack.c.l.b16 %v705_v47  ;;  %v756_v59 = vunpack.c.l.b16 %v708_v49  ;;  %v3250_v44 = vld [vmem:[%s3018_s11 + $0x34] sm:$0xf] }
  0x49   : > { %2532 = vmatmul.msk.bf16.vlgmr.msrb.gmra.mxu2 %vm474_vm3, %v769_v10  ;;  %v758_v52 = vunpack.c.l.b16 %v715_v12  ;;  %v1079_v8 = vrot.slane %v1078_v50, 4  ;;  %v1089_v25 = vrot.slane %v1088_v53, 4  ;;  %v1093_v60 = vrot.slane %v1091_v54, 5 }
  0x4a   : > { %v718_v0 = vrot.slane %v3080_v26, 5  ;;  %v721_v1 = vrot.slane %v3085_v30, 5  ;;  %v770_v3 = vpack.c.b16 %v756_v59, %v755_v58  ;;  %v2526_v5 = vrot.slane %v671_v63, 9  ;;  %v3262_v63 = vld [vmem:[%s3018_s11 + $0x38] sm:$0x1] }
  0x4b   : > { %v771_v57 = vpack.c.b16 %v758_v52, %v757_v45  ;;  %v1084_v6 = vsel %vm3046_vm4, %v1079_v8, %v1083_v42  ;;  %v1096_v7 = vshrl.u32 %v2605_v61, 16  ;;  %v1099_v9 = vshll.u32 %v2605_v61, 16  ;;  %v2779_v42 = vld [vmem:[%s3018_s11 + $0x18] sm:$0xff] }
  0x4c   : > { %v720_v10 = vrot.slane %v718_v0, 4  ;;  %v1094_v13 = vsel %vm3046_vm4, %v1089_v25, %v1093_v60  ;;  %v1105_v14 = vshll.u32 %v3224_v62, 16  ;;  %v1109_v17 = vshrl.u32 %v3224_v62, 16  ;;  %v2787_v25 = vld [vmem:[%s3018_s11 + $0x24] sm:$0xff] }
  0x4d   : > { %2591 = vmatmul.msk.bf16.vlgmr.msrb.gmra.mxu3 %vm474_vm3, %v2785_v34  ;;  %v719_v26 = vsel %vm3154_vm7, %v2526_v5, %v718_v0  ;;  %v1243_v23 = vunpack.c.l.b16 %v1084_v6  ;;  %v1244_v24 = vunpack.c.l.b16 %v1094_v13  ;;  %v1098_v28 = vrot.slane %v1096_v7, 4  ;;  %v3242_v34 = vld [vmem:[%s3018_s11 + $0x2c] sm:$0x1]  ;;  %v2780_v6 = vld [vmem:[%s3018_s11 + $0x24] sm:$0xff]  ;;  %v3270_v13 = vld [vmem:[%s3018_s11 + $0x40] sm:$0xf] }
  0x4e   : > { %v722_v30 = vsel %vm3154_vm7, %v720_v10, %v721_v1  ;;  %v759_v18 = vunpack.c.l.b16 %v719_v26  ;;  %v1101_v40 = vrot.slane %v1099_v9, 5  ;;  %v1107_v29 = vrot.slane %v1105_v14, 5  ;;  %v672_v26 = vld [vmem:[%s3018_s11 + $0x30] sm:$0xe] }
  0x4f   : > { %v760_v21 = vunpack.c.l.b16 %v722_v30  ;;  %v1111_v31 = vrot.slane %v1109_v17, 4  ;;  %v1258_v2 = vpack.c.b16 %v1244_v24, %v1243_v23  ;;  %v1115_v41 = vshll.u32 %v3242_v34, 16 }
  0x50   : > { %v1102_v38 = vor.u32 %v1101_v40, %v1098_v28  ;;  %v1123_v49 = vshll.u32 %v2608_v43, 16  ;;  %v1129_v50 = vshll.u32 %v3250_v44, 16  ;;  %v1133_v52 = vshrl.u32 %v3250_v44, 16 }
  0x51   : > { %2624 = vmatmul.msk.bf16.vlgmr.msrb.gmra.mxu0 %vm474_vm3, %v1257_v48  ;;  %v772_v32 = vpack.c.b16 %v760_v21, %v759_v18  ;;  %v1112_v39 = vor.u32 %v1111_v31, %v1107_v29  ;;  %v1117_v12 = vrot.slane %v1115_v41, 5  ;;  %v1120_v48 = vshrl.u32 %v2608_v43, 16  ;;  %v3285_v43 = vld [vmem:[%s3018_s11 + $0x44] sm:$0x1] }
  0x52   : > { %v1103_v45 = vrot.slane %v1102_v38, 4  ;;  %v1125_v58 = vrot.slane %v1123_v49, 5  ;;  %v1131_v59 = vrot.slane %v1129_v50, 5  ;;  %v1135_v8 = vrot.slane %v1133_v52, 4  ;;  %v2781_v49 = vld [vmem:[%s3018_s11 + $0x30] sm:$0xff] }
  0x53   : > { %2516 = vmatmul.msk.bf16.gmra.mxu1 %vm474_vm3, %v2778_v55  ;;  %v1113_v47 = vrot.slane %v1112_v39, 4  ;;  %v1122_v55 = vrot.slane %v1120_v48, 4  ;;  %v1153_v21 = vshll.u32 %v3270_v13, 16  ;;  %v725_v23 = vrot.slane %v3032_v19, 5 }
  0x54   : > { %v1108_v53 = vsel %vm3046_vm4, %v1103_v45, %v1107_v29  ;;  %v1136_v1 = vor.u32 %v1135_v8, %v1131_v59  ;;  %v2527_v40 = vrot.slane %v672_v26, 9  ;;  %v2788_v29 = vld [vmem:[%s3018_s11 + $0x30] sm:$0xff] }
  0x55   : > { %v1118_v54 = vsel %vm3046_vm4, %v1113_v47, %v1117_v12  ;;  %v1245_v60 = vunpack.c.l.b16 %v1108_v53  ;;  %v1126_v0 = vor.u32 %v1125_v58, %v1122_v55  ;;  %v1155_v38 = vrot.slane %v1153_v21, 5  ;;  %v2614_v55 = vld [vmem:[%s3018_s11 + $0x48] sm:$0xf]  ;;  %v3298_v58 = vld [vmem:[%s3018_s11 + $0x4c] sm:$0xf] }
  0x56   : > { %v1246_v61 = vunpack.c.l.b16 %v1118_v54  ;;  %v1137_v9 = vrot.slane %v1136_v1, 4  ;;  %v727_v41 = vrot.slane %v725_v23, 4  ;;  %v726_v19 = vsel %vm3154_vm7, %v2527_v40, %v725_v23  ;;  %v2782_v40 = vld [vmem:[%s3018_s11 + $0x3c] sm:$0xff] }
  0x57   : > { %v1127_v7 = vrot.slane %v1126_v0, 4  ;;  %v1163_v12 = vshll.u32 %v3285_v43, 16  ;;  %v1168_v0 = vshrl.u32 %v2614_v55, 16  ;;  %v1171_v1 = vshll.u32 %v2614_v55, 16 }
  0x58   : > { %v1259_v5 = vpack.c.b16 %v1246_v61, %v1245_v60  ;;  %v732_v60 = vrot.slane %v3093_v51, 5  ;;  %v673_v61 = vld [vmem:[%s3018_s11 + $0x3c] sm:$0xe] }
  0x59   : > { %2533 = vmatmul.msk.bf16.gmra.mxu2 %vm474_vm3, %v770_v3  ;;  %v1139_v3 = vshll.u32 %v3262_v63, 16  ;;  %v1132_v14 = vsel %vm3046_vm4, %v1127_v7, %v1131_v59  ;;  %v1165_v54 = vrot.slane %v1163_v12, 5  ;;  %v2789_v7 = vld [vmem:[%s3018_s11 + $0x3c] sm:$0xff]  ;;  %v1173_v51 = vrot.slane %v1171_v1, 5 }
  0x5a   : > { %v1247_v24 = vunpack.c.l.b16 %v1132_v14  ;;  %v735_v14 = vrot.slane %v3099_v56, 5  ;;  %v3339_v1 = vld [vmem:[%s3018_s11 + $0x5c] sm:$0x1] }
  0x5b   : > { %v1141_v10 = vrot.slane %v1139_v3, 5  ;;  %v1177_v3 = vshll.u32 %v3298_v58, 16 }
  0x5d   : > { %2592 = vmatmul.msk.bf16.gmra.mxu3 %vm474_vm3, %v2786_v22  ;;  %v1142_v17 = vsel %vm3046_vm4, %v1137_v9, %v1141_v10  ;;  %v1157_v22 = vshrl.u32 %v3270_v13, 16  ;;  %v2528_v10 = vrot.slane %v673_v61, 9  ;;  %v1179_v26 = vrot.slane %v1177_v3, 5 }
  0x5e   : > { %v1248_v28 = vunpack.c.l.b16 %v1142_v17  ;;  %v1170_v17 = vrot.slane %v1168_v0, 4  ;;  %v742_v61 = vrot.slane %v3051_v46, 5  ;;  %v1211_v46 = vshll.u32 %v3339_v1, 16 }
  0x5f   : > { %v1159_v39 = vrot.slane %v1157_v22, 4  ;;  %v733_v22 = vsel %vm3154_vm7, %v2528_v10, %v732_v60  ;;  %v2783_v10 = vld [vmem:[%s3018_s11 + $0x48] sm:$0xff] }
  0x60   : > { %v1260_v45 = vpack.c.b16 %v1248_v28, %v1247_v24  ;;  %v1174_v24 = vor.u32 %v1173_v51, %v1170_v17 }
  0x61   : > { %2625 = vmatmul.msk.bf16.gmra.mxu0 %vm474_vm3, %v1258_v2  ;;  %v1160_v47 = vor.u32 %v1159_v39, %v1155_v38 }
  0x63   : > { %2517 = vmatmul.msk.bf16.gmra.mxu1 %vm474_vm3, %v2779_v42  ;;  %v728_v42 = vrot.slane %v3035_v20, 5  ;;  %v761_v20 = vunpack.c.l.b16 %v726_v19  ;;  %v1161_v53 = vrot.slane %v1160_v47, 4 }
  0x65   : > { %v729_v48 = vsel %vm3154_vm7, %v727_v41, %v728_v42  ;;  %v3324_v42 = vld [vmem:[%s3018_s11 + $0x58] sm:$0xf] }
  0x66   : > { %v762_v50 = vunpack.c.l.b16 %v729_v48  ;;  %v1201_v47 = vshll.u32 %v3324_v42, 16 }
  0x68   : > { %v773_v59 = vpack.c.b16 %v762_v50, %v761_v20  ;;  %v1205_v20 = vshrl.u32 %v3324_v42, 16  ;;  %v674_v50 = vld [vmem:[%s3018_s11 + $0x48] sm:$0xe] }
  0x69   : > { %2534 = vmatmul.msk.bf16.gmra.mxu2 %vm474_vm3, %v771_v57  ;;  %v2611_v57 = vld [vmem:[%s3018_s11 + $0x3c] sm:$0xf] }
  0x6a   : > { %v1144_v30 = vshrl.u32 %v2611_v57, 16  ;;  %v1147_v18 = vshll.u32 %v2611_v57, 16  ;;  %v734_v57 = vrot.slane %v732_v60, 4  ;;  %v1207_v0 = vrot.slane %v1205_v20, 4 }
  0x6c   : > { %v1146_v31 = vrot.slane %v1144_v30, 4  ;;  %v1149_v2 = vrot.slane %v1147_v18, 5  ;;  %v3312_v18 = vld [vmem:[%s3018_s11 + $0x50] sm:$0x1]  ;;  %v736_v23 = vsel %vm3154_vm7, %v734_v57, %v735_v14 }
  0x6d   : > { %2593 = vmatmul.msk.bf16.gmra.mxu3 %vm474_vm3, %v2787_v25  ;;  %v1166_v25 = vsel %vm3046_vm4, %v1161_v53, %v1165_v54  ;;  %v1187_v56 = vshll.u32 %v3312_v18, 16  ;;  %v2790_v54 = vld [vmem:[%s3018_s11 + $0x48] sm:$0xff] }
  0x6e   : > { %v1250_v9 = vunpack.c.l.b16 %v1166_v25  ;;  %v2529_v25 = vrot.slane %v674_v50, 9  ;;  %v3372_v50 = vld [vmem:[%s3018_s11 + $0x68] sm:$0x1] }
  0x6f   : > { %v1189_v41 = vrot.slane %v1187_v56, 5 }
  0x71   : > { %2626 = vmatmul.msk.bf16.gmra.mxu0 %vm474_vm3, %v1259_v5  ;;  %v1181_v5 = vshrl.u32 %v3298_v58, 16 }
  0x73   : > { %2518 = vmatmul.msk.bf16.gmra.mxu1 %vm474_vm3, %v2780_v6  ;;  %v1183_v30 = vrot.slane %v1181_v5, 4 }
  0x75   : > { %v1184_v28 = vor.u32 %v1183_v30, %v1179_v26  ;;  %v2620_v30 = vld [vmem:[%s3018_s11 + $0x60] sm:$0xf] }
  0x77   : > { %v1185_v39 = vrot.slane %v1184_v28, 4  ;;  %v1219_v28 = vshll.u32 %v2620_v30, 16 }
  0x79   : > { %2535 = vmatmul.msk.bf16.gmra.mxu2 %vm474_vm3, %v772_v32  ;;  %v1150_v32 = vor.u32 %v1149_v2, %v1146_v31  ;;  %v764_v31 = vunpack.c.l.b16 %v736_v23  ;;  %v2617_v2 = vld [vmem:[%s3018_s11 + $0x54] sm:$0xf]  ;;  %v1190_v48 = vsel %vm3046_vm4, %v1185_v39, %v1189_v41 }
  0x7a   : > { %v1195_v19 = vshll.u32 %v2617_v2, 16 }
  0x7b   : > { %v1151_v52 = vrot.slane %v1150_v32, 4 }
  0x7c   : > { %v1197_v53 = vrot.slane %v1195_v19, 5 }
  0x7d   : > { %2594 = vmatmul.msk.bf16.gmra.mxu3 %vm474_vm3, %v2788_v29  ;;  %v1156_v8 = vsel %vm3046_vm4, %v1151_v52, %v1155_v38  ;;  %v763_v29 = vunpack.c.l.b16 %v733_v22  ;;  %v1175_v38 = vrot.slane %v1174_v24, 4  ;;  %v1216_v24 = vshrl.u32 %v2620_v30, 16 }
  0x7e   : > { %v1249_v6 = vunpack.c.l.b16 %v1156_v8  ;;  %v1203_v8 = vrot.slane %v1201_v47, 5  ;;  %v1221_v47 = vrot.slane %v1219_v28, 5 }
  0x7f   : > { %v774_v32 = vpack.c.b16 %v764_v31, %v763_v29  ;;  %v1180_v12 = vsel %vm3046_vm4, %v1175_v38, %v1179_v26  ;;  %v1213_v26 = vrot.slane %v1211_v46, 5  ;;  %v746_v31 = vrot.slane %v3110_v15, 5  ;;  %v675_v38 = vld [vmem:[%s3018_s11 + $0x54] sm:$0xe] }
  0x80   : > { %v1261_v21 = vpack.c.b16 %v1250_v9, %v1249_v6  ;;  %v1251_v55 = vunpack.c.l.b16 %v1180_v12  ;;  %v1208_v9 = vor.u32 %v1207_v0, %v1203_v8  ;;  %v749_v15 = vrot.slane %v3113_v16, 5  ;;  %v2784_v0 = vld [vmem:[%s3018_s11 + $0x54] sm:$0xff] }
  0x81   : > { %2627 = vmatmul.msk.bf16.gmra.mxu0 %vm474_vm3, %v1260_v45  ;;  %v1192_v45 = vshrl.u32 %v2617_v2, 16 }
  0x82   : > { %v1209_v51 = vrot.slane %v1208_v9, 4 }
  0x83   : > { %2519 = vmatmul.msk.bf16.gmra.mxu1 %vm474_vm3, %v2781_v49  ;;  %v739_v49 = vrot.slane %v3042_v35, 5  ;;  %v1194_v52 = vrot.slane %v1192_v45, 4  ;;  %v2791_v45 = vld [vmem:[%s3018_s11 + $0x54] sm:$0xff] }
  0x85   : > { %v741_v60 = vrot.slane %v739_v49, 4  ;;  %v1198_v35 = vor.u32 %v1197_v53, %v1194_v52  ;;  %v740_v6 = vsel %vm3154_vm7, %v2529_v25, %v739_v49  ;;  %v748_v49 = vrot.slane %v746_v31, 4 }
  0x86   : > { %v765_v14 = vunpack.c.l.b16 %v740_v6 }
  0x87   : > { %v1199_v57 = vrot.slane %v1198_v35, 4  ;;  %v750_v25 = vsel %vm3154_vm7, %v748_v49, %v749_v15  ;;  %v2792_v49 = vld [vmem:[%s3018_s11 + $0x60] sm:$0xff] }
  0x88   : > { %v768_v46 = vunpack.c.l.b16 %v750_v25 }
  0x89   : > { %2536 = vmatmul.msk.bf16.gmra.mxu2 %vm474_vm3, %v773_v59  ;;  %v1252_v59 = vunpack.c.l.b16 %v1190_v48  ;;  %v1204_v22 = vsel %vm3046_vm4, %v1199_v57, %v1203_v8  ;;  %v2530_v48 = vrot.slane %v675_v38, 9 }
  0x8a   : > { %v1253_v39 = vunpack.c.l.b16 %v1204_v22  ;;  %v1394_v22 = vrot.slane %v3159_v37, 5 }
  0x8b   : > { %v1262_v3 = vpack.c.b16 %v1252_v59, %v1251_v55  ;;  %v2716_v59 = vld [vmem:[%s3018_s11 + $0x18] sm:$0xf]  ;;  %v747_v8 = vsel %vm3154_vm7, %v2530_v48, %v746_v31 }
  0x8c   : > { %v1742_v6 = vshrl.u32 %v2716_v59, 16  ;;  %v767_v9 = vunpack.c.l.b16 %v747_v8 }
  0x8d   : > { %2595 = vmatmul.msk.bf16.gmra.mxu3 %vm474_vm3, %v2789_v7  ;;  %v743_v7 = vsel %vm3154_vm7, %v741_v60, %v742_v61  ;;  %v1235_v60 = vshll.u32 %v3372_v50, 16  ;;  %v3386_v61 = vld [vmem:[%s3018_s11 + $0x1c] sm:$0xf] }
  0x8e   : > { %v766_v17 = vunpack.c.l.b16 %v743_v7  ;;  %v1745_v7 = vshll.u32 %v2716_v59, 16  ;;  %v1751_v57 = vshll.u32 %v3386_v61, 16  ;;  %v1744_v28 = vrot.slane %v1742_v6, 4 }
  0x8f   : > { %v1237_v30 = vrot.slane %v1235_v60, 5  ;;  %v2085_v6 = vrot.slane %v3386_v61, 5 }
  0x90   : > { %v775_v23 = vpack.c.b16 %v766_v17, %v765_v14  ;;  %v1755_v14 = vshrl.u32 %v3386_v61, 16  ;;  %v1753_v31 = vrot.slane %v1751_v57, 5 }
  0x91   : > { %2628 = vmatmul.msk.bf16.gmra.mxu0 %vm474_vm3, %v1261_v21  ;;  %v3353_v21 = vld [vmem:[%s3018_s11 + $0x64] sm:$0xf] }
  0x92   : > { %v1225_v56 = vshll.u32 %v3353_v21, 16  ;;  %v1229_v2 = vshrl.u32 %v3353_v21, 16 }
  0x93   : > { %2520 = vmatmul.msk.bf16.gmra.mxu1 %vm474_vm3, %v2782_v40  ;;  %v1214_v40 = vsel %vm3046_vm4, %v1209_v51, %v1213_v26 }
  0x94   : > { %v1254_v19 = vunpack.c.l.b16 %v1214_v40  ;;  %v1227_v12 = vrot.slane %v1225_v56, 5  ;;  %v1231_v20 = vrot.slane %v1229_v2, 4  ;;  %v1747_v56 = vrot.slane %v1745_v7, 5 }
  0x95   : > { %v776_v40 = vpack.c.b16 %v768_v46, %v767_v9  ;;  %v1757_v2 = vrot.slane %v1755_v14, 4  ;;  %v2719_v46 = vld [vmem:[%s3018_s11 + $0x24] sm:$0xf] }
  0x96   : > { %v1232_v16 = vor.u32 %v1231_v20, %v1227_v12  ;;  %v1748_v48 = vor.u32 %v1747_v56, %v1744_v28  ;;  %v2633_v28 = vld [vmem:[%s3018_s11 + $0x18] sm:$0xe]  ;;  %v1766_v56 = vshrl.u32 %v2719_v46, 16 }
  0x97   : > { %v1758_v20 = vor.u32 %v1757_v2, %v1753_v31 }
  0x98   : > { %v1233_v26 = vrot.slane %v1232_v16, 4  ;;  %v1749_v25 = vrot.slane %v1748_v48, 4 }
  0x99   : > { %2537 = vmatmul.msk.bf16.gmra.mxu2 %vm474_vm3, %v774_v32  ;;  %v1218_v32 = vrot.slane %v1216_v24, 4  ;;  %v1759_v60 = vrot.slane %v1758_v20, 4 }
  0x9a   : > { %v1238_v37 = vsel %vm3046_vm4, %v1233_v26, %v1237_v30  ;;  %v1398_v30 = vrot.slane %v3190_v4, 5 }
  0x9b   : > { %v1222_v55 = vor.u32 %v1221_v47, %v1218_v32 }
  0x9d   : > { %2596 = vmatmul.msk.bf16.gmra.mxu3 %vm474_vm3, %v2790_v54  ;;  %v1263_v54 = vpack.c.b16 %v1254_v19, %v1253_v39  ;;  %v1223_v51 = vrot.slane %v1222_v55, 4 }
  0x9e   : > { %v3342_v5 = vpop.f32.mrf.mxu1 }
  0x9f   : > { %v1228_v39 = vsel %vm3046_vm4, %v1223_v51, %v1227_v12  ;;  %v1256_v12 = vunpack.c.l.b16 %v1238_v37  ;;  %v1754_v51 = vsel %vm3046_vm4, %v1749_v25, %v1753_v31  ;;  %v1400_v37 = vrot.slane %v1398_v30, 4 }
  0xa0   : > { %v1255_v15 = vunpack.c.l.b16 %v1228_v39  ;;  %v2641_v39 = vrot.slane %v2633_v28, 9 }
  0xa1   : > { %2629 = vmatmul.msk.bf16.gmra.mxu0 %vm474_vm3, %v1262_v3  ;;  %v1391_v3 = vrot.slane %v3149_v27, 5 }
  0xa2   : > { %v1264_v16 = vpack.c.b16 %v1256_v12, %v1255_v15  ;;  %v1768_v12 = vrot.slane %v1766_v56, 4 }
  0xa3   : > { %2521 = vmatmul.msk.bf16.gmra.mxu1 %vm474_vm3, %v2783_v10  ;;  %v2632_v10 = vld [vmem:[%s3018_s11 + $0xc] sm:$0xe]  ;;  %v1393_v24 = vrot.slane %v1391_v3, 4 }
  0xa5   : > { %v1395_v47 = vsel %vm3154_vm7, %v1393_v24, %v1394_v22 }
  0xa6   : > { %v3361_v29 = vpop.f32.mrf.mxu1  ;;  %v1448_v59 = vunpack.c.l.b16 %v1395_v47  ;;  %v1935_v47 = vunpack.c.l.b16 %v1754_v51 }
  0xa8   : > { %v3366_v41 = vpop.f32.mrf.mxu2 }
  0xa9   : > { %2538 = vmatmul.msk.bf16.gmra.mxu2 %vm474_vm3, %v775_v23  ;;  %v2640_v23 = vrot.slane %v2632_v10, 9  ;;  %v3426_v10 = vld [vmem:[%s3018_s11 + $0x28] sm:$0xf] }
  0xaa   : > { %v1775_v2 = vshll.u32 %v3426_v10, 16  ;;  %v1779_v31 = vshrl.u32 %v3426_v10, 16 }
  0xab   : > { %v1392_v32 = vsel %vm3154_vm7, %v2640_v23, %v1391_v3  ;;  %v2749_v3 = vld [vmem:[%s3018_s11 + $0x18] sm:$0xe]  ;;  %v2087_v23 = vrot.slane %v2085_v6, 4 }
  0xac   : > { %v3374_v52 = vpop.f32.mrf.mxu0  ;;  %v3376_v53 = vpop.f32.mrf.mxu3  ;;  %v1447_v55 = vunpack.c.l.b16 %v1392_v32  ;;  %v2757_v26 = vrot.slane %v2749_v3, 9  ;;  %v2793_v32 = vld [vmem:[%s3018_s11 + $0x18] sm:$0xff] }
  0xad   : > { %2597 = vmatmul.msk.bf16.gmra.mxu3 %vm474_vm3, %v2791_v45  ;;  %v2718_v45 = vld [vmem:[%s3018_s11 + $0x20] sm:$0x1] }
  0xae   : > { %v1463_v9 = vpack.c.b16 %v1448_v59, %v1447_v55  ;;  %v2088_v24 = vrot.slane %v2718_v45, 5  ;;  %v1781_v55 = vrot.slane %v1779_v31, 4  ;;  %v3452_v59 = vld [vmem:[%s3018_s11 + $0x2c] sm:$0x1] }
  0xaf   : > { %v1785_v51 = vshll.u32 %v3452_v59, 16 }
  0xb0   : > { %v3389_v35 = vpop.f32.mrf.mxu1  ;;  %v3396_v17 = vpop.f32.mrf.mxu2 }
  0xb1   : > { %2630 = vmatmul.msk.bf16.gmra.mxu0 %vm474_vm3, %v1263_v54  ;;  %v1761_v54 = vshll.u32 %v2718_v45, 16  ;;  %v2086_v45 = vsel %vm3154_vm7, %v2757_v26, %v2085_v6 }
  0xb2   : > { %v2141_v3 = vunpack.c.l.b16 %v2086_v45 }
  0xb3   : > { %2522 = vmatmul.msk.bf16.gmra.mxu1 %vm474_vm3, %v2784_v0  ;;  %v1763_v0 = vrot.slane %v1761_v54, 5  ;;  %v1777_v54 = vrot.slane %v1775_v2, 5 }
  0xb4   : > { %v3400_v27 = vpop.f32.mrf.mxu0  ;;  %v3402_v38 = vpop.f32.mrf.mxu3 }
  0xb5   : > { %v1764_v22 = vsel %vm3046_vm4, %v1759_v60, %v1763_v0 }
  0xb6   : > { %v1936_v48 = vunpack.c.l.b16 %v1764_v22 }
  0xb8   : > { %v3409_v19 = vpop.f32.mrf.mxu1  ;;  %v1951_v0 = vpack.c.b16 %v1936_v48, %v1935_v47 }
  0xb9   : > { %2539 = vmatmul.msk.bf16.gmra.mxu2 %vm474_vm3, %v776_v40  ;;  %v1769_v40 = vshll.u32 %v2719_v46, 16 }
  0xbb   : > { %v1771_v20 = vrot.slane %v1769_v40, 5  ;;  %v3467_v40 = vld [vmem:[%s3018_s11 + $0x34] sm:$0xf] }
  0xbc   : > { %v3417_v8 = vpop.f32.mrf.mxu2 }
  0xbd   : > { %2598 = vmatmul.msk.bf16.gmra.mxu3 %vm474_vm3, %v2792_v49  ;;  %v2089_v49 = vsel %vm3154_vm7, %v2087_v23, %v2088_v24  ;;  %v1772_v46 = vor.u32 %v1771_v20, %v1768_v12  ;;  %v2750_v24 = vld [vmem:[%s3018_s11 + $0x24] sm:$0xe]  ;;  %v1405_v12 = vrot.slane %v3224_v62, 5  ;;  %v1799_v20 = vshll.u32 %v3467_v40, 16 }
  0xbe   : > { %v3422_v7 = vpop.f32.mrf.mxu0  ;;  %v2142_v6 = vunpack.c.l.b16 %v2089_v49 }
  0xbf   : > { %v1773_v31 = vrot.slane %v1772_v46, 4 }
  0xc0   : > { %v3428_v57 = vpop.f32.mrf.mxu3  ;;  %v628_v14 = vpop.f32.mrf.mxu1  ;;  %v2157_v28 = vpack.c.b16 %v2142_v6, %v2141_v3  ;;  %v2095_v3 = vrot.slane %v3452_v59, 5 }
  0xc1   : > { %2631 = vmatmul.msk.bf16.gmra.mxu0 %vm474_vm3, %v1264_v16  ;;  %v629_v61 = vadd.f32 %v628_v14, %v3374_v52  ;;  %v1401_v52 = vrot.slane %v3209_v11, 5  ;;  %v1399_v16 = vsel %vm3154_vm7, %v2641_v39, %v1398_v30  ;;  %v1782_v14 = vor.u32 %v1781_v55, %v1777_v54  ;;  %v2722_v30 = vld [vmem:[%s3018_s11 + $0x30] sm:$0xf] }
  0xc2   : > { %v1449_v26 = vunpack.c.l.b16 %v1399_v16  ;;  %v1790_v47 = vshrl.u32 %v2722_v30, 16  ;;  %v1793_v48 = vshll.u32 %v2722_v30, 16  ;;  %v1408_v55 = vrot.slane %v3242_v34, 5 }
  0xc3   : > { %2649 = vmatmul.msk.bf16.vlgmr.msra.gmra.mxu1 %vm474_vm3, %v1463_v9  ;;  %v1402_v60 = vsel %vm3154_vm7, %v1400_v37, %v1401_v52  ;;  %v1783_v39 = vrot.slane %v1782_v14, 4  ;;  %v2092_v37 = vrot.slane %v3426_v10, 5  ;;  %v2634_v10 = vld [vmem:[%s3018_s11 + $0x24] sm:$0xe] }
  0xc4   : > { %v3441_v4 = vpop.f32.mrf.mxu2  ;;  %v1450_v22 = vunpack.c.l.b16 %v1402_v60  ;;  %v1778_v60 = vsel %vm3046_vm4, %v1773_v31, %v1777_v54  ;;  %v1792_v6 = vrot.slane %v1790_v47, 4  ;;  %v1795_v46 = vrot.slane %v1793_v48, 5 }
  0xc5   : > { %v2094_v62 = vrot.slane %v2092_v37, 4  ;;  %v1801_v54 = vrot.slane %v1799_v20, 5  ;;  %v1937_v30 = vunpack.c.l.b16 %v1778_v60 }
  0xc6   : > { %v3449_v15 = vpop.f32.mrf.mxu0  ;;  %v1464_v52 = vpack.c.b16 %v1450_v22, %v1449_v26  ;;  %v1407_v26 = vrot.slane %v1405_v12, 4 }
  0xc7   : > { %v2096_v31 = vsel %vm3154_vm7, %v2094_v62, %v2095_v3  ;;  %v2751_v3 = vld [vmem:[%s3018_s11 + $0x30] sm:$0xe] }
  0xc8   : > { %v3454_v25 = vpop.f32.mrf.mxu3  ;;  %v630_v11 = vpop.f32.mrf.mxu1 }
  0xc9   : > { %2708 = vmatmul.msk.bf16.vlgmr.msra.gmra.mxu2 %vm474_vm3, %v2793_v32  ;;  %v631_v9 = vadd.f32 %v630_v11, %v3400_v27  ;;  %v1787_v27 = vrot.slane %v1785_v51, 5  ;;  %v2758_v32 = vrot.slane %v2750_v24, 9  ;;  %v2642_v51 = vrot.slane %v2634_v10, 9  ;;  %v2794_v24 = vld [vmem:[%s3018_s11 + $0x24] sm:$0xff] }
  0xcb   : > { %v2093_v34 = vsel %vm3154_vm7, %v2758_v32, %v2092_v37  ;;  %v1409_v32 = vsel %vm3154_vm7, %v1407_v26, %v1408_v55 }
  0xcc   : > { %v813_v23 = vpop.f32.mrf.mxu2 }
  0xcd   : > { %2741 = vmatmul.msk.bf16.vlgmr.msra.gmra.mxu3 %vm474_vm3, %v1951_v0  ;;  %v853_v56 = vadd.f32 %v813_v23, %v629_v61  ;;  %v1803_v61 = vshrl.u32 %v3467_v40, 16  ;;  %v1788_v0 = vsel %vm3046_vm4, %v1783_v39, %v1787_v27  ;;  %v2143_v39 = vunpack.c.l.b16 %v2093_v34 }
  0xce   : > { %v1301_v2 = vpop.f32.mrf.mxu0  ;;  %v1796_v27 = vor.u32 %v1795_v46, %v1792_v6  ;;  %v2099_v46 = vrot.slane %v3467_v40, 5 }
  0xcf   : > { %v1805_v22 = vrot.slane %v1803_v61, 4 }
  0xd0   : > { %v967_v45 = vpop.f32.mrf.mxu3  ;;  %v633_v49 = vpop.f32.mrf.mxu1 }
  0xd1   : > { %2766 = vmatmul.msk.bf16.vlgmr.msra.gmra.mxu0 %vm474_vm3, %v2157_v28  ;;  %v1007_v11 = vadd.f32 %v967_v45, %v853_v56  ;;  %v634_v16 = vadd.f32 %v633_v49, %v3422_v7  ;;  %v1938_v28 = vunpack.c.l.b16 %v1788_v0  ;;  %v3489_v56 = vld [vmem:[%s3018_s11 + $0x38] sm:$0x1]  ;;  %v2144_v49 = vunpack.c.l.b16 %v2096_v31 }
  0xd2   : > { %v1809_v47 = vshll.u32 %v3489_v56, 16 }
  0xd3   : > { %2650 = vmatmul.msk.bf16.gmra.mxu1 %vm474_vm3, %v1464_v52  ;;  %v3485_v7 = vadd.f32 %v1301_v2, %v1007_v11  ;;  %v1406_v52 = vsel %vm3154_vm7, %v2642_v51, %v1405_v12  ;;  %v1952_v45 = vpack.c.b16 %v1938_v28, %v1937_v30  ;;  %v1452_v11 = vunpack.c.l.b16 %v1409_v32  ;;  %v3507_v51 = vld [vmem:[%s3018_s11 + $0x40] sm:$0xf] }
  0xd4   : > { %v815_v14 = vpop.f32.mrf.mxu2  ;;  %v1451_v61 = vunpack.c.l.b16 %v1406_v52  ;;  %v1797_v12 = vrot.slane %v1796_v27, 4  ;;  %v1811_v0 = vrot.slane %v1809_v47, 5  ;;  %v2158_v55 = vpack.c.b16 %v2144_v49, %v2143_v39  ;;  %v2795_v49 = vld [vmem:[%s3018_s11 + $0x30] sm:$0xff] }
  0xd5   : > { %v854_v23 = vadd.f32 %v815_v14, %v631_v9  ;;  %v1806_v9 = vor.u32 %v1805_v22, %v1801_v54  ;;  %v2725_v14 = vld [vmem:[%s3018_s11 + $0x3c] sm:$0xf]  ;;  %v1412_v30 = vrot.slane %v3250_v44, 5  ;;  %v2101_v27 = vrot.slane %v2099_v46, 4 }
  0xd6   : > { %v1303_v59 = vpop.f32.mrf.mxu0  ;;  %v1814_v31 = vshrl.u32 %v2725_v14, 16  ;;  %v1817_v39 = vshll.u32 %v2725_v14, 16  ;;  %v1415_v52 = vrot.slane %v3262_v63, 5 }
  0xd7   : > { %v1807_v60 = vrot.slane %v1806_v9, 4 }
  0xd8   : > { %v969_v37 = vpop.f32.mrf.mxu3  ;;  %v635_v2 = vpop.f32.mrf.mxu1 }
  0xd9   : > { %v1008_v48 = vadd.f32 %v969_v37, %v854_v23  ;;  %2709 = vmatmul.msk.bf16.gmra.mxu2 %vm474_vm3, %v2794_v24  ;;  %v636_v20 = vadd.f32 %v635_v2, %v3449_v15  ;;  %v1465_v15 = vpack.c.b16 %v1452_v11, %v1451_v61  ;;  %v1802_v23 = vsel %vm3046_vm4, %v1797_v12, %v1801_v54 }
  0xda   : > { %v1812_v24 = vsel %vm3046_vm4, %v1807_v60, %v1811_v0  ;;  %v2102_v37 = vrot.slane %v3489_v56, 5  ;;  %v1823_v54 = vshll.u32 %v3507_v51, 16  ;;  %v1827_v2 = vshrl.u32 %v3507_v51, 16  ;;  %v2727_v0 = vld [vmem:[%s3018_s11 + $0x44] sm:$0x1] }
  0xdb   : > { %v3502_v34 = vadd.f32 %v1303_v59, %v1008_v48  ;;  %v2635_v59 = vld [vmem:[%s3018_s11 + $0x30] sm:$0xe]  ;;  %v1940_v9 = vunpack.c.l.b16 %v1812_v24  ;;  %v1414_v48 = vrot.slane %v1412_v30, 4  ;;  %v1816_v61 = vrot.slane %v1814_v31, 4  ;;  %v2752_v31 = vld [vmem:[%s3018_s11 + $0x3c] sm:$0xe] }
  0xdc   : > { %v818_v10 = vpop.f32.mrf.mxu2  ;;  %v2643_v47 = vrot.slane %v2635_v59, 9  ;;  %v1819_v11 = vrot.slane %v1817_v39, 5  ;;  %v2103_v63 = vsel %vm3154_vm7, %v2101_v27, %v2102_v37  ;;  %v1825_v12 = vrot.slane %v1823_v54, 5 }
  0xdd   : > { %2742 = vmatmul.msk.bf16.gmra.mxu3 %vm474_vm3, %v1952_v45  ;;  %v855_v62 = vadd.f32 %v818_v10, %v634_v16  ;;  %v2759_v16 = vrot.slane %v2751_v3, 9  ;;  %v1829_v60 = vrot.slane %v1827_v2, 4  ;;  %v1833_v24 = vshll.u32 %v2727_v0, 16  ;;  %v3541_v2 = vld [vmem:[%s3018_s11 + $0x4c] sm:$0xf] }
  0xde   : > { %v1306_v6 = vpop.f32.mrf.mxu0 }
  0xdf   : > { %v2100_v56 = vsel %vm3154_vm7, %v2759_v16, %v2099_v46  ;;  %v1416_v46 = vsel %vm3154_vm7, %v1414_v48, %v1415_v52  ;;  %v2106_v16 = vrot.slane %v3507_v51, 5  ;;  %v2109_v48 = vrot.slane %v2727_v0, 5 }
  0xe0   : > { %v972_v26 = vpop.f32.mrf.mxu3  ;;  %v638_v22 = vpop.f32.mrf.mxu1  ;;  %v2145_v3 = vunpack.c.l.b16 %v2100_v56  ;;  %v1454_v59 = vunpack.c.l.b16 %v1416_v46 }
  0xe1   : > { %2767 = vmatmul.msk.bf16.gmra.mxu0 %vm474_vm3, %v2158_v55  ;;  %v1009_v28 = vadd.f32 %v972_v26, %v855_v62  ;;  %v639_v40 = vadd.f32 %v638_v22, %v3342_v5  ;;  %v1939_v5 = vunpack.c.l.b16 %v1802_v23  ;;  %v1820_v22 = vor.u32 %v1819_v11, %v1816_v61 }
  0xe2   : > { %v1830_v23 = vor.u32 %v1829_v60, %v1825_v12  ;;  %v2108_v51 = vrot.slane %v2106_v16, 4  ;;  %v1419_v11 = vrot.slane %v3270_v13, 5 }
  0xe3   : > { %2651 = vmatmul.msk.bf16.gmra.mxu1 %vm474_vm3, %v1465_v15  ;;  %v3522_v44 = vadd.f32 %v1306_v6, %v1009_v28  ;;  %v1953_v62 = vpack.c.b16 %v1940_v9, %v1939_v5  ;;  %v2146_v15 = vunpack.c.l.b16 %v2103_v63  ;;  %v1821_v54 = vrot.slane %v1820_v22, 4 }
  0xe4   : > { %v820_v32 = vpop.f32.mrf.mxu2  ;;  %v1835_v5 = vrot.slane %v1833_v24, 5  ;;  %v2760_v9 = vrot.slane %v2752_v31, 9  ;;  %v1851_v63 = vshrl.u32 %v3541_v2, 16  ;;  %v2796_v24 = vld [vmem:[%s3018_s11 + $0x3c] sm:$0xff]  ;;  %v3567_v31 = vld [vmem:[%s3018_s11 + $0x50] sm:$0x1] }
  0xe5   : > { %v856_v45 = vadd.f32 %v820_v32, %v636_v20  ;;  %v1413_v20 = vsel %vm3154_vm7, %v2643_v47, %v1412_v30  ;;  %v2728_v30 = vld [vmem:[%s3018_s11 + $0x48] sm:$0xf]  ;;  %v2159_v27 = vpack.c.b16 %v2146_v15, %v2145_v3  ;;  %v1831_v32 = vrot.slane %v1830_v23, 4 }
  0xe6   : > { %v1308_v10 = vpop.f32.mrf.mxu0  ;;  %v1453_v28 = vunpack.c.l.b16 %v1413_v20  ;;  %v1826_v0 = vsel %vm3046_vm4, %v1821_v54, %v1825_v12  ;;  %v2107_v13 = vsel %vm3154_vm7, %v2760_v9, %v2106_v16  ;;  %v1421_v15 = vrot.slane %v1419_v11, 4 }
  0xe7   : > { %v1836_v3 = vsel %vm3046_vm4, %v1831_v32, %v1835_v5  ;;  %v1853_v22 = vrot.slane %v1851_v63, 4 }
  0xe8   : > { %v974_v55 = vpop.f32.mrf.mxu3  ;;  %v640_v6 = vpop.f32.mrf.mxu1  ;;  %v1466_v47 = vpack.c.b16 %v1454_v59, %v1453_v28  ;;  %v1941_v28 = vunpack.c.l.b16 %v1826_v0  ;;  %v1942_v16 = vunpack.c.l.b16 %v1836_v3  ;;  %v2113_v0 = vrot.slane %v3541_v2, 5 }
  0xe9   : > { %v1010_v14 = vadd.f32 %v974_v55, %v856_v45  ;;  %2710 = vmatmul.msk.bf16.gmra.mxu2 %vm474_vm3, %v2795_v49  ;;  %v641_v26 = vadd.f32 %v640_v6, %v3361_v29  ;;  %v1838_v45 = vshrl.u32 %v2728_v30, 16  ;;  %v1841_v49 = vshll.u32 %v2728_v30, 16  ;;  %v2636_v55 = vld [vmem:[%s3018_s11 + $0x3c] sm:$0xe] }
  0xea   : > { %v2110_v6 = vsel %vm3154_vm7, %v2108_v51, %v2109_v48  ;;  %v1954_v9 = vpack.c.b16 %v1942_v16, %v1941_v28  ;;  %v2115_v28 = vrot.slane %v2113_v0, 4  ;;  %v2116_v16 = vrot.slane %v3567_v31, 5 }
  0xeb   : > { %v3543_v52 = vadd.f32 %v1308_v10, %v1010_v14  ;;  %v1843_v20 = vrot.slane %v1841_v49, 5  ;;  %v2644_v14 = vrot.slane %v2636_v55, 9  ;;  %v2148_v30 = vunpack.c.l.b16 %v2110_v6  ;;  %v2731_v49 = vld [vmem:[%s3018_s11 + $0x54] sm:$0xf] }
  0xec   : > { %v823_v39 = vpop.f32.mrf.mxu2  ;;  %v1865_v6 = vshll.u32 %v2731_v49, 16 }
  0xed   : > { %2743 = vmatmul.msk.bf16.gmra.mxu3 %vm474_vm3, %v1953_v62  ;;  %v857_v37 = vadd.f32 %v823_v39, %v639_v40  ;;  %v1847_v40 = vshll.u32 %v3541_v2, 16  ;;  %v1422_v62 = vrot.slane %v3285_v43, 5  ;;  %v2147_v39 = vunpack.c.l.b16 %v2107_v13 }
  0xee   : > { %v1311_v29 = vpop.f32.mrf.mxu0  ;;  %v1420_v54 = vsel %vm3154_vm7, %v2644_v14, %v1419_v11  ;;  %v1862_v13 = vshrl.u32 %v2731_v49, 16  ;;  %v1426_v2 = vrot.slane %v3298_v58, 5  ;;  %v1429_v58 = vrot.slane %v3312_v18, 5 }
  0xef   : > { %v3563_v12 = vrot.slane %v1847_v40, 5  ;;  %v1455_v48 = vunpack.c.l.b16 %v1420_v54  ;;  %v2117_v49 = vsel %vm3154_vm7, %v2115_v28, %v2116_v16  ;;  %v2734_v28 = vld [vmem:[%s3018_s11 + $0x60] sm:$0xf] }
  0xf0   : > { %v977_v56 = vpop.f32.mrf.mxu3  ;;  %v643_v61 = vpop.f32.mrf.mxu1 }
  0xf1   : > { %2768 = vmatmul.msk.bf16.gmra.mxu0 %vm474_vm3, %v2159_v27  ;;  %v1011_v10 = vadd.f32 %v977_v56, %v857_v37  ;;  %v644_v60 = vadd.f32 %v643_v61, %v3389_v35  ;;  %v1840_v35 = vrot.slane %v1838_v45, 4  ;;  %v3579_v56 = vld [vmem:[%s3018_s11 + $0x58] sm:$0xf]  ;;  %v2160_v61 = vpack.c.b16 %v2148_v30, %v2147_v39 }
  0xf2   : > { %v1864_v39 = vrot.slane %v1862_v13, 4  ;;  %v1867_v30 = vrot.slane %v1865_v6, 5 }
  0xf3   : > { %2652 = vmatmul.msk.bf16.gmra.mxu1 %vm474_vm3, %v1466_v47  ;;  %v3561_v46 = vadd.f32 %v1311_v29, %v1011_v10  ;;  %v1423_v29 = vsel %vm3154_vm7, %v1421_v15, %v1422_v62  ;;  %v1844_v32 = vor.u32 %v1843_v20, %v1840_v35  ;;  %v1857_v47 = vshll.u32 %v3567_v31, 16  ;;  %v2753_v62 = vld [vmem:[%s3018_s11 + $0x48] sm:$0xe] }
  0xf4   : > { %v825_v43 = vpop.f32.mrf.mxu2  ;;  %v1456_v45 = vunpack.c.l.b16 %v1423_v29  ;;  %v1871_v35 = vshll.u32 %v3579_v56, 16  ;;  %v1875_v20 = vshrl.u32 %v3579_v56, 16 }
  0xf5   : > { %v858_v23 = vadd.f32 %v825_v43, %v641_v26  ;;  %v1854_v26 = vor.u32 %v1853_v22, %v3563_v12  ;;  %v1845_v40 = vrot.slane %v1844_v32, 4  ;;  %v1859_v55 = vrot.slane %v1857_v47, 5 }
  0xf6   : > { %v1313_v59 = vpop.f32.mrf.mxu0  ;;  %v1467_v43 = vpack.c.b16 %v1456_v45, %v1455_v48  ;;  %v2761_v22 = vrot.slane %v2753_v62, 9  ;;  %v1428_v32 = vrot.slane %v1426_v2, 4 }
  0xf7   : > { %v1855_v63 = vrot.slane %v1854_v26, 4  ;;  %v3602_v26 = vld [vmem:[%s3018_s11 + $0x5c] sm:$0x1] }
  0xf8   : > { %v979_v27 = vpop.f32.mrf.mxu3  ;;  %v645_v37 = vpop.f32.mrf.mxu1  ;;  %v2114_v45 = vsel %vm3154_vm7, %v2761_v22, %v2113_v0  ;;  %v1881_v18 = vshll.u32 %v3602_v26, 16  ;;  %v2754_v22 = vld [vmem:[%s3018_s11 + $0x54] sm:$0xe] }
  0xf9   : > { %v1012_v5 = vadd.f32 %v979_v27, %v858_v23  ;;  %2711 = vmatmul.msk.bf16.gmra.mxu2 %vm474_vm3, %v2796_v24  ;;  %v646_v51 = vadd.f32 %v645_v37, %v3409_v19  ;;  %v1860_v24 = vsel %vm3046_vm4, %v1855_v63, %v1859_v55  ;;  %v1873_v27 = vrot.slane %v1871_v35, 5 }
  0xfa   : > { %v1877_v37 = vrot.slane %v1875_v20, 4  ;;  %v1944_v31 = vunpack.c.l.b16 %v1860_v24  ;;  %v2149_v0 = vunpack.c.l.b16 %v2114_v45  ;;  %v1436_v45 = vrot.slane %v3339_v1, 5 }
  0xfb   : > { %v3584_v3 = vadd.f32 %v1313_v59, %v1012_v5  ;;  %v2637_v59 = vld [vmem:[%s3018_s11 + $0x48] sm:$0xe] }
  0xfc   : > { %v828_v11 = vpop.f32.mrf.mxu2  ;;  %v2645_v29 = vrot.slane %v2637_v59, 9 }
  0xfd   : > { %2744 = vmatmul.msk.bf16.gmra.mxu3 %vm474_vm3, %v1954_v9  ;;  %v859_v10 = vadd.f32 %v828_v11, %v644_v60  ;;  %v1850_v60 = vsel %vm3046_vm4, %v1845_v40, %v3563_v12  ;;  %v2797_v9 = vld [vmem:[%s3018_s11 + $0x48] sm:$0xff]  ;;  %v1878_v11 = vor.u32 %v1877_v37, %v1873_v27  ;;  %v2762_v37 = vrot.slane %v2754_v22, 9 }
  0xfe   : > { %v1316_v19 = vpop.f32.mrf.mxu0  ;;  %v1943_v47 = vunpack.c.l.b16 %v1850_v60 }
  0xff   : > { %v1879_v6 = vrot.slane %v1878_v11, 4 }
 0x100   : > { %v982_v14 = vpop.f32.mrf.mxu3  ;;  %v648_v15 = vpop.f32.mrf.mxu1  ;;  %v1955_v62 = vpack.c.b16 %v1944_v31, %v1943_v47  ;;  %v2123_v47 = vrot.slane %v3602_v26, 5  ;;  %v2638_v31 = vld [vmem:[%s3018_s11 + $0x54] sm:$0xe] }
 0x101   : > { %2769 = vmatmul.msk.bf16.gmra.mxu0 %vm474_vm3, %v2160_v61  ;;  %v1013_v23 = vadd.f32 %v982_v14, %v859_v10  ;;  %v1868_v61 = vor.u32 %v1867_v30, %v1864_v39  ;;  %v1430_v10 = vsel %vm3154_vm7, %v1428_v32, %v1429_v58  ;;  %v649_v35 = vadd.f32 %v648_v15, %v3366_v41  ;;  %v3623_v39 = vld [vmem:[%s3018_s11 + $0x64] sm:$0xf] }
 0x102   : > { %v1883_v14 = vrot.slane %v1881_v18, 5  ;;  %v1886_v32 = vshrl.u32 %v2734_v28, 16 }
 0x103   : > { %2653 = vmatmul.msk.bf16.gmra.mxu1 %vm474_vm3, %v1467_v43  ;;  %v3598_v12 = vadd.f32 %v1316_v19, %v1013_v23  ;;  %v2150_v19 = vunpack.c.l.b16 %v2117_v49  ;;  %v1869_v13 = vrot.slane %v1868_v61, 4  ;;  %v1458_v43 = vunpack.c.l.b16 %v1430_v10 }
 0x104   : > { %v830_v54 = vpop.f32.mrf.mxu2  ;;  %v1884_v15 = vsel %vm3046_vm4, %v1879_v6, %v1883_v14  ;;  %v1888_v10 = vrot.slane %v1886_v32, 4 }
 0x105   : > { %v860_v5 = vadd.f32 %v830_v54, %v646_v51  ;;  %v1427_v51 = vsel %vm3154_vm7, %v2645_v29, %v1426_v2  ;;  %v2120_v2 = vrot.slane %v3579_v56, 5  ;;  %v2161_v23 = vpack.c.b16 %v2150_v19, %v2149_v0  ;;  %v2798_v0 = vld [vmem:[%s3018_s11 + $0x54] sm:$0xff] }
 0x106   : > { %v1318_v48 = vpop.f32.mrf.mxu0  ;;  %v1457_v20 = vunpack.c.l.b16 %v1427_v51  ;;  %v1874_v41 = vsel %vm3046_vm4, %v1869_v13, %v1873_v27  ;;  %v1433_v29 = vrot.slane %v3324_v42, 5  ;;  %v1895_v27 = vshll.u32 %v3623_v39, 16  ;;  %v2736_v13 = vld [vmem:[%s3018_s11 + $0x68] sm:$0x1] }
 0x107   : > { %v2122_v54 = vrot.slane %v2120_v2, 4  ;;  %v1945_v49 = vunpack.c.l.b16 %v1874_v41  ;;  %v1946_v42 = vunpack.c.l.b16 %v1884_v15  ;;  %v2121_v11 = vsel %vm3154_vm7, %v2762_v37, %v2120_v2 }
 0x108   : > { %v984_v40 = vpop.f32.mrf.mxu3  ;;  %v650_v63 = vpop.f32.mrf.mxu1  ;;  %v1468_v30 = vpack.c.b16 %v1458_v43, %v1457_v20  ;;  %v1435_v51 = vrot.slane %v1433_v29, 4  ;;  %v2151_v6 = vunpack.c.l.b16 %v2121_v11 }
 0x109   : > { %v1014_v55 = vadd.f32 %v984_v40, %v860_v5  ;;  %2712 = vmatmul.msk.bf16.gmra.mxu2 %vm474_vm3, %v2797_v9  ;;  %v1889_v5 = vshll.u32 %v2734_v28, 16  ;;  %v651_v61 = vadd.f32 %v650_v63, %v3396_v17  ;;  %v2646_v40 = vrot.slane %v2638_v31, 9 }
 0x10a   : > { %v2124_v1 = vsel %vm3154_vm7, %v2122_v54, %v2123_v47  ;;  %v1897_v17 = vrot.slane %v1895_v27, 5  ;;  %v1905_v28 = vshll.u32 %v2736_v13, 16  ;;  %v2127_v31 = vrot.slane %v3623_v39, 5  ;;  %v2737_v27 = vld [vmem:[%s3018_s11 + $0x6c] sm:$0xf] }
 0x10b   : > { %v3620_v16 = vadd.f32 %v1318_v48, %v1014_v55  ;;  %v1899_v48 = vshrl.u32 %v3623_v39, 16  ;;  %v1891_v55 = vrot.slane %v1889_v5, 5  ;;  %v2152_v20 = vunpack.c.l.b16 %v2124_v1  ;;  %v2755_v5 = vld [vmem:[%s3018_s11 + $0x60] sm:$0xe] }
 0x10c   : > { %v833_v60 = vpop.f32.mrf.mxu2  ;;  %v1434_v14 = vsel %vm3154_vm7, %v2646_v40, %v1433_v29  ;;  %v1907_v32 = vrot.slane %v1905_v28, 5  ;;  %v2639_v40 = vld [vmem:[%s3018_s11 + $0x60] sm:$0xe]  ;;  %v1910_v39 = vshrl.u32 %v2737_v27, 16  ;;  %v1443_v1 = vrot.slane %v3372_v50, 5 }
 0x10d   : > { %2745 = vmatmul.msk.bf16.gmra.mxu3 %vm474_vm3, %v1955_v62  ;;  %v861_v24 = vadd.f32 %v833_v60, %v649_v35  ;;  %v1901_v63 = vrot.slane %v1899_v48, 4  ;;  %v1437_v60 = vsel %vm3154_vm7, %v1435_v51, %v1436_v45  ;;  %v1892_v22 = vor.u32 %v1891_v55, %v1888_v10 }
 0x10e   : > { %v1321_v59 = vpop.f32.mrf.mxu0  ;;  %v1460_v41 = vunpack.c.l.b16 %v1437_v60  ;;  %v2162_v15 = vpack.c.b16 %v2152_v20, %v2151_v6  ;;  %v1913_v51 = vshll.u32 %v2737_v27, 16  ;;  %v2129_v10 = vrot.slane %v2127_v31, 4 }
 0x10f   : > { %v2130_v55 = vrot.slane %v2736_v13, 5  ;;  %v2799_v13 = vld [vmem:[%s3018_s11 + $0x60] sm:$0xff] }
 0x110   : > { %v987_v56 = vpop.f32.mrf.mxu3  ;;  %v653_v58 = vpop.f32.mrf.mxu1 }
 0x111   : > { %2770 = vmatmul.msk.bf16.gmra.mxu0 %vm474_vm3, %v2161_v23  ;;  %v1015_v9 = vadd.f32 %v987_v56, %v861_v24  ;;  %v1956_v23 = vpack.c.b16 %v1946_v42, %v1945_v49  ;;  %v1902_v24 = vor.u32 %v1901_v63, %v1897_v17  ;;  %v1893_v56 = vrot.slane %v1892_v22, 4 }
 0x112   : > { %v1440_v42 = vrot.slane %v3353_v21, 5  ;;  %v1912_v22 = vrot.slane %v1910_v39, 4 }
 0x113   : > { %2654 = vmatmul.msk.bf16.gmra.mxu1 %vm474_vm3, %v1468_v30  ;;  %v3640_v18 = vadd.f32 %v1321_v59, %v1015_v9  ;;  %v654_v59 = vadd.f32 %v653_v58, %v3417_v8  ;;  %v1459_v30 = vunpack.c.l.b16 %v1434_v14  ;;  %v1903_v29 = vrot.slane %v1902_v24, 4  ;;  %v3659_v58 = vld [vmem:[%s3018_s11 + $0x70] sm:$0xf]  ;;  %v2739_v24 = vld [vmem:[%s3018_s11 + $0x74] sm:$0x1] }
 0x114   : > { %v835_v26 = vpop.f32.mrf.mxu2  ;;  %v1898_v49 = vsel %vm3046_vm4, %v1893_v56, %v1897_v17  ;;  %v1442_v20 = vrot.slane %v1440_v42, 4  ;;  %v2134_v39 = vrot.slane %v3659_v58, 5 }
 0x115   : > { %v862_v62 = vadd.f32 %v835_v26, %v651_v61  ;;  %v1469_v8 = vpack.c.b16 %v1460_v41, %v1459_v30  ;;  %v2763_v61 = vrot.slane %v2755_v5, 9  ;;  %v1908_v26 = vsel %vm3046_vm4, %v1903_v29, %v1907_v32 }
 0x116   : > { %v1323_v19 = vpop.f32.mrf.mxu0  ;;  %v1948_v6 = vunpack.c.l.b16 %v1908_v26  ;;  %v1929_v5 = vshll.u32 %v2739_v24, 16 }
 0x117   : > { %v2128_v60 = vsel %vm3154_vm7, %v2763_v61, %v2127_v31 }
 0x118   : > { %v989_v35 = vpop.f32.mrf.mxu3  ;;  %v655_v43 = vpop.f32.mrf.mxu1 }
 0x119   : > { %v1016_v2 = vadd.f32 %v989_v35, %v862_v62  ;;  %2713 = vmatmul.msk.bf16.gmra.mxu2 %vm474_vm3, %v2798_v0  ;;  %v1919_v62 = vshll.u32 %v3659_v58, 16  ;;  %v1923_v0 = vshrl.u32 %v3659_v58, 16  ;;  %v656_v21 = vadd.f32 %v655_v43, %v3441_v4 }
 0x11a   : > { %v2647_v35 = vrot.slane %v2639_v40, 9  ;;  %v2131_v4 = vsel %vm3154_vm7, %v2129_v10, %v2130_v55  ;;  %v1931_v40 = vrot.slane %v1929_v5, 5  ;;  %v2756_v10 = vld [vmem:[%s3018_s11 + $0x6c] sm:$0xe] }
 0x11b   : > { %v3654_v9 = vadd.f32 %v1323_v19, %v1016_v2  ;;  %v1947_v19 = vunpack.c.l.b16 %v1898_v49  ;;  %v1915_v2 = vrot.slane %v1913_v51, 5  ;;  %v1921_v43 = vrot.slane %v1919_v62, 5 }
 0x11c   : > { %v838_v37 = vpop.f32.mrf.mxu2  ;;  %v1441_v41 = vsel %vm3154_vm7, %v2647_v35, %v1440_v42 }
 0x11d   : > { %2746 = vmatmul.msk.bf16.gmra.mxu3 %vm474_vm3, %v1956_v23  ;;  %v863_v54 = vadd.f32 %v838_v37, %v654_v59  ;;  %v1925_v23 = vrot.slane %v1923_v0, 4  ;;  %v2153_v59 = vunpack.c.l.b16 %v2128_v60  ;;  %v1957_v56 = vpack.c.b16 %v1948_v6, %v1947_v19 }
 0x11e   : > { %v1326_v47 = vpop.f32.mrf.mxu0  ;;  %v1916_v29 = vor.u32 %v1915_v2, %v1912_v22  ;;  %v1461_v31 = vunpack.c.l.b16 %v1441_v41 }
 0x11f   : > { %v1926_v32 = vor.u32 %v1925_v23, %v1921_v43 }
 0x120   : > { %v992_v48 = vpop.f32.mrf.mxu3  ;;  %v658_v45 = vpop.f32.mrf.mxu1  ;;  %v1917_v42 = vrot.slane %v1916_v29, 4 }
 0x121   : > { %2771 = vmatmul.msk.bf16.gmra.mxu0 %vm474_vm3, %v2162_v15  ;;  %v1017_v11 = vadd.f32 %v992_v48, %v863_v54  ;;  %v1444_v15 = vsel %vm3154_vm7, %v1442_v20, %v1443_v1  ;;  %v2154_v54 = vunpack.c.l.b16 %v2131_v4  ;;  %v1927_v26 = vrot.slane %v1926_v32, 4  ;;  %v2800_v20 = vld [vmem:[%s3018_s11 + $0x6c] sm:$0xff] }
 0x122   : > { %v1462_v27 = vunpack.c.l.b16 %v1444_v15  ;;  %v1922_v62 = vsel %vm3046_vm4, %v1917_v42, %v1921_v43  ;;  %v2764_v1 = vrot.slane %v2756_v10, 9 }
 0x123   : > { %2655 = vmatmul.msk.bf16.gmra.mxu1 %vm474_vm3, %v1469_v8  ;;  %v3673_v17 = vadd.f32 %v1326_v47, %v1017_v11  ;;  %v659_v47 = vadd.f32 %v658_v45, %v3376_v53  ;;  %v2163_v49 = vpack.c.b16 %v2154_v54, %v2153_v59  ;;  %v1932_v0 = vsel %vm3046_vm4, %v1927_v26, %v1931_v40 }
 0x124   : > { %v840_v63 = vpop.f32.mrf.mxu2  ;;  %v1470_v51 = vpack.c.b16 %v1462_v27, %v1461_v31  ;;  %v2135_v22 = vsel %vm3154_vm7, %v2764_v1, %v2134_v39 }
 0x125   : > { %v864_v14 = vadd.f32 %v840_v63, %v656_v21  ;;  %v2136_v21 = vrot.slane %v2134_v39, 4  ;;  %v2137_v63 = vrot.slane %v2739_v24, 5  ;;  %v2155_v43 = vunpack.c.l.b16 %v2135_v22 }
 0x126   : > { %v1328_v50 = vpop.f32.mrf.mxu0 }
 0x127   : > { %v2138_v36 = vsel %vm3154_vm7, %v2136_v21, %v2137_v63 }
 0x128   : > { %v994_v28 = vpop.f32.mrf.mxu3  ;;  %v660_v30 = vpop.f32.mrf.mxu1  ;;  %v2156_v23 = vunpack.c.l.b16 %v2138_v36 }
 0x129   : > { %v1018_v37 = vadd.f32 %v994_v28, %v864_v14  ;;  %2714 = vmatmul.msk.bf16.gmra.mxu2 %vm474_vm3, %v2799_v13  ;;  %v661_v19 = vadd.f32 %v660_v30, %v3402_v38  ;;  %v1949_v14 = vunpack.c.l.b16 %v1922_v62  ;;  %v1950_v13 = vunpack.c.l.b16 %v1932_v0  ;;  %v3729_v62 = vld [vmem:[%s3808_s3] ss:$0 sm:$0xff] }
 0x12a   : > { %v2164_v30 = vpack.c.b16 %v2156_v23, %v2155_v43 }
 0x12b   : > { %v3687_v8 = vadd.f32 %v1328_v50, %v1018_v37  ;;  %v1958_v38 = vpack.c.b16 %v1950_v13, %v1949_v14 }
 0x12c   : > { %v843_v48 = vpop.f32.mrf.mxu2 }
 0x12d   : > { %2747 = vmatmul.msk.bf16.gmra.mxu3 %vm474_vm3, %v1957_v56  ;;  %v865_v61 = vadd.f32 %v843_v48, %v659_v47 }
 0x12e   : > { %v1331_v11 = vpop.f32.mrf.mxu0 }
 0x130   : > { %v997_v55 = vpop.f32.mrf.mxu3  ;;  %v663_v53 = vpop.f32.mrf.mxu1 }
 0x131   : > { %2772 = vmatmul.msk.bf16.gmra.mxu0 %vm474_vm3, %v2163_v49  ;;  %v1019_v45 = vadd.f32 %v997_v55, %v865_v61  ;;  %v664_v24 = vadd.f32 %v663_v53, %v3428_v57 }
 0x133   : > { %2656 = vmatmul.msk.bf16.gmra.mxu1 %vm474_vm3, %v1470_v51  ;;  %v3699_v58 = vadd.f32 %v1331_v11, %v1019_v45  ;;  %v3722_v51 = vld [vmem:[%s3807_s2] ss:$0 sm:$0xff] }
 0x134   : > { %v845_v6 = vpop.f32.mrf.mxu2 }
 0x135   : > { %v866_v35 = vadd.f32 %v845_v6, %v661_v19 }
 0x136   : > { %v1333_v60 = vpop.f32.mrf.mxu0 }
 0x138   : > { %v999_v2 = vpop.f32.mrf.mxu3  ;;  %v665_v50 = vpop.f32.mrf.mxu1 }
 0x139   : > { %v1020_v4 = vadd.f32 %v999_v2, %v866_v35  ;;  %2715 = vmatmul.msk.bf16.gmra.mxu2 %vm474_vm3, %v2800_v20  ;;  %v666_v54 = vadd.f32 %v665_v50, %v3454_v25 }
 0x13b   : > { %v3708_v28 = vadd.f32 %v1333_v60, %v1020_v4 }
 0x13c   : > { %v848_v59 = vpop.f32.mrf.mxu2 }
 0x13d   : > { %2748 = vmatmul.msk.bf16.gmra.mxu3 %vm474_vm3, %v1958_v38  ;;  %v867_v41 = vadd.f32 %v848_v59, %v664_v24 }
 0x13e   : > { %v1336_v15 = vpop.f32.mrf.mxu0 }
 0x140   : > { %v1002_v33 = vpop.f32.mrf.mxu3  ;;  %v1507_v37 = vpop.f32.mrf.mxu1 }
 0x141   : > { %2773 = vmatmul.msk.bf16.gmra.mxu0 %vm474_vm3, %v2164_v30  ;;  %v1021_v56 = vadd.f32 %v1002_v33, %v867_v41  ;;  %v1547_v48 = vadd.f32 %v1507_v37, %v3485_v7 }
 0x143   : > { %v3713_v29 = vadd.f32 %v1336_v15, %v1021_v56 }
 0x144   : > { %v850_v32 = vpop.f32.mrf.mxu2 }
 0x145   : > { %v868_v57 = vadd.f32 %v850_v32, %v666_v54 }
 0x146   : > { %v1338_v5 = vpop.f32.mrf.mxu0 }
 0x148   : > { %v1004_v47 = vpop.f32.mrf.mxu3  ;;  %v1509_v31 = vpop.f32.mrf.mxu1 }
 0x149   : > { %v1022_v27 = vadd.f32 %v1004_v47, %v868_v57  ;;  %v1548_v10 = vadd.f32 %v1509_v31, %v3502_v34 }
 0x14b   : > { %v3716_v49 = vadd.f32 %v1338_v5, %v1022_v27 }
 0x14c   : > { %v1661_v61 = vpop.f32.mrf.mxu2 }
 0x14d   : > { %v1701_v42 = vadd.f32 %v1661_v61, %v1547_v48 }
 0x14e   : > { %v2201_v11 = vpop.f32.mrf.mxu0 }
 0x150   : > { %v1995_v26 = vpop.f32.mrf.mxu3  ;;  %v1512_v40 = vpop.f32.mrf.mxu1 }
 0x151   : > { %v2035_v39 = vadd.f32 %v1995_v26, %v1701_v42  ;;  %v1549_v19 = vadd.f32 %v1512_v40, %v3522_v44 }
 0x153   : > { %v2241_v25 = vadd.f32 %v2201_v11, %v2035_v39 }
 0x154   : > { %v1663_v7 = vpop.f32.mrf.mxu2 }
 0x155   : > { %v1702_v55 = vadd.f32 %v1663_v7, %v1548_v10  ;;  %v2261_v45 = vmul.f32 %v3722_v51, %v2241_v25 }
 0x156   : > { %v2203_v53 = vpop.f32.mrf.mxu0 }
 0x157   : > { %v2281_v63 = vadd.f32 %v3729_v62, %v2261_v45 }
 0x158   : > { %v1997_v0 = vpop.f32.mrf.mxu3  ;;  %v1514_v1 = vpop.f32.mrf.mxu1 }
 0x159   : > { %v2036_v21 = vadd.f32 %v1997_v0, %v1702_v55  ;;  %v2297_v13 = vmul.f32 0.1, %v2281_v63  ;;  %v1550_v23 = vadd.f32 %v1514_v1, %v3543_v52 }
 0x15b   : > { %v2242_v34 = vadd.f32 %v2203_v53, %v2036_v21  ;;  %v2313_v4 = vmax.f32 %v2281_v63, %v2297_v13 }
 0x15c   : > { %v1666_v6 = vpop.f32.mrf.mxu2 }
 0x15d   : > { %v2262_v35 = vmul.f32 %v3722_v51, %v2242_v34  ;;  %v1703_v20 = vadd.f32 %v1666_v6, %v1549_v19 }
 0x15e   : > { %v2206_v14 = vpop.f32.mrf.mxu0 }
 0x15f   : > { %v2282_v60 = vadd.f32 %v3729_v62, %v2262_v35 }
 0x160   : > { %v2000_v22 = vpop.f32.mrf.mxu3  ;;  %v1517_v36 = vpop.f32.mrf.mxu1 }
 0x161   : > { %v2298_v2 = vmul.f32 0.1, %v2282_v60  ;;  %v2037_v50 = vadd.f32 %v2000_v22, %v1703_v20  ;;  %v1551_v52 = vadd.f32 %v1517_v36, %v3561_v46 }
 0x163   : > { %v2314_v38 = vmax.f32 %v2282_v60, %v2298_v2  ;;  %v2243_v43 = vadd.f32 %v2206_v14, %v2037_v50 }
 0x164   : > { %v1668_v44 = vpop.f32.mrf.mxu2 }
 0x165   : > { %v2804_v24 = vpack.c.bf16 %v2314_v38, %v2313_v4  ;;  %v1704_v59 = vadd.f32 %v1668_v44, %v1550_v23  ;;  %v2263_v41 = vmul.f32 %v3722_v51, %v2243_v43 }
 0x166   : > { %v2208_v30 = vpop.f32.mrf.mxu0 }
 0x167   : > { %2805 = vst [vmem:[%s3740_s10] sm:$0xff] %v2804_v24   ;;  %v2283_v56 = vadd.f32 %v3729_v62, %v2263_v41 }
 0x168   : > { %v2002_v15 = vpop.f32.mrf.mxu3  ;;  %v1519_v33 = vpop.f32.mrf.mxu1 }
 0x169   : > { %v2038_v37 = vadd.f32 %v2002_v15, %v1704_v59  ;;  %v2299_v31 = vmul.f32 0.1, %v2283_v56  ;;  %v1552_v25 = vadd.f32 %v1519_v33, %v3584_v3 }
 0x16b   : > { %v2244_v54 = vadd.f32 %v2208_v30, %v2038_v37  ;;  %v2315_v26 = vmax.f32 %v2283_v56, %v2299_v31 }
 0x16c   : > { %v1671_v32 = vpop.f32.mrf.mxu2 }
 0x16d   : > { %v2264_v57 = vmul.f32 %v3722_v51, %v2244_v54  ;;  %v1705_v5 = vadd.f32 %v1671_v32, %v1551_v52 }
 0x16e   : > { %v2211_v47 = vpop.f32.mrf.mxu0 }
 0x16f   : > { %v2284_v27 = vadd.f32 %v3729_v62, %v2264_v57 }
 0x170   : > { %v2005_v48 = vpop.f32.mrf.mxu3  ;;  %v1522_v61 = vpop.f32.mrf.mxu1 }
 0x171   : > { %v2300_v42 = vmul.f32 0.1, %v2284_v27  ;;  %v2039_v11 = vadd.f32 %v2005_v48, %v1705_v5  ;;  %v1553_v34 = vadd.f32 %v1522_v61, %v3598_v12 }
 0x173   : > { %v2316_v40 = vmax.f32 %v2284_v27, %v2300_v42  ;;  %v2245_v39 = vadd.f32 %v2211_v47, %v2039_v11 }
 0x174   : > { %v1673_v10 = vpop.f32.mrf.mxu2 }
 0x175   : > { %v2809_v46 = vpack.c.bf16 %v2316_v40, %v2315_v26  ;;  %v1706_v7 = vadd.f32 %v1673_v10, %v1552_v25  ;;  %v2265_v53 = vmul.f32 %v3722_v51, %v2245_v39 }
 0x176   : > { %v2213_v55 = vpop.f32.mrf.mxu0 }
 0x177   : > { %2841 = vst [vmem:[%s3740_s10 + $0x8] sm:$0xff] %v2809_v46   ;;  %v2285_v21 = vadd.f32 %v3729_v62, %v2265_v53 }
 0x178   : > { %v2007_v45 = vpop.f32.mrf.mxu3  ;;  %v1524_v0 = vpop.f32.mrf.mxu1 }
 0x179   : > { %v2040_v1 = vadd.f32 %v2007_v45, %v1706_v7  ;;  %v2301_v20 = vmul.f32 0.1, %v2285_v21  ;;  %v1554_v38 = vadd.f32 %v1524_v0, %v3620_v16 }
 0x17b   : > { %v2246_v63 = vadd.f32 %v2213_v55, %v2040_v1  ;;  %v2317_v2 = vmax.f32 %v2285_v21, %v2301_v20 }
 0x17c   : > { %v1676_v19 = vpop.f32.mrf.mxu2 }
 0x17d   : > { %v2266_v6 = vmul.f32 %v3722_v51, %v2246_v63  ;;  %v1707_v35 = vadd.f32 %v1676_v19, %v1553_v34 }
 0x17e   : > { %v2216_v3 = vpop.f32.mrf.mxu0 }
 0x17f   : > { %v2286_v14 = vadd.f32 %v3729_v62, %v2266_v6 }
 0x180   : > { %v2010_v13 = vpop.f32.mrf.mxu3  ;;  %v1527_v60 = vpop.f32.mrf.mxu1 }
 0x181   : > { %v2302_v22 = vmul.f32 0.1, %v2286_v14  ;;  %v2041_v36 = vadd.f32 %v2010_v13, %v1707_v35  ;;  %v1555_v37 = vadd.f32 %v1527_v60, %v3640_v18 }
 0x183   : > { %v2318_v50 = vmax.f32 %v2286_v14, %v2302_v22  ;;  %v2247_v4 = vadd.f32 %v2216_v3, %v2041_v36 }
 0x184   : > { %v1678_v43 = vpop.f32.mrf.mxu2 }
 0x185   : > { %v2814_v12 = vpack.c.bf16 %v2318_v50, %v2317_v2  ;;  %v1708_v23 = vadd.f32 %v1678_v43, %v1554_v38  ;;  %v2267_v24 = vmul.f32 %v3722_v51, %v2247_v4 }
 0x186   : > { %v2218_v44 = vpop.f32.mrf.mxu0 }
 0x187   : > { %2842 = vst [vmem:[%s3740_s10 + $0x10] sm:$0xff] %v2814_v12   ;;  %v2287_v15 = vadd.f32 %v3729_v62, %v2267_v24 }
 0x188   : > { %v2012_v59 = vpop.f32.mrf.mxu3  ;;  %v1529_v30 = vpop.f32.mrf.mxu1 }
 0x189   : > { %v2042_v41 = vadd.f32 %v2012_v59, %v1708_v23  ;;  %v2303_v32 = vmul.f32 0.1, %v2287_v15  ;;  %v1556_v11 = vadd.f32 %v1529_v30, %v3654_v9 }
 0x18b   : > { %v2248_v33 = vadd.f32 %v2218_v44, %v2042_v41  ;;  %v2319_v48 = vmax.f32 %v2287_v15, %v2303_v32 }
 0x18c   : > { %v1681_v56 = vpop.f32.mrf.mxu2 }
 0x18d   : > { %v2268_v54 = vmul.f32 %v3722_v51, %v2248_v33  ;;  %v1709_v52 = vadd.f32 %v1681_v56, %v1555_v37 }
 0x18e   : > { %v2221_v16 = vpop.f32.mrf.mxu0 }
 0x18f   : > { %v2288_v57 = vadd.f32 %v3729_v62, %v2268_v54 }
 0x190   : > { %v2015_v5 = vpop.f32.mrf.mxu3  ;;  %v1532_v47 = vpop.f32.mrf.mxu1 }
 0x191   : > { %v2304_v31 = vmul.f32 0.1, %v2288_v57  ;;  %v2043_v27 = vadd.f32 %v2015_v5, %v1709_v52  ;;  %v1557_v45 = vadd.f32 %v1532_v47, %v3673_v17 }
 0x193   : > { %v2320_v61 = vmax.f32 %v2288_v57, %v2304_v31  ;;  %v2249_v42 = vadd.f32 %v2221_v16, %v2043_v27 }
 0x194   : > { %v1683_v26 = vpop.f32.mrf.mxu2 }
 0x195   : > { %v2819_v18 = vpack.c.bf16 %v2320_v61, %v2319_v48  ;;  %v1710_v40 = vadd.f32 %v1683_v26, %v1556_v11  ;;  %v2269_v25 = vmul.f32 %v3722_v51, %v2249_v42 }
 0x196   : > { %v2223_v39 = vpop.f32.mrf.mxu0 }
 0x197   : > { %2843 = vst [vmem:[%s3740_s10 + $0x18] sm:$0xff] %v2819_v18   ;;  %v2289_v55 = vadd.f32 %v3729_v62, %v2269_v25 }
 0x198   : > { %v2017_v10 = vpop.f32.mrf.mxu3  ;;  %v1534_v46 = vpop.f32.mrf.mxu1 }
 0x199   : > { %v2044_v7 = vadd.f32 %v2017_v10, %v1710_v40  ;;  %v2305_v63 = vmul.f32 0.1, %v2289_v55  ;;  %v1558_v60 = vadd.f32 %v1534_v46, %v3687_v8 }
 0x19b   : > { %v2250_v53 = vadd.f32 %v2223_v39, %v2044_v7  ;;  %v2321_v20 = vmax.f32 %v2289_v55, %v2305_v63 }
 0x19c   : > { %v1686_v0 = vpop.f32.mrf.mxu2 }
 0x19d   : > { %v2270_v1 = vmul.f32 %v3722_v51, %v2250_v53  ;;  %v1711_v21 = vadd.f32 %v1686_v0, %v1557_v45 }
 0x19e   : > { %v2226_v9 = vpop.f32.mrf.mxu0 }
 0x19f   : > { %v2290_v34 = vadd.f32 %v3729_v62, %v2270_v1 }
 0x1a0   : > { %v2020_v19 = vpop.f32.mrf.mxu3  ;;  %v1537_v3 = vpop.f32.mrf.mxu1 }
 0x1a1   : > { %v2306_v6 = vmul.f32 0.1, %v2290_v34  ;;  %v2045_v35 = vadd.f32 %v2020_v19, %v1711_v21  ;;  %v1559_v23 = vadd.f32 %v1537_v3, %v3699_v58 }
 0x1a3   : > { %v2322_v14 = vmax.f32 %v2290_v34, %v2306_v6  ;;  %v2251_v13 = vadd.f32 %v2226_v9, %v2045_v35 }
 0x1a4   : > { %v1688_v22 = vpop.f32.mrf.mxu2 }
 0x1a5   : > { %v2824_v17 = vpack.c.bf16 %v2322_v14, %v2321_v20  ;;  %v1712_v36 = vadd.f32 %v1688_v22, %v1558_v60  ;;  %v2271_v50 = vmul.f32 %v3722_v51, %v2251_v13 }
 0x1a6   : > { %v2228_v2 = vpop.f32.mrf.mxu0 }
 0x1a7   : > { %2844 = vst [vmem:[%s3740_s10 + $0x20] sm:$0xff] %v2824_v17   ;;  %v2291_v43 = vadd.f32 %v3729_v62, %v2271_v50 }
 0x1a8   : > { %v2022_v4 = vpop.f32.mrf.mxu3  ;;  %v1539_v44 = vpop.f32.mrf.mxu1 }
 0x1a9   : > { %v2046_v38 = vadd.f32 %v2022_v4, %v1712_v36  ;;  %v2307_v41 = vmul.f32 0.1, %v2291_v43  ;;  %v1560_v32 = vadd.f32 %v1539_v44, %v3708_v28 }
 0x1ab   : > { %v2252_v12 = vadd.f32 %v2228_v2, %v2046_v38  ;;  %v2323_v54 = vmax.f32 %v2291_v43, %v2307_v41 }
 0x1ac   : > { %v1691_v24 = vpop.f32.mrf.mxu2 }
 0x1ad   : > { %v2272_v59 = vmul.f32 %v3722_v51, %v2252_v12  ;;  %v1713_v30 = vadd.f32 %v1691_v24, %v1559_v23 }
 0x1ae   : > { %v2231_v8 = vpop.f32.mrf.mxu0 }
 0x1af   : > { %v2292_v15 = vadd.f32 %v3729_v62, %v2272_v59 }
 0x1b0   : > { %v2025_v33 = vpop.f32.mrf.mxu3  ;;  %v1542_v47 = vpop.f32.mrf.mxu1 }
 0x1b1   : > { %v2308_v37 = vmul.f32 0.1, %v2292_v15  ;;  %v2047_v56 = vadd.f32 %v2025_v33, %v1713_v30  ;;  %v1561_v26 = vadd.f32 %v1542_v47, %v3713_v29 }
 0x1b3   : > { %v2324_v52 = vmax.f32 %v2292_v15, %v2308_v37  ;;  %v2253_v16 = vadd.f32 %v2231_v8, %v2047_v56 }
 0x1b4   : > { %v1693_v57 = vpop.f32.mrf.mxu2 }
 0x1b5   : > { %v2829_v58 = vpack.c.bf16 %v2324_v52, %v2323_v54  ;;  %v1714_v5 = vadd.f32 %v1693_v57, %v1560_v32  ;;  %v2273_v27 = vmul.f32 %v3722_v51, %v2253_v16 }
 0x1b6   : > { %v2233_v31 = vpop.f32.mrf.mxu0 }
 0x1b7   : > { %2845 = vst [vmem:[%s3740_s10 + $0x28] sm:$0xff] %v2829_v58   ;;  %v2293_v42 = vadd.f32 %v3729_v62, %v2273_v27 }
 0x1b8   : > { %v2027_v48 = vpop.f32.mrf.mxu3  ;;  %v1544_v10 = vpop.f32.mrf.mxu1 }
 0x1b9   : > { %v2048_v61 = vadd.f32 %v2027_v48, %v1714_v5  ;;  %v2309_v39 = vmul.f32 0.1, %v2293_v42  ;;  %v1562_v21 = vadd.f32 %v1544_v10, %v3716_v49 }
 0x1bb   : > { %v2254_v11 = vadd.f32 %v2233_v31, %v2048_v61  ;;  %v2325_v45 = vmax.f32 %v2293_v42, %v2309_v39 }
 0x1bc   : > { %v1696_v18 = vpop.f32.mrf.mxu2 }
 0x1bd   : > { %v2274_v40 = vmul.f32 %v3722_v51, %v2254_v11  ;;  %v1715_v28 = vadd.f32 %v1696_v18, %v1561_v26 }
 0x1be   : > { %v2236_v46 = vpop.f32.mrf.mxu0 }
 0x1bf   : > { %v2294_v25 = vadd.f32 %v3729_v62, %v2274_v40 }
 0x1c0   : > { %v2030_v7 = vpop.f32.mrf.mxu3 }
 0x1c1   : > { %v2310_v55 = vmul.f32 0.1, %v2294_v25  ;;  %v2049_v53 = vadd.f32 %v2030_v7, %v1715_v28 }
 0x1c3   : > { %v2326_v0 = vmax.f32 %v2294_v25, %v2310_v55  ;;  %v2255_v1 = vadd.f32 %v2236_v46, %v2049_v53 }
 0x1c4   : > { %v1698_v9 = vpop.f32.mrf.mxu2 }
 0x1c5   : > { %v2834_v29 = vpack.c.bf16 %v2326_v0, %v2325_v45  ;;  %v1716_v63 = vadd.f32 %v1698_v9, %v1562_v21  ;;  %v2275_v34 = vmul.f32 %v3722_v51, %v2255_v1 }
 0x1c6   : > { %v2238_v35 = vpop.f32.mrf.mxu0 }
 0x1c7   : > { %2846 = vst [vmem:[%s3740_s10 + $0x30] sm:$0xff] %v2834_v29   ;;  %v2295_v3 = vadd.f32 %v3729_v62, %v2275_v34 }
 0x1c8   : > { %v2032_v19 = vpop.f32.mrf.mxu3 }
 0x1c9   : > { %v2050_v6 = vadd.f32 %v2032_v19, %v1716_v63  ;;  %v2311_v13 = vmul.f32 0.1, %v2295_v3 }
 0x1cb   : > { %v2256_v20 = vadd.f32 %v2238_v35, %v2050_v6  ;;  %v2327_v49 = vmax.f32 %v2295_v3, %v2311_v13 }
 0x1cd   : > { %v2276_v14 = vmul.f32 %v3722_v51, %v2256_v20 }
 0x1cf   : > { %v2296_v60 = vadd.f32 %v3729_v62, %v2276_v14 }
 0x1d1   : > { %v2312_v22 = vmul.f32 0.1, %v2296_v60 }
 0x1d3   : > { %v2328_v17 = vmax.f32 %v2296_v60, %v2312_v22 }
 0x1d5   : > { %v2839_v36 = vpack.c.bf16 %v2328_v17, %v2327_v49 }
 0x1d7   : > { %2847 = vst [vmem:[%s3740_s10 + $0x38] sm:$0xff] %v2839_v36  }
 0x1d8 PF: > { %s14_s19 = sadd.s32 1, %s2932_s19   ;;  %s3814_s15 = smov %s2924_s17 }
 0x1d9   : > { %p11_p7 = scmp.ge.s32.totalorder %s14_s19, 6   ;;  %s3815_s16 = smov %s2928_s18 }
 0x1da   : > { %s3816_s17 = smov %s3819_s20  ;;  %s3817_s18 = smov %s3823_s21 }
 0x1db   :  { %13 = sbr.rel (!%p11_p7) target bundleno = 3 (0x3), region = 77 }

// kernel: cnn_block_forward.2
= control target key start
LH: loop header
LB: loop body
LE: loop exit
PB: predicated region body
PF: predicated region fallthrough
CT: control target
= control target key end

     0   :  { %s2868_s9 = smov 0   ;;  %s2870_s10 = smov 0   ;;  %s3700_s0 = inlined_call_operand.vmem [shape: bf16[2,18,18,8], index: 0, kind: input, shape index: {}]   ;;  %s3701_s1 = inlined_call_operand.vmem [shape: bf16[9,8,128], index: 1, kind: input, shape index: {}]   ;;  %s3702_s2 = inlined_call_operand.vmem [shape: f32[4,8,128], index: 2, kind: output, shape index: {}]  }
   0x1   :  { %s2872_s11 = smov 0   ;;  %s2874_s12 = smov 0  }
   0x2   :  { %s2876_s13 = smov 0  }
   0x3 LB: > { %s21_s14 = sadd.s32 1, %s2843_s11  ;;  %s24_s15 = sadd.s32 1, %s2847_s12  ;;  %s2851_s13 = sphi %s2876_s13, %s12_s13   ;;  %s2847_s12 = sphi %s2874_s12, %s3710_s12   ;;  %s2843_s11 = sphi %s2872_s11, %s3709_s11   ;;  %s2839_s10 = sphi %s2870_s10, %s3708_s10   ;;  %s2835_s9 = sphi %s2868_s9, %s3707_s9  }
   0x4   : > { %p22_p0 = scmp.ge.s32.totalorder %s21_s14, 2  ;;  %p2434_p1 = scmp.ge.s32.totalorder %s2851_s13, 1 }
   0x5   : > { %p128_p2 = scmp.lt.s32.totalorder %s2851_s13, 5 }
   0x6   : > { %s3712_s14 = smov (%p22_p0, %s21_s14), 0  ;;  %s3714_s15 = smov (!%p22_p0, %s24_s15), %s2847_s12 }
   0x7   : > { %p129_p3 = pnand %p2434_p1, %p128_p2  ;;  %p26_p4 = scmp.ge.s32.totalorder %s3714_s15, 2 }
   0x8   : > { %p151_p5 = scmp.lt.s32.totalorder (!%p129_p3), %s2839_s10, 1  ;;  %s2744_s21 = smul.u32 (!%p129_p3), 96, %s2835_s9 }
   0x9   : > { %s3716_s15 = smov (%p26_p4, %s3714_s15), 0  ;;  %132 = sbr.rel (%p129_p3) target bundleno = 482 (0x1e2), region = 28 }
   0xa   : > { %s2438_s20 = sshll.u32 (!%p129_p3), %s2835_s9, 3  ;;  %s2436_s23 = sshll.u32 (!%p129_p3), %s2839_s10, 1 }
   0xb   : > { %s157_s24 = sadd.s32 (!%p129_p3), %s2835_s9, %s2436_s23 }
   0xc   : > { %p158_p7 = scmp.lt.s32.totalorder (!%p129_p3), %s157_s24, 3 }
   0xe   : > { %v2441_v0 = vld [vmem:[%s3701_s1 + $0x4] sm:$0xf]  ;;  %vm440_vm0 = vcmask 1043456   ;;  %s152_s18 = scalar_select %p151_p5, %s2839_s10, 1  ;;  %v2498_v2 = vld [vmem:[%s3701_s1 + $0x8] sm:$0xf] }
   0xf   : > { %v442_v1 = vsel %vm440_vm0, %v2441_v0, 0  ;;  %v743_v3 = vsel %vm440_vm0, %v2498_v2, 0  ;;  %v2525_v4 = vld [vmem:[%s3701_s1 + $0xc] sm:$0xf]  ;;  %v185_v5 = vld [vmem:[%s3701_s1] sm:$0xf] }
  0x10   : > { %2769 = vmatpush.bf16.msra.mxu1 %v442_v1  ;;  %2770 = vmatpush.bf16.msra.mxu2 %v442_v1  ;;  %s2772_s22 = smul.u32 216, %s152_s18  ;;  %v897_v6 = vsel %vm440_vm0, %v2525_v4, 0  ;;  %v558_v7 = vsel %vm440_vm0, %v185_v5, 0  ;;  %v2590_v8 = vld [vmem:[%s3701_s1 + $0x10] sm:$0xf]  ;;  %vm415_vm3 = vcmask 64512  }
  0x11   : > { %2771 = vmatpush.bf16.msra.mxu3 %v442_v1  ;;  %451 = vmatpush.bf16.msra.mxu0 %v442_v1  ;;  %v1231_v9 = vsel %vm440_vm0, %v2590_v8, 0  ;;  %vm194_vm1 = vsmask.f32 3328  ;;  %vm195_vm2 = vsmask.f32 7440  ;;  %vm633_vm5 = vcmask 1042432  }
  0x12   : > { %s155_s3 = scalar_lea.vmem %s3700_s0, %s2772_s22  ;;  %vm2956_vm4 = vmor %vm194_vm1, %vm195_vm2  ;;  %vm634_vm6 = vcmask 1046532   ;;  %s3720_s24 = smov (!%p158_p7, %s157_s24), 3 }
  0x13   : > { %s2928_s4 = scalar_lea.vmem %s155_s3, %s2744_s21  ;;  %vm3064_vm7 = vmor %vm633_vm5, %vm634_vm6  ;;  %s2198_s21 = ssub.s32 16, %s2438_s20 }
  0x14   : > { %752 = vmatpush.bf16.msrb.mxu2 %v743_v3  ;;  %567 = vmatpush.bf16.msrb.mxu1 %v558_v7  ;;  %v173_v10 = vld [vmem:[%s2928_s4 + $0x18] sm:$0xf]  ;;  %v2932_v11 = vld [vmem:[%s2928_s4 + $0x1c] sm:$0xf]  ;;  %v2935_v12 = vld [vmem:[%s2928_s4 + $0x20] sm:$0x1] }
  0x15   : > { %906 = vmatpush.bf16.msrb.mxu3 %v897_v6  ;;  %1240 = vmatpush.bf16.msrb.mxu0 %v1231_v9  ;;  %v246_v13 = vshrl.u32 %v173_v10, 16  ;;  %v249_v14 = vshll.u32 %v173_v10, 16  ;;  %v255_v15 = vshll.u32 %v2932_v11, 16  ;;  %v259_v16 = vshrl.u32 %v2932_v11, 16  ;;  %v177_v17 = vld [vmem:[%s2928_s4 + $0x30] sm:$0xf] }
  0x16   : > { %v265_v18 = vshll.u32 %v2935_v12, 16  ;;  %v2942_v19 = vld [vmem:[%s2928_s4 + $0x34] sm:$0xf]  ;;  %v2945_v20 = vld [vmem:[%s2928_s4 + $0x38] sm:$0x1]  ;;  %v294_v21 = vshrl.u32 %v177_v17, 16 }
  0x17   : > { %v248_v22 = vrot.slane %v246_v13, 4  ;;  %v251_v23 = vrot.slane %v249_v14, 5  ;;  %v257_v24 = vrot.slane %v255_v15, 5  ;;  %v261_v25 = vrot.slane %v259_v16, 4  ;;  %v181_v26 = vld [vmem:[%s2928_s4 + $0x48] sm:$0xf] }
  0x18   : > { %v267_v27 = vrot.slane %v265_v18, 5  ;;  %v296_v28 = vrot.slane %v294_v21, 4  ;;  %v297_v29 = vshll.u32 %v177_v17, 16  ;;  %v303_v30 = vshll.u32 %v2942_v19, 16  ;;  %v2952_v35 = vld [vmem:[%s2928_s4 + $0x4c] sm:$0xf] }
  0x19   : > { %v252_v31 = vor.u32 %v251_v23, %v248_v22  ;;  %v262_v32 = vor.u32 %v261_v25, %v257_v24  ;;  %v307_v33 = vshrl.u32 %v2942_v19, 16  ;;  %v313_v34 = vshll.u32 %v2945_v20, 16  ;;  %v2961_v46 = vld [vmem:[%s2928_s4 + $0x50] sm:$0x1]  ;;  %v169_v54 = vld [vmem:[%s2928_s4] sm:$0xf] }
  0x1a   : > { %v299_v37 = vrot.slane %v297_v29, 5  ;;  %v305_v38 = vrot.slane %v303_v30, 5  ;;  %v342_v39 = vshrl.u32 %v181_v26, 16  ;;  %v345_v40 = vshll.u32 %v181_v26, 16  ;;  %v2974_v2 = vld [vmem:[%s2928_s4 + $0x4] sm:$0xf] }
  0x1b   : > { %v253_v41 = vrot.slane %v252_v31, 4  ;;  %v263_v42 = vrot.slane %v262_v32, 4  ;;  %v309_v43 = vrot.slane %v307_v33, 4  ;;  %v315_v44 = vrot.slane %v313_v34, 5  ;;  %v2979_v8 = vld [vmem:[%s2928_s4 + $0x8] sm:$0x1] }
  0x1c   : > { %v300_v45 = vor.u32 %v299_v37, %v296_v28  ;;  %v344_v47 = vrot.slane %v342_v39, 4  ;;  %v347_v48 = vrot.slane %v345_v40, 5  ;;  %v351_v49 = vshll.u32 %v2952_v35, 16  ;;  %v175_v15 = vld [vmem:[%s2928_s4 + $0x24] sm:$0xf]  ;;  %p2199_p6 = scmp.lt.s32.totalorder %s2198_s21, 8 }
  0x1d   : > { %v258_v50 = vsel %vm2956_vm4, %v253_v41, %v257_v24  ;;  %v268_v51 = vsel %vm2956_vm4, %v263_v42, %v267_v27  ;;  %v310_v52 = vor.u32 %v309_v43, %v305_v38  ;;  %v355_v53 = vshrl.u32 %v2952_v35, 16  ;;  %v2990_v26 = vld [vmem:[%s2928_s4 + $0x28] sm:$0xf]  ;;  %v2995_v30 = vld [vmem:[%s2928_s4 + $0x2c] sm:$0x1]  ;;  %s2437_s25 = sshll.u32 %s3720_s24, 3 }
  0x1e   : > { %v395_v55 = vunpack.c.l.b16 %v258_v50  ;;  %v396_v56 = vunpack.c.l.b16 %v268_v51  ;;  %v301_v57 = vrot.slane %v300_v45, 4  ;;  %v348_v58 = vor.u32 %v347_v48, %v344_v47  ;;  %v3003_v51 = vld [vmem:[%s2928_s4 + $0x40] sm:$0xf]  ;;  %s3718_s21 = smov (!%p2199_p6, %s2198_s21), 8  ;;  %s161_s26 = scalar_lea.vmem %s3702_s2, %s2437_s25 }
  0x1f   : > { %v311_v59 = vrot.slane %v310_v52, 4  ;;  %v353_v60 = vrot.slane %v351_v49, 5  ;;  %v357_v61 = vrot.slane %v355_v53, 4  ;;  %v361_v62 = vshll.u32 %v2961_v46, 16  ;;  %s2741_s22 = sshll.u32 %s3718_s21, 4 }
  0x20   : > { %v409_v63 = vpack.c.b16 %v396_v56, %v395_v55  ;;  %v306_v0 = vsel %vm2956_vm4, %v301_v57, %v305_v38  ;;  %v349_v1 = vrot.slane %v348_v58, 4  ;;  %v198_v3 = vshrl.u32 %v169_v54, 16  ;;  %v179_v38 = vld [vmem:[%s2928_s4 + $0x3c] sm:$0xf]  ;;  %v3009_v56 = vld [vmem:[%s2928_s4 + $0x44] sm:$0x1] }
  0x21   : > { %v316_v4 = vsel %vm2956_vm4, %v311_v59, %v315_v44  ;;  %v399_v5 = vunpack.c.l.b16 %v306_v0  ;;  %v358_v6 = vor.u32 %v357_v61, %v353_v60  ;;  %v363_v7 = vrot.slane %v361_v62, 5  ;;  %v183_v58 = vld [vmem:[%s2928_s4 + $0x54] sm:$0xf] }
  0x22   : > { %2444 = vmatmul.msk.bf16.vlgmr.msra.gmra.mxu1 %vm415_vm3, %v409_v63  ;;  %v400_v9 = vunpack.c.l.b16 %v316_v4  ;;  %v354_v10 = vsel %vm2956_vm4, %v349_v1, %v353_v60  ;;  %v200_v13 = vrot.slane %v198_v3, 4  ;;  %v201_v14 = vshll.u32 %v169_v54, 16 }
  0x23   : > { %v359_v16 = vrot.slane %v358_v6, 4  ;;  %v403_v17 = vunpack.c.l.b16 %v354_v10  ;;  %v207_v18 = vshll.u32 %v2974_v2, 16  ;;  %v211_v21 = vshrl.u32 %v2974_v2, 16 }
  0x24   : > { %v411_v22 = vpack.c.b16 %v400_v9, %v399_v5  ;;  %v203_v23 = vrot.slane %v201_v14, 5  ;;  %v217_v24 = vshll.u32 %v2979_v8, 16  ;;  %v641_v25 = vrot.slane %v2979_v8, 5 }
  0x25   : > { %v364_v27 = vsel %vm2956_vm4, %v359_v16, %v363_v7  ;;  %v209_v28 = vrot.slane %v207_v18, 5  ;;  %v213_v29 = vrot.slane %v211_v21, 4  ;;  %v270_v31 = vshrl.u32 %v175_v15, 16  ;;  %v3023_v16 = vld [vmem:[%s2928_s4 + $0x5c] sm:$0x1] }
  0x26   : > { %2446 = vmatmul.msk.bf16.vlgmr.msra.gmra.mxu2 %vm415_vm3, %v411_v22  ;;  %v404_v32 = vunpack.c.l.b16 %v364_v27  ;;  %v204_v33 = vor.u32 %v203_v23, %v200_v13  ;;  %v219_v34 = vrot.slane %v217_v24, 5  ;;  %v273_v37 = vshll.u32 %v175_v15, 16  ;;  %v3020_v15 = vld [vmem:[%s2928_s4 + $0x58] sm:$0xf]  ;;  %v171_v23 = vld [vmem:[%s2928_s4 + $0xc] sm:$0xf] }
  0x27   : > { %v214_v39 = vor.u32 %v213_v29, %v209_v28  ;;  %v272_v40 = vrot.slane %v270_v31, 4  ;;  %v279_v41 = vshll.u32 %v2990_v26, 16  ;;  %v283_v42 = vshrl.u32 %v2990_v26, 16 }
  0x28   : > { %v413_v43 = vpack.c.b16 %v404_v32, %v403_v17  ;;  %v205_v44 = vrot.slane %v204_v33, 4  ;;  %v275_v45 = vrot.slane %v273_v37, 5  ;;  %v289_v47 = vshll.u32 %v2995_v30, 16 }
  0x29   : > { %v215_v48 = vrot.slane %v214_v39, 4  ;;  %v281_v49 = vrot.slane %v279_v41, 5  ;;  %v285_v50 = vrot.slane %v283_v42, 4  ;;  %v318_v52 = vshrl.u32 %v179_v38, 16 }
  0x2a   : > { %2448 = vmatmul.msk.bf16.vlgmr.msra.gmra.mxu3 %vm415_vm3, %v413_v43  ;;  %v210_v53 = vsel %vm2956_vm4, %v205_v44, %v209_v28  ;;  %v276_v54 = vor.u32 %v275_v45, %v272_v40  ;;  %v291_v55 = vrot.slane %v289_v47, 5  ;;  %v321_v57 = vshll.u32 %v179_v38, 16  ;;  %v3035_v40 = vld [vmem:[%s2928_s4 + $0x10] sm:$0xf]  ;;  %v3038_v47 = vld [vmem:[%s2928_s4 + $0x14] sm:$0x1] }
  0x2b   : > { %v220_v59 = vsel %vm2956_vm4, %v215_v48, %v219_v34  ;;  %v391_v60 = vunpack.c.l.b16 %v210_v53  ;;  %v286_v61 = vor.u32 %v285_v50, %v281_v49  ;;  %v320_v62 = vrot.slane %v318_v52, 4 }
  0x2c   : > { %v392_v63 = vunpack.c.l.b16 %v220_v59  ;;  %v277_v0 = vrot.slane %v276_v54, 4  ;;  %v323_v1 = vrot.slane %v321_v57, 5  ;;  %v327_v3 = vshll.u32 %v3003_v51, 16 }
  0x2d   : > { %v287_v4 = vrot.slane %v286_v61, 4  ;;  %v331_v5 = vshrl.u32 %v3003_v51, 16  ;;  %v337_v6 = vshll.u32 %v3009_v56, 16  ;;  %v366_v7 = vshrl.u32 %v183_v58, 16 }
  0x2e   : > { %v407_v9 = vpack.c.b16 %v392_v63, %v391_v60  ;;  %v282_v10 = vsel %vm2956_vm4, %v277_v0, %v281_v49  ;;  %v324_v13 = vor.u32 %v323_v1, %v320_v62  ;;  %v329_v14 = vrot.slane %v327_v3, 5  ;;  %v609_v1 = vld [vmem:[%s2928_s4] sm:$0xe] }
  0x2f   : > { %v292_v17 = vsel %vm2956_vm4, %v287_v4, %v291_v55  ;;  %v397_v18 = vunpack.c.l.b16 %v282_v10  ;;  %v333_v21 = vrot.slane %v331_v5, 4  ;;  %v339_v22 = vrot.slane %v337_v6, 5 }
  0x30   : > { %2442 = vmatmul.msk.bf16.vlgmr.msra.gmra.mxu0 %vm415_vm3, %v407_v9  ;;  %v398_v24 = vunpack.c.l.b16 %v292_v17  ;;  %v325_v27 = vrot.slane %v324_v13, 4  ;;  %v368_v28 = vrot.slane %v366_v7, 4  ;;  %v369_v29 = vshll.u32 %v183_v58, 16  ;;  %v2642_v7 = vld [vmem:[%s3701_s1 + $0x18] sm:$0xf] }
  0x31   : > { %v334_v31 = vor.u32 %v333_v21, %v329_v14  ;;  %v375_v32 = vshll.u32 %v3020_v15, 16  ;;  %v379_v33 = vshrl.u32 %v3020_v15, 16  ;;  %v385_v34 = vshll.u32 %v3023_v16, 16  ;;  %v2566_v9 = vld [vmem:[%s2928_s4 + $0xc] sm:$0xf] }
  0x32   : > { %v410_v37 = vpack.c.b16 %v398_v24, %v397_v18  ;;  %v330_v38 = vsel %vm2956_vm4, %v325_v27, %v329_v14  ;;  %v371_v39 = vrot.slane %v369_v29, 5  ;;  %v222_v41 = vshrl.u32 %v171_v23, 16  ;;  %v3059_v27 = vld [vmem:[%s2928_s4 + $0x10] sm:$0xf] }
  0x33   : > { %v335_v42 = vrot.slane %v334_v31, 4  ;;  %v401_v43 = vunpack.c.l.b16 %v330_v38  ;;  %v377_v44 = vrot.slane %v375_v32, 5  ;;  %v381_v45 = vrot.slane %v379_v33, 4 }
  0x34   : > { %2445 = vmatmul.msk.bf16.gmra.mxu1 %vm415_vm3, %v410_v37  ;;  %v372_v48 = vor.u32 %v371_v39, %v368_v28  ;;  %v387_v49 = vrot.slane %v385_v34, 5  ;;  %v224_v50 = vrot.slane %v222_v41, 4  ;;  %v225_v52 = vshll.u32 %v171_v23, 16  ;;  %v3069_v37 = vld [vmem:[%s2928_s4 + $0x14] sm:$0x1] }
  0x35   : > { %v340_v53 = vsel %vm2956_vm4, %v335_v42, %v339_v22  ;;  %v382_v54 = vor.u32 %v381_v45, %v377_v44  ;;  %v231_v55 = vshll.u32 %v3035_v40, 16  ;;  %v235_v57 = vshrl.u32 %v3035_v40, 16  ;;  %v2707_v41 = vld [vmem:[%s3701_s1 + $0x1c] sm:$0xf]  ;;  %v2615_v45 = vld [vmem:[%s3701_s1 + $0x14] sm:$0xf] }
  0x36   : > { %v402_v58 = vunpack.c.l.b16 %v340_v53  ;;  %v373_v59 = vrot.slane %v372_v48, 4  ;;  %v227_v60 = vrot.slane %v225_v52, 5  ;;  %v241_v61 = vshll.u32 %v3038_v47, 16  ;;  %v2732_v53 = vld [vmem:[%s3701_s1 + $0x20] sm:$0xf] }
  0x37   : > { %v383_v62 = vrot.slane %v382_v54, 4  ;;  %v233_v63 = vrot.slane %v231_v55, 5  ;;  %v237_v0 = vrot.slane %v235_v57, 4  ;;  %v2490_v21 = vrot.slane %v609_v1, 9  ;;  %v2745_v55 = vld [vmem:[%s2928_s4] sm:$0xff] }
  0x38   : > { %v412_v3 = vpack.c.b16 %v402_v58, %v401_v43  ;;  %v378_v4 = vsel %vm2956_vm4, %v373_v59, %v377_v44  ;;  %v228_v5 = vor.u32 %v227_v60, %v224_v50  ;;  %v243_v6 = vrot.slane %v241_v61, 5 }
  0x39   : > { %v388_v10 = vsel %vm2956_vm4, %v383_v62, %v387_v49  ;;  %v405_v13 = vunpack.c.l.b16 %v378_v4  ;;  %v238_v14 = vor.u32 %v237_v0, %v233_v63  ;;  %v638_v22 = vrot.slane %v2974_v2, 5  ;;  %v3100_v4 = vld [vmem:[%s2928_s4 + $0x1c] sm:$0xf] }
  0x3a   : > { %2447 = vmatmul.msk.bf16.gmra.mxu2 %vm415_vm3, %v412_v3  ;;  %v406_v17 = vunpack.c.l.b16 %v388_v10  ;;  %v229_v18 = vrot.slane %v228_v5, 4  ;;  %v1591_v24 = vsel %vm440_vm0, %v2642_v7, 0  ;;  %v989_v28 = vshrl.u32 %v2566_v9, 16  ;;  %v2569_v3 = vld [vmem:[%s2928_s4 + $0x18] sm:$0xf] }
  0x3b   : > { %v239_v23 = vrot.slane %v238_v14, 4  ;;  %v992_v29 = vshll.u32 %v2566_v9, 16  ;;  %v640_v34 = vrot.slane %v638_v22, 4  ;;  %1600 = vmatpush.bf16.msra.mxu2 %v1591_v24  ;;  %v998_v44 = vshll.u32 %v3059_v27, 16  ;;  %v611_v5 = vld [vmem:[%s2928_s4 + $0x18] sm:$0xe] }
  0x3c   : > { %v414_v31 = vpack.c.b16 %v406_v17, %v405_v13  ;;  %v234_v32 = vsel %vm2956_vm4, %v229_v18, %v233_v63  ;;  %v991_v39 = vrot.slane %v989_v28, 4  ;;  %v639_v48 = vsel %vm3064_vm7, %v2490_v21, %v638_v22  ;;  %v610_v7 = vld [vmem:[%s2928_s4 + $0xc] sm:$0xe] }
  0x3d   : > { %v244_v2 = vsel %vm2956_vm4, %v239_v23, %v243_v6  ;;  %v393_v38 = vunpack.c.l.b16 %v234_v32  ;;  %v994_v43 = vrot.slane %v992_v29, 5  ;;  %v642_v49 = vsel %vm3064_vm7, %v640_v34, %v641_v25  ;;  %v2753_v34 = vld [vmem:[%s2928_s4 + $0xc] sm:$0xff] }
  0x3e   : > { %2449 = vmatmul.msk.bf16.gmra.mxu3 %vm415_vm3, %v414_v31  ;;  %v394_v42 = vunpack.c.l.b16 %v244_v2  ;;  %v1002_v50 = vshrl.u32 %v3059_v27, 16  ;;  %v1008_v52 = vshll.u32 %v3069_v37, 16  ;;  %v1000_v58 = vrot.slane %v998_v44, 5 }
  0x3f   : > { %v995_v57 = vor.u32 %v994_v43, %v991_v39  ;;  %v1925_v59 = vsel %vm440_vm0, %v2707_v41, 0  ;;  %v1437_v25 = vsel %vm440_vm0, %v2615_v45, 0  ;;  %v694_v60 = vunpack.c.l.b16 %v639_v48 }
  0x40   : > { %v408_v54 = vpack.c.b16 %v394_v42, %v393_v38  ;;  %v1004_v8 = vrot.slane %v1002_v50, 4  ;;  %1934 = vmatpush.bf16.msra.mxu3 %v1925_v59  ;;  %v695_v61 = vunpack.c.l.b16 %v642_v49  ;;  %1446 = vmatpush.bf16.msra.mxu1 %v1437_v25  ;;  %v2131_v63 = vsel %vm440_vm0, %v2732_v53, 0 }
  0x41   : > { %v996_v62 = vrot.slane %v995_v57, 4  ;;  %v1010_v1 = vrot.slane %v1008_v52, 5  ;;  %2140 = vmatpush.bf16.msra.mxu0 %v2131_v63  ;;  %v645_v9 = vrot.slane %v3035_v40, 5  ;;  %v1013_v14 = vshrl.u32 %v2569_v3, 16  ;;  %v612_v63 = vld [vmem:[%s2928_s4 + $0x24] sm:$0xe] }
  0x42   : > { %2443 = vmatmul.msk.bf16.gmra.mxu0 %vm415_vm3, %v408_v54  ;;  %v1005_v0 = vor.u32 %v1004_v8, %v1000_v58  ;;  %v710_v10 = vpack.c.b16 %v695_v61, %v694_v60  ;;  %v1016_v17 = vshll.u32 %v2569_v3, 16  ;;  %v1022_v21 = vshll.u32 %v3100_v4, 16  ;;  %v2572_v61 = vld [vmem:[%s2928_s4 + $0x24] sm:$0xf] }
  0x43   : > { %v1001_v13 = vsel %vm2956_vm4, %v996_v62, %v1000_v58  ;;  %v1026_v22 = vshrl.u32 %v3100_v4, 16  ;;  %v2492_v23 = vrot.slane %v611_v5, 9  ;;  %v2491_v24 = vrot.slane %v610_v7, 9  ;;  %v3134_v62 = vld [vmem:[%s2928_s4 + $0x28] sm:$0xf] }
  0x44   : > { %2482 = vmatmul.msk.bf16.vlgmr.msrb.gmra.mxu1 %vm415_vm3, %v2745_v55  ;;  %v1006_v6 = vrot.slane %v1005_v0, 4  ;;  %v652_v28 = vrot.slane %v2932_v11, 5  ;;  %v1182_v40 = vunpack.c.l.b16 %v1001_v13  ;;  %v647_v29 = vrot.slane %v645_v9, 4  ;;  %v3119_v11 = vld [vmem:[%s2928_s4 + $0x20] sm:$0x1]  ;;  %v2746_v55 = vld [vmem:[%s2928_s4 + $0xc] sm:$0xff] }
  0x45   : > { %v648_v31 = vrot.slane %v3038_v47, 5  ;;  %v655_v32 = vrot.slane %v2935_v12, 5  ;;  %v1015_v38 = vrot.slane %v1013_v14, 4  ;;  %v1018_v39 = vrot.slane %v1016_v17, 5 }
  0x46   : > { %v1011_v18 = vsel %vm2956_vm4, %v1006_v6, %v1010_v1  ;;  %v653_v41 = vsel %vm3064_vm7, %v2492_v23, %v652_v28  ;;  %v1024_v42 = vrot.slane %v1022_v21, 5  ;;  %v1028_v43 = vrot.slane %v1026_v22, 4  ;;  %v2754_v22 = vld [vmem:[%s2928_s4 + $0x18] sm:$0xff] }
  0x47   : > { %v1183_v2 = vunpack.c.l.b16 %v1011_v18  ;;  %v654_v44 = vrot.slane %v652_v28, 4  ;;  %v698_v45 = vunpack.c.l.b16 %v653_v41  ;;  %v646_v47 = vsel %vm3064_vm7, %v2491_v24, %v645_v9 }
  0x48   : > { %v649_v49 = vsel %vm3064_vm7, %v647_v29, %v648_v31  ;;  %v1019_v50 = vor.u32 %v1018_v39, %v1015_v38  ;;  %v1029_v53 = vor.u32 %v1028_v43, %v1024_v42  ;;  %v1032_v54 = vshll.u32 %v3119_v11, 16  ;;  %v2575_v43 = vld [vmem:[%s2928_s4 + $0x30] sm:$0xf] }
  0x49   : > { %v656_v12 = vsel %vm3064_vm7, %v654_v44, %v655_v32  ;;  %v1198_v48 = vpack.c.b16 %v1183_v2, %v1182_v40  ;;  %v696_v58 = vunpack.c.l.b16 %v646_v47  ;;  %v697_v59 = vunpack.c.l.b16 %v649_v49  ;;  %v3160_v44 = vld [vmem:[%s2928_s4 + $0x34] sm:$0xf] }
  0x4a   : > { %2499 = vmatmul.msk.bf16.vlgmr.msrb.gmra.mxu2 %vm415_vm3, %v710_v10  ;;  %v699_v52 = vunpack.c.l.b16 %v656_v12  ;;  %v1020_v8 = vrot.slane %v1019_v50, 4  ;;  %v1030_v25 = vrot.slane %v1029_v53, 4  ;;  %v1034_v60 = vrot.slane %v1032_v54, 5 }
  0x4b   : > { %v659_v0 = vrot.slane %v2990_v26, 5  ;;  %v662_v1 = vrot.slane %v2995_v30, 5  ;;  %v711_v3 = vpack.c.b16 %v697_v59, %v696_v58  ;;  %v2493_v5 = vrot.slane %v612_v63, 9  ;;  %v3172_v63 = vld [vmem:[%s2928_s4 + $0x38] sm:$0x1] }
  0x4c   : > { %v712_v57 = vpack.c.b16 %v699_v52, %v698_v45  ;;  %v1025_v6 = vsel %vm2956_vm4, %v1020_v8, %v1024_v42  ;;  %v1037_v7 = vshrl.u32 %v2572_v61, 16  ;;  %v1040_v9 = vshll.u32 %v2572_v61, 16  ;;  %v2747_v42 = vld [vmem:[%s2928_s4 + $0x18] sm:$0xff] }
  0x4d   : > { %v661_v10 = vrot.slane %v659_v0, 4  ;;  %v1035_v13 = vsel %vm2956_vm4, %v1030_v25, %v1034_v60  ;;  %v1046_v14 = vshll.u32 %v3134_v62, 16  ;;  %v1050_v17 = vshrl.u32 %v3134_v62, 16  ;;  %v2755_v25 = vld [vmem:[%s2928_s4 + $0x24] sm:$0xff] }
  0x4e   : > { %2558 = vmatmul.msk.bf16.vlgmr.msrb.gmra.mxu3 %vm415_vm3, %v2753_v34  ;;  %v660_v26 = vsel %vm3064_vm7, %v2493_v5, %v659_v0  ;;  %v1184_v23 = vunpack.c.l.b16 %v1025_v6  ;;  %v1185_v24 = vunpack.c.l.b16 %v1035_v13  ;;  %v1039_v28 = vrot.slane %v1037_v7, 4  ;;  %v3152_v34 = vld [vmem:[%s2928_s4 + $0x2c] sm:$0x1]  ;;  %v2748_v6 = vld [vmem:[%s2928_s4 + $0x24] sm:$0xff]  ;;  %v3180_v13 = vld [vmem:[%s2928_s4 + $0x40] sm:$0xf] }
  0x4f   : > { %v663_v30 = vsel %vm3064_vm7, %v661_v10, %v662_v1  ;;  %v700_v18 = vunpack.c.l.b16 %v660_v26  ;;  %v1042_v40 = vrot.slane %v1040_v9, 5  ;;  %v1048_v29 = vrot.slane %v1046_v14, 5  ;;  %v613_v26 = vld [vmem:[%s2928_s4 + $0x30] sm:$0xe] }
  0x50   : > { %v701_v21 = vunpack.c.l.b16 %v663_v30  ;;  %v1052_v31 = vrot.slane %v1050_v17, 4  ;;  %v1199_v2 = vpack.c.b16 %v1185_v24, %v1184_v23  ;;  %v1056_v41 = vshll.u32 %v3152_v34, 16 }
  0x51   : > { %v1043_v38 = vor.u32 %v1042_v40, %v1039_v28  ;;  %v1064_v49 = vshll.u32 %v2575_v43, 16  ;;  %v1070_v50 = vshll.u32 %v3160_v44, 16  ;;  %v1074_v52 = vshrl.u32 %v3160_v44, 16 }
  0x52   : > { %2591 = vmatmul.msk.bf16.vlgmr.msrb.gmra.mxu0 %vm415_vm3, %v1198_v48  ;;  %v713_v32 = vpack.c.b16 %v701_v21, %v700_v18  ;;  %v1053_v39 = vor.u32 %v1052_v31, %v1048_v29  ;;  %v1058_v12 = vrot.slane %v1056_v41, 5  ;;  %v1061_v48 = vshrl.u32 %v2575_v43, 16  ;;  %v3195_v43 = vld [vmem:[%s2928_s4 + $0x44] sm:$0x1] }
  0x53   : > { %v1044_v45 = vrot.slane %v1043_v38, 4  ;;  %v1066_v58 = vrot.slane %v1064_v49, 5  ;;  %v1072_v59 = vrot.slane %v1070_v50, 5  ;;  %v1076_v8 = vrot.slane %v1074_v52, 4  ;;  %v2749_v49 = vld [vmem:[%s2928_s4 + $0x30] sm:$0xff] }
  0x54   : > { %2483 = vmatmul.msk.bf16.gmra.mxu1 %vm415_vm3, %v2746_v55  ;;  %v1054_v47 = vrot.slane %v1053_v39, 4  ;;  %v1063_v55 = vrot.slane %v1061_v48, 4  ;;  %v1094_v21 = vshll.u32 %v3180_v13, 16  ;;  %v666_v23 = vrot.slane %v2942_v19, 5 }
  0x55   : > { %v1049_v53 = vsel %vm2956_vm4, %v1044_v45, %v1048_v29  ;;  %v1077_v1 = vor.u32 %v1076_v8, %v1072_v59  ;;  %v2494_v40 = vrot.slane %v613_v26, 9  ;;  %v2756_v29 = vld [vmem:[%s2928_s4 + $0x30] sm:$0xff] }
  0x56   : > { %v1059_v54 = vsel %vm2956_vm4, %v1054_v47, %v1058_v12  ;;  %v1186_v60 = vunpack.c.l.b16 %v1049_v53  ;;  %v1067_v0 = vor.u32 %v1066_v58, %v1063_v55  ;;  %v1096_v38 = vrot.slane %v1094_v21, 5  ;;  %v2581_v55 = vld [vmem:[%s2928_s4 + $0x48] sm:$0xf]  ;;  %v3208_v58 = vld [vmem:[%s2928_s4 + $0x4c] sm:$0xf] }
  0x57   : > { %v1187_v61 = vunpack.c.l.b16 %v1059_v54  ;;  %v1078_v9 = vrot.slane %v1077_v1, 4  ;;  %v668_v41 = vrot.slane %v666_v23, 4  ;;  %v667_v19 = vsel %vm3064_vm7, %v2494_v40, %v666_v23  ;;  %v2750_v40 = vld [vmem:[%s2928_s4 + $0x3c] sm:$0xff] }
  0x58   : > { %v1068_v7 = vrot.slane %v1067_v0, 4  ;;  %v1104_v12 = vshll.u32 %v3195_v43, 16  ;;  %v1109_v0 = vshrl.u32 %v2581_v55, 16  ;;  %v1112_v1 = vshll.u32 %v2581_v55, 16 }
  0x59   : > { %v1200_v5 = vpack.c.b16 %v1187_v61, %v1186_v60  ;;  %v673_v60 = vrot.slane %v3003_v51, 5  ;;  %v614_v61 = vld [vmem:[%s2928_s4 + $0x3c] sm:$0xe] }
  0x5a   : > { %2500 = vmatmul.msk.bf16.gmra.mxu2 %vm415_vm3, %v711_v3  ;;  %v1080_v3 = vshll.u32 %v3172_v63, 16  ;;  %v1073_v14 = vsel %vm2956_vm4, %v1068_v7, %v1072_v59  ;;  %v1106_v54 = vrot.slane %v1104_v12, 5  ;;  %v2757_v7 = vld [vmem:[%s2928_s4 + $0x3c] sm:$0xff]  ;;  %v1114_v51 = vrot.slane %v1112_v1, 5 }
  0x5b   : > { %v1188_v24 = vunpack.c.l.b16 %v1073_v14  ;;  %v676_v14 = vrot.slane %v3009_v56, 5  ;;  %v3249_v1 = vld [vmem:[%s2928_s4 + $0x5c] sm:$0x1] }
  0x5c   : > { %v1082_v10 = vrot.slane %v1080_v3, 5  ;;  %v1118_v3 = vshll.u32 %v3208_v58, 16 }
  0x5e   : > { %2559 = vmatmul.msk.bf16.gmra.mxu3 %vm415_vm3, %v2754_v22  ;;  %v1083_v17 = vsel %vm2956_vm4, %v1078_v9, %v1082_v10  ;;  %v1098_v22 = vshrl.u32 %v3180_v13, 16  ;;  %v2495_v10 = vrot.slane %v614_v61, 9  ;;  %v1120_v26 = vrot.slane %v1118_v3, 5 }
  0x5f   : > { %v1189_v28 = vunpack.c.l.b16 %v1083_v17  ;;  %v1111_v17 = vrot.slane %v1109_v0, 4  ;;  %v683_v61 = vrot.slane %v2961_v46, 5  ;;  %v1152_v46 = vshll.u32 %v3249_v1, 16 }
  0x60   : > { %v1100_v39 = vrot.slane %v1098_v22, 4  ;;  %v674_v22 = vsel %vm3064_vm7, %v2495_v10, %v673_v60  ;;  %v2751_v10 = vld [vmem:[%s2928_s4 + $0x48] sm:$0xff] }
  0x61   : > { %v1201_v45 = vpack.c.b16 %v1189_v28, %v1188_v24  ;;  %v1115_v24 = vor.u32 %v1114_v51, %v1111_v17 }
  0x62   : > { %2592 = vmatmul.msk.bf16.gmra.mxu0 %vm415_vm3, %v1199_v2  ;;  %v1101_v47 = vor.u32 %v1100_v39, %v1096_v38 }
  0x64   : > { %2484 = vmatmul.msk.bf16.gmra.mxu1 %vm415_vm3, %v2747_v42  ;;  %v669_v42 = vrot.slane %v2945_v20, 5  ;;  %v702_v20 = vunpack.c.l.b16 %v667_v19  ;;  %v1102_v53 = vrot.slane %v1101_v47, 4 }
  0x66   : > { %v670_v48 = vsel %vm3064_vm7, %v668_v41, %v669_v42  ;;  %v3234_v42 = vld [vmem:[%s2928_s4 + $0x58] sm:$0xf] }
  0x67   : > { %v703_v50 = vunpack.c.l.b16 %v670_v48  ;;  %v1142_v47 = vshll.u32 %v3234_v42, 16 }
  0x69   : > { %v714_v59 = vpack.c.b16 %v703_v50, %v702_v20  ;;  %v1146_v20 = vshrl.u32 %v3234_v42, 16  ;;  %v615_v50 = vld [vmem:[%s2928_s4 + $0x48] sm:$0xe] }
  0x6a   : > { %2501 = vmatmul.msk.bf16.gmra.mxu2 %vm415_vm3, %v712_v57  ;;  %v2578_v57 = vld [vmem:[%s2928_s4 + $0x3c] sm:$0xf] }
  0x6b   : > { %v1085_v30 = vshrl.u32 %v2578_v57, 16  ;;  %v1088_v18 = vshll.u32 %v2578_v57, 16  ;;  %v675_v57 = vrot.slane %v673_v60, 4  ;;  %v1148_v0 = vrot.slane %v1146_v20, 4 }
  0x6d   : > { %v1087_v31 = vrot.slane %v1085_v30, 4  ;;  %v1090_v2 = vrot.slane %v1088_v18, 5  ;;  %v3222_v18 = vld [vmem:[%s2928_s4 + $0x50] sm:$0x1]  ;;  %v677_v23 = vsel %vm3064_vm7, %v675_v57, %v676_v14 }
  0x6e   : > { %2560 = vmatmul.msk.bf16.gmra.mxu3 %vm415_vm3, %v2755_v25  ;;  %v1107_v25 = vsel %vm2956_vm4, %v1102_v53, %v1106_v54  ;;  %v1128_v56 = vshll.u32 %v3222_v18, 16  ;;  %v2758_v54 = vld [vmem:[%s2928_s4 + $0x48] sm:$0xff] }
  0x6f   : > { %v1191_v9 = vunpack.c.l.b16 %v1107_v25  ;;  %v2496_v25 = vrot.slane %v615_v50, 9  ;;  %v3282_v50 = vld [vmem:[%s2928_s4 + $0x68] sm:$0x1] }
  0x70   : > { %v1130_v41 = vrot.slane %v1128_v56, 5 }
  0x72   : > { %2593 = vmatmul.msk.bf16.gmra.mxu0 %vm415_vm3, %v1200_v5  ;;  %v1122_v5 = vshrl.u32 %v3208_v58, 16 }
  0x74   : > { %2485 = vmatmul.msk.bf16.gmra.mxu1 %vm415_vm3, %v2748_v6  ;;  %v1124_v30 = vrot.slane %v1122_v5, 4 }
  0x76   : > { %v1125_v28 = vor.u32 %v1124_v30, %v1120_v26  ;;  %v2587_v30 = vld [vmem:[%s2928_s4 + $0x60] sm:$0xf] }
  0x78   : > { %v1126_v39 = vrot.slane %v1125_v28, 4  ;;  %v1160_v28 = vshll.u32 %v2587_v30, 16 }
  0x7a   : > { %2502 = vmatmul.msk.bf16.gmra.mxu2 %vm415_vm3, %v713_v32  ;;  %v1091_v32 = vor.u32 %v1090_v2, %v1087_v31  ;;  %v705_v31 = vunpack.c.l.b16 %v677_v23  ;;  %v2584_v2 = vld [vmem:[%s2928_s4 + $0x54] sm:$0xf]  ;;  %v1131_v48 = vsel %vm2956_vm4, %v1126_v39, %v1130_v41 }
  0x7b   : > { %v1136_v19 = vshll.u32 %v2584_v2, 16 }
  0x7c   : > { %v1092_v52 = vrot.slane %v1091_v32, 4 }
  0x7d   : > { %v1138_v53 = vrot.slane %v1136_v19, 5 }
  0x7e   : > { %2561 = vmatmul.msk.bf16.gmra.mxu3 %vm415_vm3, %v2756_v29  ;;  %v1097_v8 = vsel %vm2956_vm4, %v1092_v52, %v1096_v38  ;;  %v704_v29 = vunpack.c.l.b16 %v674_v22  ;;  %v1116_v38 = vrot.slane %v1115_v24, 4  ;;  %v1157_v24 = vshrl.u32 %v2587_v30, 16 }
  0x7f   : > { %v1190_v6 = vunpack.c.l.b16 %v1097_v8  ;;  %v1144_v8 = vrot.slane %v1142_v47, 5  ;;  %v1162_v47 = vrot.slane %v1160_v28, 5 }
  0x80   : > { %v715_v32 = vpack.c.b16 %v705_v31, %v704_v29  ;;  %v1121_v12 = vsel %vm2956_vm4, %v1116_v38, %v1120_v26  ;;  %v1154_v26 = vrot.slane %v1152_v46, 5  ;;  %v687_v31 = vrot.slane %v3020_v15, 5  ;;  %v616_v38 = vld [vmem:[%s2928_s4 + $0x54] sm:$0xe] }
  0x81   : > { %v1202_v21 = vpack.c.b16 %v1191_v9, %v1190_v6  ;;  %v1192_v55 = vunpack.c.l.b16 %v1121_v12  ;;  %v1149_v9 = vor.u32 %v1148_v0, %v1144_v8  ;;  %v690_v15 = vrot.slane %v3023_v16, 5  ;;  %v2752_v0 = vld [vmem:[%s2928_s4 + $0x54] sm:$0xff] }
  0x82   : > { %2594 = vmatmul.msk.bf16.gmra.mxu0 %vm415_vm3, %v1201_v45  ;;  %v1133_v45 = vshrl.u32 %v2584_v2, 16 }
  0x83   : > { %v1150_v51 = vrot.slane %v1149_v9, 4 }
  0x84   : > { %2486 = vmatmul.msk.bf16.gmra.mxu1 %vm415_vm3, %v2749_v49  ;;  %v680_v49 = vrot.slane %v2952_v35, 5  ;;  %v1135_v52 = vrot.slane %v1133_v45, 4  ;;  %v2759_v45 = vld [vmem:[%s2928_s4 + $0x54] sm:$0xff] }
  0x86   : > { %v682_v60 = vrot.slane %v680_v49, 4  ;;  %v1139_v35 = vor.u32 %v1138_v53, %v1135_v52  ;;  %v681_v6 = vsel %vm3064_vm7, %v2496_v25, %v680_v49  ;;  %v689_v49 = vrot.slane %v687_v31, 4 }
  0x87   : > { %v706_v14 = vunpack.c.l.b16 %v681_v6 }
  0x88   : > { %v1140_v57 = vrot.slane %v1139_v35, 4  ;;  %v691_v25 = vsel %vm3064_vm7, %v689_v49, %v690_v15  ;;  %v2760_v49 = vld [vmem:[%s2928_s4 + $0x60] sm:$0xff] }
  0x89   : > { %v709_v46 = vunpack.c.l.b16 %v691_v25 }
  0x8a   : > { %2503 = vmatmul.msk.bf16.gmra.mxu2 %vm415_vm3, %v714_v59  ;;  %v1193_v59 = vunpack.c.l.b16 %v1131_v48  ;;  %v1145_v22 = vsel %vm2956_vm4, %v1140_v57, %v1144_v8  ;;  %v2497_v48 = vrot.slane %v616_v38, 9 }
  0x8b   : > { %v1194_v39 = vunpack.c.l.b16 %v1145_v22  ;;  %v1335_v22 = vrot.slane %v3069_v37, 5 }
  0x8c   : > { %v1203_v3 = vpack.c.b16 %v1193_v59, %v1192_v55  ;;  %v2683_v59 = vld [vmem:[%s2928_s4 + $0x18] sm:$0xf]  ;;  %v688_v8 = vsel %vm3064_vm7, %v2497_v48, %v687_v31 }
  0x8d   : > { %v1683_v6 = vshrl.u32 %v2683_v59, 16  ;;  %v708_v9 = vunpack.c.l.b16 %v688_v8 }
  0x8e   : > { %2562 = vmatmul.msk.bf16.gmra.mxu3 %vm415_vm3, %v2757_v7  ;;  %v684_v7 = vsel %vm3064_vm7, %v682_v60, %v683_v61  ;;  %v1176_v60 = vshll.u32 %v3282_v50, 16  ;;  %v3296_v61 = vld [vmem:[%s2928_s4 + $0x1c] sm:$0xf] }
  0x8f   : > { %v707_v17 = vunpack.c.l.b16 %v684_v7  ;;  %v1686_v7 = vshll.u32 %v2683_v59, 16  ;;  %v1692_v57 = vshll.u32 %v3296_v61, 16  ;;  %v1685_v28 = vrot.slane %v1683_v6, 4 }
  0x90   : > { %v1178_v30 = vrot.slane %v1176_v60, 5  ;;  %v2026_v6 = vrot.slane %v3296_v61, 5 }
  0x91   : > { %v716_v23 = vpack.c.b16 %v707_v17, %v706_v14  ;;  %v1696_v14 = vshrl.u32 %v3296_v61, 16  ;;  %v1694_v31 = vrot.slane %v1692_v57, 5 }
  0x92   : > { %2595 = vmatmul.msk.bf16.gmra.mxu0 %vm415_vm3, %v1202_v21  ;;  %v3263_v21 = vld [vmem:[%s2928_s4 + $0x64] sm:$0xf] }
  0x93   : > { %v1166_v56 = vshll.u32 %v3263_v21, 16  ;;  %v1170_v2 = vshrl.u32 %v3263_v21, 16 }
  0x94   : > { %2487 = vmatmul.msk.bf16.gmra.mxu1 %vm415_vm3, %v2750_v40  ;;  %v1155_v40 = vsel %vm2956_vm4, %v1150_v51, %v1154_v26 }
  0x95   : > { %v1195_v19 = vunpack.c.l.b16 %v1155_v40  ;;  %v1168_v12 = vrot.slane %v1166_v56, 5  ;;  %v1172_v20 = vrot.slane %v1170_v2, 4  ;;  %v1688_v56 = vrot.slane %v1686_v7, 5 }
  0x96   : > { %v717_v40 = vpack.c.b16 %v709_v46, %v708_v9  ;;  %v1698_v2 = vrot.slane %v1696_v14, 4  ;;  %v2686_v46 = vld [vmem:[%s2928_s4 + $0x24] sm:$0xf] }
  0x97   : > { %v1173_v16 = vor.u32 %v1172_v20, %v1168_v12  ;;  %v1689_v48 = vor.u32 %v1688_v56, %v1685_v28  ;;  %v2600_v28 = vld [vmem:[%s2928_s4 + $0x18] sm:$0xe]  ;;  %v1707_v56 = vshrl.u32 %v2686_v46, 16 }
  0x98   : > { %v1699_v20 = vor.u32 %v1698_v2, %v1694_v31 }
  0x99   : > { %v1174_v26 = vrot.slane %v1173_v16, 4  ;;  %v1690_v25 = vrot.slane %v1689_v48, 4 }
  0x9a   : > { %2504 = vmatmul.msk.bf16.gmra.mxu2 %vm415_vm3, %v715_v32  ;;  %v1159_v32 = vrot.slane %v1157_v24, 4  ;;  %v1700_v60 = vrot.slane %v1699_v20, 4 }
  0x9b   : > { %v1179_v37 = vsel %vm2956_vm4, %v1174_v26, %v1178_v30  ;;  %v1339_v30 = vrot.slane %v3100_v4, 5 }
  0x9c   : > { %v1163_v55 = vor.u32 %v1162_v47, %v1159_v32 }
  0x9e   : > { %2563 = vmatmul.msk.bf16.gmra.mxu3 %vm415_vm3, %v2758_v54  ;;  %v1204_v54 = vpack.c.b16 %v1195_v19, %v1194_v39  ;;  %v1164_v51 = vrot.slane %v1163_v55, 4 }
  0x9f   : > { %v3252_v5 = vpop.f32.mrf.mxu1 }
  0xa0   : > { %v1169_v39 = vsel %vm2956_vm4, %v1164_v51, %v1168_v12  ;;  %v1197_v12 = vunpack.c.l.b16 %v1179_v37  ;;  %v1695_v51 = vsel %vm2956_vm4, %v1690_v25, %v1694_v31  ;;  %v1341_v37 = vrot.slane %v1339_v30, 4 }
  0xa1   : > { %v1196_v15 = vunpack.c.l.b16 %v1169_v39  ;;  %v2608_v39 = vrot.slane %v2600_v28, 9 }
  0xa2   : > { %2596 = vmatmul.msk.bf16.gmra.mxu0 %vm415_vm3, %v1203_v3  ;;  %v1332_v3 = vrot.slane %v3059_v27, 5 }
  0xa3   : > { %v1205_v16 = vpack.c.b16 %v1197_v12, %v1196_v15  ;;  %v1709_v12 = vrot.slane %v1707_v56, 4 }
  0xa4   : > { %2488 = vmatmul.msk.bf16.gmra.mxu1 %vm415_vm3, %v2751_v10  ;;  %v2599_v10 = vld [vmem:[%s2928_s4 + $0xc] sm:$0xe]  ;;  %v1334_v24 = vrot.slane %v1332_v3, 4 }
  0xa6   : > { %v1336_v47 = vsel %vm3064_vm7, %v1334_v24, %v1335_v22 }
  0xa7   : > { %v3271_v29 = vpop.f32.mrf.mxu1  ;;  %v1389_v59 = vunpack.c.l.b16 %v1336_v47  ;;  %v1876_v47 = vunpack.c.l.b16 %v1695_v51 }
  0xa9   : > { %v3276_v41 = vpop.f32.mrf.mxu2 }
  0xaa   : > { %2505 = vmatmul.msk.bf16.gmra.mxu2 %vm415_vm3, %v716_v23  ;;  %v2607_v23 = vrot.slane %v2599_v10, 9  ;;  %v3336_v10 = vld [vmem:[%s2928_s4 + $0x28] sm:$0xf] }
  0xab   : > { %v1716_v2 = vshll.u32 %v3336_v10, 16  ;;  %v1720_v31 = vshrl.u32 %v3336_v10, 16 }
  0xac   : > { %v1333_v32 = vsel %vm3064_vm7, %v2607_v23, %v1332_v3  ;;  %v2716_v3 = vld [vmem:[%s2928_s4 + $0x18] sm:$0xe]  ;;  %v2028_v23 = vrot.slane %v2026_v6, 4 }
  0xad   : > { %v3284_v52 = vpop.f32.mrf.mxu0  ;;  %v3286_v53 = vpop.f32.mrf.mxu3  ;;  %v1388_v55 = vunpack.c.l.b16 %v1333_v32  ;;  %v2724_v26 = vrot.slane %v2716_v3, 9  ;;  %v2761_v32 = vld [vmem:[%s2928_s4 + $0x18] sm:$0xff] }
  0xae   : > { %2564 = vmatmul.msk.bf16.gmra.mxu3 %vm415_vm3, %v2759_v45  ;;  %v2685_v45 = vld [vmem:[%s2928_s4 + $0x20] sm:$0x1] }
  0xaf   : > { %v1404_v9 = vpack.c.b16 %v1389_v59, %v1388_v55  ;;  %v2029_v24 = vrot.slane %v2685_v45, 5  ;;  %v1722_v55 = vrot.slane %v1720_v31, 4  ;;  %v3362_v59 = vld [vmem:[%s2928_s4 + $0x2c] sm:$0x1] }
  0xb0   : > { %v1726_v51 = vshll.u32 %v3362_v59, 16 }
  0xb1   : > { %v3299_v35 = vpop.f32.mrf.mxu1  ;;  %v3306_v17 = vpop.f32.mrf.mxu2 }
  0xb2   : > { %2597 = vmatmul.msk.bf16.gmra.mxu0 %vm415_vm3, %v1204_v54  ;;  %v1702_v54 = vshll.u32 %v2685_v45, 16  ;;  %v2027_v45 = vsel %vm3064_vm7, %v2724_v26, %v2026_v6 }
  0xb3   : > { %v2082_v3 = vunpack.c.l.b16 %v2027_v45 }
  0xb4   : > { %2489 = vmatmul.msk.bf16.gmra.mxu1 %vm415_vm3, %v2752_v0  ;;  %v1704_v0 = vrot.slane %v1702_v54, 5  ;;  %v1718_v54 = vrot.slane %v1716_v2, 5 }
  0xb5   : > { %v3310_v27 = vpop.f32.mrf.mxu0  ;;  %v3312_v38 = vpop.f32.mrf.mxu3 }
  0xb6   : > { %v1705_v22 = vsel %vm2956_vm4, %v1700_v60, %v1704_v0 }
  0xb7   : > { %v1877_v48 = vunpack.c.l.b16 %v1705_v22 }
  0xb9   : > { %v3319_v19 = vpop.f32.mrf.mxu1  ;;  %v1892_v0 = vpack.c.b16 %v1877_v48, %v1876_v47 }
  0xba   : > { %2506 = vmatmul.msk.bf16.gmra.mxu2 %vm415_vm3, %v717_v40  ;;  %v1710_v40 = vshll.u32 %v2686_v46, 16 }
  0xbc   : > { %v1712_v20 = vrot.slane %v1710_v40, 5  ;;  %v3377_v40 = vld [vmem:[%s2928_s4 + $0x34] sm:$0xf] }
  0xbd   : > { %v3327_v8 = vpop.f32.mrf.mxu2 }
  0xbe   : > { %2565 = vmatmul.msk.bf16.gmra.mxu3 %vm415_vm3, %v2760_v49  ;;  %v2030_v49 = vsel %vm3064_vm7, %v2028_v23, %v2029_v24  ;;  %v1713_v46 = vor.u32 %v1712_v20, %v1709_v12  ;;  %v2717_v24 = vld [vmem:[%s2928_s4 + $0x24] sm:$0xe]  ;;  %v1346_v12 = vrot.slane %v3134_v62, 5  ;;  %v1740_v20 = vshll.u32 %v3377_v40, 16 }
  0xbf   : > { %v3332_v7 = vpop.f32.mrf.mxu0  ;;  %v2083_v6 = vunpack.c.l.b16 %v2030_v49 }
  0xc0   : > { %v1714_v31 = vrot.slane %v1713_v46, 4 }
  0xc1   : > { %v3338_v57 = vpop.f32.mrf.mxu3  ;;  %v569_v14 = vpop.f32.mrf.mxu1  ;;  %v2098_v28 = vpack.c.b16 %v2083_v6, %v2082_v3  ;;  %v2036_v3 = vrot.slane %v3362_v59, 5 }
  0xc2   : > { %2598 = vmatmul.msk.bf16.gmra.mxu0 %vm415_vm3, %v1205_v16  ;;  %v570_v61 = vadd.f32 %v569_v14, %v3284_v52  ;;  %v1342_v52 = vrot.slane %v3119_v11, 5  ;;  %v1340_v16 = vsel %vm3064_vm7, %v2608_v39, %v1339_v30  ;;  %v1723_v14 = vor.u32 %v1722_v55, %v1718_v54  ;;  %v2689_v30 = vld [vmem:[%s2928_s4 + $0x30] sm:$0xf] }
  0xc3   : > { %v1390_v26 = vunpack.c.l.b16 %v1340_v16  ;;  %v1731_v47 = vshrl.u32 %v2689_v30, 16  ;;  %v1734_v48 = vshll.u32 %v2689_v30, 16  ;;  %v1349_v55 = vrot.slane %v3152_v34, 5 }
  0xc4   : > { %2616 = vmatmul.msk.bf16.vlgmr.msra.gmra.mxu1 %vm415_vm3, %v1404_v9  ;;  %v1343_v60 = vsel %vm3064_vm7, %v1341_v37, %v1342_v52  ;;  %v1724_v39 = vrot.slane %v1723_v14, 4  ;;  %v2033_v37 = vrot.slane %v3336_v10, 5  ;;  %v2601_v10 = vld [vmem:[%s2928_s4 + $0x24] sm:$0xe] }
  0xc5   : > { %v3351_v4 = vpop.f32.mrf.mxu2  ;;  %v1391_v22 = vunpack.c.l.b16 %v1343_v60  ;;  %v1719_v60 = vsel %vm2956_vm4, %v1714_v31, %v1718_v54  ;;  %v1733_v6 = vrot.slane %v1731_v47, 4  ;;  %v1736_v46 = vrot.slane %v1734_v48, 5 }
  0xc6   : > { %v2035_v62 = vrot.slane %v2033_v37, 4  ;;  %v1742_v54 = vrot.slane %v1740_v20, 5  ;;  %v1878_v30 = vunpack.c.l.b16 %v1719_v60 }
  0xc7   : > { %v3359_v15 = vpop.f32.mrf.mxu0  ;;  %v1405_v52 = vpack.c.b16 %v1391_v22, %v1390_v26  ;;  %v1348_v26 = vrot.slane %v1346_v12, 4 }
  0xc8   : > { %v2037_v31 = vsel %vm3064_vm7, %v2035_v62, %v2036_v3  ;;  %v2718_v3 = vld [vmem:[%s2928_s4 + $0x30] sm:$0xe] }
  0xc9   : > { %v3364_v25 = vpop.f32.mrf.mxu3  ;;  %v571_v11 = vpop.f32.mrf.mxu1 }
  0xca   : > { %2675 = vmatmul.msk.bf16.vlgmr.msra.gmra.mxu2 %vm415_vm3, %v2761_v32  ;;  %v572_v9 = vadd.f32 %v571_v11, %v3310_v27  ;;  %v1728_v27 = vrot.slane %v1726_v51, 5  ;;  %v2725_v32 = vrot.slane %v2717_v24, 9  ;;  %v2609_v51 = vrot.slane %v2601_v10, 9  ;;  %v2762_v24 = vld [vmem:[%s2928_s4 + $0x24] sm:$0xff] }
  0xcc   : > { %v2034_v34 = vsel %vm3064_vm7, %v2725_v32, %v2033_v37  ;;  %v1350_v32 = vsel %vm3064_vm7, %v1348_v26, %v1349_v55 }
  0xcd   : > { %v754_v23 = vpop.f32.mrf.mxu2 }
  0xce   : > { %2708 = vmatmul.msk.bf16.vlgmr.msra.gmra.mxu3 %vm415_vm3, %v1892_v0  ;;  %v794_v56 = vadd.f32 %v754_v23, %v570_v61  ;;  %v1744_v61 = vshrl.u32 %v3377_v40, 16  ;;  %v1729_v0 = vsel %vm2956_vm4, %v1724_v39, %v1728_v27  ;;  %v2084_v39 = vunpack.c.l.b16 %v2034_v34 }
  0xcf   : > { %v1242_v2 = vpop.f32.mrf.mxu0  ;;  %v1737_v27 = vor.u32 %v1736_v46, %v1733_v6  ;;  %v2040_v46 = vrot.slane %v3377_v40, 5 }
  0xd0   : > { %v1746_v22 = vrot.slane %v1744_v61, 4 }
  0xd1   : > { %v908_v45 = vpop.f32.mrf.mxu3  ;;  %v574_v49 = vpop.f32.mrf.mxu1 }
  0xd2   : > { %2733 = vmatmul.msk.bf16.vlgmr.msra.gmra.mxu0 %vm415_vm3, %v2098_v28  ;;  %v948_v11 = vadd.f32 %v908_v45, %v794_v56  ;;  %v575_v16 = vadd.f32 %v574_v49, %v3332_v7  ;;  %v1879_v28 = vunpack.c.l.b16 %v1729_v0  ;;  %v3399_v56 = vld [vmem:[%s2928_s4 + $0x38] sm:$0x1]  ;;  %v2085_v49 = vunpack.c.l.b16 %v2037_v31 }
  0xd3   : > { %v1750_v47 = vshll.u32 %v3399_v56, 16 }
  0xd4   : > { %2617 = vmatmul.msk.bf16.gmra.mxu1 %vm415_vm3, %v1405_v52  ;;  %v3395_v7 = vadd.f32 %v1242_v2, %v948_v11  ;;  %v1347_v52 = vsel %vm3064_vm7, %v2609_v51, %v1346_v12  ;;  %v1893_v45 = vpack.c.b16 %v1879_v28, %v1878_v30  ;;  %v1393_v11 = vunpack.c.l.b16 %v1350_v32  ;;  %v3417_v51 = vld [vmem:[%s2928_s4 + $0x40] sm:$0xf] }
  0xd5   : > { %v756_v14 = vpop.f32.mrf.mxu2  ;;  %v1392_v61 = vunpack.c.l.b16 %v1347_v52  ;;  %v1738_v12 = vrot.slane %v1737_v27, 4  ;;  %v1752_v0 = vrot.slane %v1750_v47, 5  ;;  %v2099_v55 = vpack.c.b16 %v2085_v49, %v2084_v39  ;;  %v2763_v49 = vld [vmem:[%s2928_s4 + $0x30] sm:$0xff] }
  0xd6   : > { %v795_v23 = vadd.f32 %v756_v14, %v572_v9  ;;  %v1747_v9 = vor.u32 %v1746_v22, %v1742_v54  ;;  %v2692_v14 = vld [vmem:[%s2928_s4 + $0x3c] sm:$0xf]  ;;  %v1353_v30 = vrot.slane %v3160_v44, 5  ;;  %v2042_v27 = vrot.slane %v2040_v46, 4 }
  0xd7   : > { %v1244_v59 = vpop.f32.mrf.mxu0  ;;  %v1755_v31 = vshrl.u32 %v2692_v14, 16  ;;  %v1758_v39 = vshll.u32 %v2692_v14, 16  ;;  %v1356_v52 = vrot.slane %v3172_v63, 5 }
  0xd8   : > { %v1748_v60 = vrot.slane %v1747_v9, 4 }
  0xd9   : > { %v910_v37 = vpop.f32.mrf.mxu3  ;;  %v576_v2 = vpop.f32.mrf.mxu1 }
  0xda   : > { %v949_v48 = vadd.f32 %v910_v37, %v795_v23  ;;  %2676 = vmatmul.msk.bf16.gmra.mxu2 %vm415_vm3, %v2762_v24  ;;  %v577_v20 = vadd.f32 %v576_v2, %v3359_v15  ;;  %v1406_v15 = vpack.c.b16 %v1393_v11, %v1392_v61  ;;  %v1743_v23 = vsel %vm2956_vm4, %v1738_v12, %v1742_v54 }
  0xdb   : > { %v1753_v24 = vsel %vm2956_vm4, %v1748_v60, %v1752_v0  ;;  %v2043_v37 = vrot.slane %v3399_v56, 5  ;;  %v1764_v54 = vshll.u32 %v3417_v51, 16  ;;  %v1768_v2 = vshrl.u32 %v3417_v51, 16  ;;  %v2694_v0 = vld [vmem:[%s2928_s4 + $0x44] sm:$0x1] }
  0xdc   : > { %v3412_v34 = vadd.f32 %v1244_v59, %v949_v48  ;;  %v2602_v59 = vld [vmem:[%s2928_s4 + $0x30] sm:$0xe]  ;;  %v1881_v9 = vunpack.c.l.b16 %v1753_v24  ;;  %v1355_v48 = vrot.slane %v1353_v30, 4  ;;  %v1757_v61 = vrot.slane %v1755_v31, 4  ;;  %v2719_v31 = vld [vmem:[%s2928_s4 + $0x3c] sm:$0xe] }
  0xdd   : > { %v759_v10 = vpop.f32.mrf.mxu2  ;;  %v2610_v47 = vrot.slane %v2602_v59, 9  ;;  %v1760_v11 = vrot.slane %v1758_v39, 5  ;;  %v2044_v63 = vsel %vm3064_vm7, %v2042_v27, %v2043_v37  ;;  %v1766_v12 = vrot.slane %v1764_v54, 5 }
  0xde   : > { %2709 = vmatmul.msk.bf16.gmra.mxu3 %vm415_vm3, %v1893_v45  ;;  %v796_v62 = vadd.f32 %v759_v10, %v575_v16  ;;  %v2726_v16 = vrot.slane %v2718_v3, 9  ;;  %v1770_v60 = vrot.slane %v1768_v2, 4  ;;  %v1774_v24 = vshll.u32 %v2694_v0, 16  ;;  %v3451_v2 = vld [vmem:[%s2928_s4 + $0x4c] sm:$0xf] }
  0xdf   : > { %v1247_v6 = vpop.f32.mrf.mxu0 }
  0xe0   : > { %v2041_v56 = vsel %vm3064_vm7, %v2726_v16, %v2040_v46  ;;  %v1357_v46 = vsel %vm3064_vm7, %v1355_v48, %v1356_v52  ;;  %v2047_v16 = vrot.slane %v3417_v51, 5  ;;  %v2050_v48 = vrot.slane %v2694_v0, 5 }
  0xe1   : > { %v913_v26 = vpop.f32.mrf.mxu3  ;;  %v579_v22 = vpop.f32.mrf.mxu1  ;;  %v2086_v3 = vunpack.c.l.b16 %v2041_v56  ;;  %v1395_v59 = vunpack.c.l.b16 %v1357_v46 }
  0xe2   : > { %2734 = vmatmul.msk.bf16.gmra.mxu0 %vm415_vm3, %v2099_v55  ;;  %v950_v28 = vadd.f32 %v913_v26, %v796_v62  ;;  %v580_v40 = vadd.f32 %v579_v22, %v3252_v5  ;;  %v1880_v5 = vunpack.c.l.b16 %v1743_v23  ;;  %v1761_v22 = vor.u32 %v1760_v11, %v1757_v61 }
  0xe3   : > { %v1771_v23 = vor.u32 %v1770_v60, %v1766_v12  ;;  %v2049_v51 = vrot.slane %v2047_v16, 4  ;;  %v1360_v11 = vrot.slane %v3180_v13, 5 }
  0xe4   : > { %2618 = vmatmul.msk.bf16.gmra.mxu1 %vm415_vm3, %v1406_v15  ;;  %v3432_v44 = vadd.f32 %v1247_v6, %v950_v28  ;;  %v1894_v62 = vpack.c.b16 %v1881_v9, %v1880_v5  ;;  %v2087_v15 = vunpack.c.l.b16 %v2044_v63  ;;  %v1762_v54 = vrot.slane %v1761_v22, 4 }
  0xe5   : > { %v761_v32 = vpop.f32.mrf.mxu2  ;;  %v1776_v5 = vrot.slane %v1774_v24, 5  ;;  %v2727_v9 = vrot.slane %v2719_v31, 9  ;;  %v1792_v63 = vshrl.u32 %v3451_v2, 16  ;;  %v2764_v24 = vld [vmem:[%s2928_s4 + $0x3c] sm:$0xff]  ;;  %v3477_v31 = vld [vmem:[%s2928_s4 + $0x50] sm:$0x1] }
  0xe6   : > { %v797_v45 = vadd.f32 %v761_v32, %v577_v20  ;;  %v1354_v20 = vsel %vm3064_vm7, %v2610_v47, %v1353_v30  ;;  %v2695_v30 = vld [vmem:[%s2928_s4 + $0x48] sm:$0xf]  ;;  %v2100_v27 = vpack.c.b16 %v2087_v15, %v2086_v3  ;;  %v1772_v32 = vrot.slane %v1771_v23, 4 }
  0xe7   : > { %v1249_v10 = vpop.f32.mrf.mxu0  ;;  %v1394_v28 = vunpack.c.l.b16 %v1354_v20  ;;  %v1767_v0 = vsel %vm2956_vm4, %v1762_v54, %v1766_v12  ;;  %v2048_v13 = vsel %vm3064_vm7, %v2727_v9, %v2047_v16  ;;  %v1362_v15 = vrot.slane %v1360_v11, 4 }
  0xe8   : > { %v1777_v3 = vsel %vm2956_vm4, %v1772_v32, %v1776_v5  ;;  %v1794_v22 = vrot.slane %v1792_v63, 4 }
  0xe9   : > { %v915_v55 = vpop.f32.mrf.mxu3  ;;  %v581_v6 = vpop.f32.mrf.mxu1  ;;  %v1407_v47 = vpack.c.b16 %v1395_v59, %v1394_v28  ;;  %v1882_v28 = vunpack.c.l.b16 %v1767_v0  ;;  %v1883_v16 = vunpack.c.l.b16 %v1777_v3  ;;  %v2054_v0 = vrot.slane %v3451_v2, 5 }
  0xea   : > { %v951_v14 = vadd.f32 %v915_v55, %v797_v45  ;;  %2677 = vmatmul.msk.bf16.gmra.mxu2 %vm415_vm3, %v2763_v49  ;;  %v582_v26 = vadd.f32 %v581_v6, %v3271_v29  ;;  %v1779_v45 = vshrl.u32 %v2695_v30, 16  ;;  %v1782_v49 = vshll.u32 %v2695_v30, 16  ;;  %v2603_v55 = vld [vmem:[%s2928_s4 + $0x3c] sm:$0xe] }
  0xeb   : > { %v2051_v6 = vsel %vm3064_vm7, %v2049_v51, %v2050_v48  ;;  %v1895_v9 = vpack.c.b16 %v1883_v16, %v1882_v28  ;;  %v2056_v28 = vrot.slane %v2054_v0, 4  ;;  %v2057_v16 = vrot.slane %v3477_v31, 5 }
  0xec   : > { %v3453_v52 = vadd.f32 %v1249_v10, %v951_v14  ;;  %v1784_v20 = vrot.slane %v1782_v49, 5  ;;  %v2611_v14 = vrot.slane %v2603_v55, 9  ;;  %v2089_v30 = vunpack.c.l.b16 %v2051_v6  ;;  %v2698_v49 = vld [vmem:[%s2928_s4 + $0x54] sm:$0xf] }
  0xed   : > { %v764_v39 = vpop.f32.mrf.mxu2  ;;  %v1806_v6 = vshll.u32 %v2698_v49, 16 }
  0xee   : > { %2710 = vmatmul.msk.bf16.gmra.mxu3 %vm415_vm3, %v1894_v62  ;;  %v798_v37 = vadd.f32 %v764_v39, %v580_v40  ;;  %v1788_v40 = vshll.u32 %v3451_v2, 16  ;;  %v1363_v62 = vrot.slane %v3195_v43, 5  ;;  %v2088_v39 = vunpack.c.l.b16 %v2048_v13 }
  0xef   : > { %v1252_v29 = vpop.f32.mrf.mxu0  ;;  %v1361_v54 = vsel %vm3064_vm7, %v2611_v14, %v1360_v11  ;;  %v1803_v13 = vshrl.u32 %v2698_v49, 16  ;;  %v1367_v2 = vrot.slane %v3208_v58, 5  ;;  %v1370_v58 = vrot.slane %v3222_v18, 5 }
  0xf0   : > { %v3473_v12 = vrot.slane %v1788_v40, 5  ;;  %v1396_v48 = vunpack.c.l.b16 %v1361_v54  ;;  %v2058_v49 = vsel %vm3064_vm7, %v2056_v28, %v2057_v16  ;;  %v2701_v28 = vld [vmem:[%s2928_s4 + $0x60] sm:$0xf] }
  0xf1   : > { %v918_v56 = vpop.f32.mrf.mxu3  ;;  %v584_v61 = vpop.f32.mrf.mxu1 }
  0xf2   : > { %2735 = vmatmul.msk.bf16.gmra.mxu0 %vm415_vm3, %v2100_v27  ;;  %v952_v10 = vadd.f32 %v918_v56, %v798_v37  ;;  %v585_v60 = vadd.f32 %v584_v61, %v3299_v35  ;;  %v1781_v35 = vrot.slane %v1779_v45, 4  ;;  %v3489_v56 = vld [vmem:[%s2928_s4 + $0x58] sm:$0xf]  ;;  %v2101_v61 = vpack.c.b16 %v2089_v30, %v2088_v39 }
  0xf3   : > { %v1805_v39 = vrot.slane %v1803_v13, 4  ;;  %v1808_v30 = vrot.slane %v1806_v6, 5 }
  0xf4   : > { %2619 = vmatmul.msk.bf16.gmra.mxu1 %vm415_vm3, %v1407_v47  ;;  %v3471_v46 = vadd.f32 %v1252_v29, %v952_v10  ;;  %v1364_v29 = vsel %vm3064_vm7, %v1362_v15, %v1363_v62  ;;  %v1785_v32 = vor.u32 %v1784_v20, %v1781_v35  ;;  %v1798_v47 = vshll.u32 %v3477_v31, 16  ;;  %v2720_v62 = vld [vmem:[%s2928_s4 + $0x48] sm:$0xe] }
  0xf5   : > { %v766_v43 = vpop.f32.mrf.mxu2  ;;  %v1397_v45 = vunpack.c.l.b16 %v1364_v29  ;;  %v1812_v35 = vshll.u32 %v3489_v56, 16  ;;  %v1816_v20 = vshrl.u32 %v3489_v56, 16 }
  0xf6   : > { %v799_v23 = vadd.f32 %v766_v43, %v582_v26  ;;  %v1795_v26 = vor.u32 %v1794_v22, %v3473_v12  ;;  %v1786_v40 = vrot.slane %v1785_v32, 4  ;;  %v1800_v55 = vrot.slane %v1798_v47, 5 }
  0xf7   : > { %v1254_v59 = vpop.f32.mrf.mxu0  ;;  %v1408_v43 = vpack.c.b16 %v1397_v45, %v1396_v48  ;;  %v2728_v22 = vrot.slane %v2720_v62, 9  ;;  %v1369_v32 = vrot.slane %v1367_v2, 4 }
  0xf8   : > { %v1796_v63 = vrot.slane %v1795_v26, 4  ;;  %v3512_v26 = vld [vmem:[%s2928_s4 + $0x5c] sm:$0x1] }
  0xf9   : > { %v920_v27 = vpop.f32.mrf.mxu3  ;;  %v586_v37 = vpop.f32.mrf.mxu1  ;;  %v2055_v45 = vsel %vm3064_vm7, %v2728_v22, %v2054_v0  ;;  %v1822_v18 = vshll.u32 %v3512_v26, 16  ;;  %v2721_v22 = vld [vmem:[%s2928_s4 + $0x54] sm:$0xe] }
  0xfa   : > { %v953_v5 = vadd.f32 %v920_v27, %v799_v23  ;;  %2678 = vmatmul.msk.bf16.gmra.mxu2 %vm415_vm3, %v2764_v24  ;;  %v587_v51 = vadd.f32 %v586_v37, %v3319_v19  ;;  %v1801_v24 = vsel %vm2956_vm4, %v1796_v63, %v1800_v55  ;;  %v1814_v27 = vrot.slane %v1812_v35, 5 }
  0xfb   : > { %v1818_v37 = vrot.slane %v1816_v20, 4  ;;  %v1885_v31 = vunpack.c.l.b16 %v1801_v24  ;;  %v2090_v0 = vunpack.c.l.b16 %v2055_v45  ;;  %v1377_v45 = vrot.slane %v3249_v1, 5 }
  0xfc   : > { %v3494_v3 = vadd.f32 %v1254_v59, %v953_v5  ;;  %v2604_v59 = vld [vmem:[%s2928_s4 + $0x48] sm:$0xe] }
  0xfd   : > { %v769_v11 = vpop.f32.mrf.mxu2  ;;  %v2612_v29 = vrot.slane %v2604_v59, 9 }
  0xfe   : > { %2711 = vmatmul.msk.bf16.gmra.mxu3 %vm415_vm3, %v1895_v9  ;;  %v800_v10 = vadd.f32 %v769_v11, %v585_v60  ;;  %v1791_v60 = vsel %vm2956_vm4, %v1786_v40, %v3473_v12  ;;  %v2765_v9 = vld [vmem:[%s2928_s4 + $0x48] sm:$0xff]  ;;  %v1819_v11 = vor.u32 %v1818_v37, %v1814_v27  ;;  %v2729_v37 = vrot.slane %v2721_v22, 9 }
  0xff   : > { %v1257_v19 = vpop.f32.mrf.mxu0  ;;  %v1884_v47 = vunpack.c.l.b16 %v1791_v60 }
 0x100   : > { %v1820_v6 = vrot.slane %v1819_v11, 4 }
 0x101   : > { %v923_v14 = vpop.f32.mrf.mxu3  ;;  %v589_v15 = vpop.f32.mrf.mxu1  ;;  %v1896_v62 = vpack.c.b16 %v1885_v31, %v1884_v47  ;;  %v2064_v47 = vrot.slane %v3512_v26, 5  ;;  %v2605_v31 = vld [vmem:[%s2928_s4 + $0x54] sm:$0xe] }
 0x102   : > { %2736 = vmatmul.msk.bf16.gmra.mxu0 %vm415_vm3, %v2101_v61  ;;  %v954_v23 = vadd.f32 %v923_v14, %v800_v10  ;;  %v1809_v61 = vor.u32 %v1808_v30, %v1805_v39  ;;  %v1371_v10 = vsel %vm3064_vm7, %v1369_v32, %v1370_v58  ;;  %v590_v35 = vadd.f32 %v589_v15, %v3276_v41  ;;  %v3533_v39 = vld [vmem:[%s2928_s4 + $0x64] sm:$0xf] }
 0x103   : > { %v1824_v14 = vrot.slane %v1822_v18, 5  ;;  %v1827_v32 = vshrl.u32 %v2701_v28, 16 }
 0x104   : > { %2620 = vmatmul.msk.bf16.gmra.mxu1 %vm415_vm3, %v1408_v43  ;;  %v3508_v12 = vadd.f32 %v1257_v19, %v954_v23  ;;  %v2091_v19 = vunpack.c.l.b16 %v2058_v49  ;;  %v1810_v13 = vrot.slane %v1809_v61, 4  ;;  %v1399_v43 = vunpack.c.l.b16 %v1371_v10 }
 0x105   : > { %v771_v54 = vpop.f32.mrf.mxu2  ;;  %v1825_v15 = vsel %vm2956_vm4, %v1820_v6, %v1824_v14  ;;  %v1829_v10 = vrot.slane %v1827_v32, 4 }
 0x106   : > { %v801_v5 = vadd.f32 %v771_v54, %v587_v51  ;;  %v1368_v51 = vsel %vm3064_vm7, %v2612_v29, %v1367_v2  ;;  %v2061_v2 = vrot.slane %v3489_v56, 5  ;;  %v2102_v23 = vpack.c.b16 %v2091_v19, %v2090_v0  ;;  %v2766_v0 = vld [vmem:[%s2928_s4 + $0x54] sm:$0xff] }
 0x107   : > { %v1259_v48 = vpop.f32.mrf.mxu0  ;;  %v1398_v20 = vunpack.c.l.b16 %v1368_v51  ;;  %v1815_v41 = vsel %vm2956_vm4, %v1810_v13, %v1814_v27  ;;  %v1374_v29 = vrot.slane %v3234_v42, 5  ;;  %v1836_v27 = vshll.u32 %v3533_v39, 16  ;;  %v2703_v13 = vld [vmem:[%s2928_s4 + $0x68] sm:$0x1] }
 0x108   : > { %v2063_v54 = vrot.slane %v2061_v2, 4  ;;  %v1886_v49 = vunpack.c.l.b16 %v1815_v41  ;;  %v1887_v42 = vunpack.c.l.b16 %v1825_v15  ;;  %v2062_v11 = vsel %vm3064_vm7, %v2729_v37, %v2061_v2 }
 0x109   : > { %v925_v40 = vpop.f32.mrf.mxu3  ;;  %v591_v63 = vpop.f32.mrf.mxu1  ;;  %v1409_v30 = vpack.c.b16 %v1399_v43, %v1398_v20  ;;  %v1376_v51 = vrot.slane %v1374_v29, 4  ;;  %v2092_v6 = vunpack.c.l.b16 %v2062_v11 }
 0x10a   : > { %v955_v55 = vadd.f32 %v925_v40, %v801_v5  ;;  %2679 = vmatmul.msk.bf16.gmra.mxu2 %vm415_vm3, %v2765_v9  ;;  %v1830_v5 = vshll.u32 %v2701_v28, 16  ;;  %v592_v61 = vadd.f32 %v591_v63, %v3306_v17  ;;  %v2613_v40 = vrot.slane %v2605_v31, 9 }
 0x10b   : > { %v2065_v1 = vsel %vm3064_vm7, %v2063_v54, %v2064_v47  ;;  %v1838_v17 = vrot.slane %v1836_v27, 5  ;;  %v1846_v28 = vshll.u32 %v2703_v13, 16  ;;  %v2068_v31 = vrot.slane %v3533_v39, 5  ;;  %v2704_v27 = vld [vmem:[%s2928_s4 + $0x6c] sm:$0xf] }
 0x10c   : > { %v3530_v16 = vadd.f32 %v1259_v48, %v955_v55  ;;  %v1840_v48 = vshrl.u32 %v3533_v39, 16  ;;  %v1832_v55 = vrot.slane %v1830_v5, 5  ;;  %v2093_v20 = vunpack.c.l.b16 %v2065_v1  ;;  %v2722_v5 = vld [vmem:[%s2928_s4 + $0x60] sm:$0xe] }
 0x10d   : > { %v774_v60 = vpop.f32.mrf.mxu2  ;;  %v1375_v14 = vsel %vm3064_vm7, %v2613_v40, %v1374_v29  ;;  %v1848_v32 = vrot.slane %v1846_v28, 5  ;;  %v2606_v40 = vld [vmem:[%s2928_s4 + $0x60] sm:$0xe]  ;;  %v1851_v39 = vshrl.u32 %v2704_v27, 16  ;;  %v1384_v1 = vrot.slane %v3282_v50, 5 }
 0x10e   : > { %2712 = vmatmul.msk.bf16.gmra.mxu3 %vm415_vm3, %v1896_v62  ;;  %v802_v24 = vadd.f32 %v774_v60, %v590_v35  ;;  %v1842_v63 = vrot.slane %v1840_v48, 4  ;;  %v1378_v60 = vsel %vm3064_vm7, %v1376_v51, %v1377_v45  ;;  %v1833_v22 = vor.u32 %v1832_v55, %v1829_v10 }
 0x10f   : > { %v1262_v59 = vpop.f32.mrf.mxu0  ;;  %v1401_v41 = vunpack.c.l.b16 %v1378_v60  ;;  %v2103_v15 = vpack.c.b16 %v2093_v20, %v2092_v6  ;;  %v1854_v51 = vshll.u32 %v2704_v27, 16  ;;  %v2070_v10 = vrot.slane %v2068_v31, 4 }
 0x110   : > { %v2071_v55 = vrot.slane %v2703_v13, 5  ;;  %v2767_v13 = vld [vmem:[%s2928_s4 + $0x60] sm:$0xff] }
 0x111   : > { %v928_v56 = vpop.f32.mrf.mxu3  ;;  %v594_v58 = vpop.f32.mrf.mxu1 }
 0x112   : > { %2737 = vmatmul.msk.bf16.gmra.mxu0 %vm415_vm3, %v2102_v23  ;;  %v956_v9 = vadd.f32 %v928_v56, %v802_v24  ;;  %v1897_v23 = vpack.c.b16 %v1887_v42, %v1886_v49  ;;  %v1843_v24 = vor.u32 %v1842_v63, %v1838_v17  ;;  %v1834_v56 = vrot.slane %v1833_v22, 4 }
 0x113   : > { %v1381_v42 = vrot.slane %v3263_v21, 5  ;;  %v1853_v22 = vrot.slane %v1851_v39, 4 }
 0x114   : > { %2621 = vmatmul.msk.bf16.gmra.mxu1 %vm415_vm3, %v1409_v30  ;;  %v3550_v18 = vadd.f32 %v1262_v59, %v956_v9  ;;  %v595_v59 = vadd.f32 %v594_v58, %v3327_v8  ;;  %v1400_v30 = vunpack.c.l.b16 %v1375_v14  ;;  %v1844_v29 = vrot.slane %v1843_v24, 4  ;;  %v3569_v58 = vld [vmem:[%s2928_s4 + $0x70] sm:$0xf]  ;;  %v2706_v24 = vld [vmem:[%s2928_s4 + $0x74] sm:$0x1] }
 0x115   : > { %v776_v26 = vpop.f32.mrf.mxu2  ;;  %v1839_v49 = vsel %vm2956_vm4, %v1834_v56, %v1838_v17  ;;  %v1383_v20 = vrot.slane %v1381_v42, 4  ;;  %v2075_v39 = vrot.slane %v3569_v58, 5 }
 0x116   : > { %v803_v62 = vadd.f32 %v776_v26, %v592_v61  ;;  %v1410_v8 = vpack.c.b16 %v1401_v41, %v1400_v30  ;;  %v2730_v61 = vrot.slane %v2722_v5, 9  ;;  %v1849_v26 = vsel %vm2956_vm4, %v1844_v29, %v1848_v32 }
 0x117   : > { %v1264_v19 = vpop.f32.mrf.mxu0  ;;  %v1889_v6 = vunpack.c.l.b16 %v1849_v26  ;;  %v1870_v5 = vshll.u32 %v2706_v24, 16 }
 0x118   : > { %v2069_v60 = vsel %vm3064_vm7, %v2730_v61, %v2068_v31 }
 0x119   : > { %v930_v35 = vpop.f32.mrf.mxu3  ;;  %v596_v43 = vpop.f32.mrf.mxu1 }
 0x11a   : > { %v957_v2 = vadd.f32 %v930_v35, %v803_v62  ;;  %2680 = vmatmul.msk.bf16.gmra.mxu2 %vm415_vm3, %v2766_v0  ;;  %v1860_v62 = vshll.u32 %v3569_v58, 16  ;;  %v1864_v0 = vshrl.u32 %v3569_v58, 16  ;;  %v597_v21 = vadd.f32 %v596_v43, %v3351_v4 }
 0x11b   : > { %v2614_v35 = vrot.slane %v2606_v40, 9  ;;  %v2072_v4 = vsel %vm3064_vm7, %v2070_v10, %v2071_v55  ;;  %v1872_v40 = vrot.slane %v1870_v5, 5  ;;  %v2723_v10 = vld [vmem:[%s2928_s4 + $0x6c] sm:$0xe] }
 0x11c   : > { %v3564_v9 = vadd.f32 %v1264_v19, %v957_v2  ;;  %v1888_v19 = vunpack.c.l.b16 %v1839_v49  ;;  %v1856_v2 = vrot.slane %v1854_v51, 5  ;;  %v1862_v43 = vrot.slane %v1860_v62, 5 }
 0x11d   : > { %v779_v37 = vpop.f32.mrf.mxu2  ;;  %v1382_v41 = vsel %vm3064_vm7, %v2614_v35, %v1381_v42 }
 0x11e   : > { %2713 = vmatmul.msk.bf16.gmra.mxu3 %vm415_vm3, %v1897_v23  ;;  %v804_v54 = vadd.f32 %v779_v37, %v595_v59  ;;  %v1866_v23 = vrot.slane %v1864_v0, 4  ;;  %v2094_v59 = vunpack.c.l.b16 %v2069_v60  ;;  %v1898_v56 = vpack.c.b16 %v1889_v6, %v1888_v19 }
 0x11f   : > { %v1267_v47 = vpop.f32.mrf.mxu0  ;;  %v1857_v29 = vor.u32 %v1856_v2, %v1853_v22  ;;  %v1402_v31 = vunpack.c.l.b16 %v1382_v41 }
 0x120   : > { %v1867_v32 = vor.u32 %v1866_v23, %v1862_v43 }
 0x121   : > { %v933_v48 = vpop.f32.mrf.mxu3  ;;  %v599_v45 = vpop.f32.mrf.mxu1  ;;  %v1858_v42 = vrot.slane %v1857_v29, 4 }
 0x122   : > { %2738 = vmatmul.msk.bf16.gmra.mxu0 %vm415_vm3, %v2103_v15  ;;  %v958_v11 = vadd.f32 %v933_v48, %v804_v54  ;;  %v1385_v15 = vsel %vm3064_vm7, %v1383_v20, %v1384_v1  ;;  %v2095_v54 = vunpack.c.l.b16 %v2072_v4  ;;  %v1868_v26 = vrot.slane %v1867_v32, 4  ;;  %v2768_v20 = vld [vmem:[%s2928_s4 + $0x6c] sm:$0xff] }
 0x123   : > { %v1403_v27 = vunpack.c.l.b16 %v1385_v15  ;;  %v1863_v62 = vsel %vm2956_vm4, %v1858_v42, %v1862_v43  ;;  %v2731_v1 = vrot.slane %v2723_v10, 9 }
 0x124   : > { %2622 = vmatmul.msk.bf16.gmra.mxu1 %vm415_vm3, %v1410_v8  ;;  %v3583_v17 = vadd.f32 %v1267_v47, %v958_v11  ;;  %v600_v47 = vadd.f32 %v599_v45, %v3286_v53  ;;  %v2104_v49 = vpack.c.b16 %v2095_v54, %v2094_v59  ;;  %v1873_v0 = vsel %vm2956_vm4, %v1868_v26, %v1872_v40 }
 0x125   : > { %v781_v63 = vpop.f32.mrf.mxu2  ;;  %v1411_v51 = vpack.c.b16 %v1403_v27, %v1402_v31  ;;  %v2076_v22 = vsel %vm3064_vm7, %v2731_v1, %v2075_v39  ;;  %v2202_v26 = vlaneseq }
 0x126   : > { %v805_v14 = vadd.f32 %v781_v63, %v597_v21  ;;  %v2077_v21 = vrot.slane %v2075_v39, 4  ;;  %v2078_v63 = vrot.slane %v2706_v24, 5  ;;  %v2096_v43 = vunpack.c.l.b16 %v2076_v22 }
 0x127   : > { %v1269_v50 = vpop.f32.mrf.mxu0 }
 0x128   : > { %v2079_v36 = vsel %vm3064_vm7, %v2077_v21, %v2078_v63 }
 0x129   : > { %v935_v28 = vpop.f32.mrf.mxu3  ;;  %v601_v30 = vpop.f32.mrf.mxu1  ;;  %v2097_v23 = vunpack.c.l.b16 %v2079_v36 }
 0x12a   : > { %v959_v37 = vadd.f32 %v935_v28, %v805_v14  ;;  %2681 = vmatmul.msk.bf16.gmra.mxu2 %vm415_vm3, %v2767_v13  ;;  %v602_v19 = vadd.f32 %v601_v30, %v3312_v38  ;;  %v1890_v14 = vunpack.c.l.b16 %v1863_v62  ;;  %v1891_v13 = vunpack.c.l.b16 %v1873_v0 }
 0x12b   : > { %v2105_v30 = vpack.c.b16 %v2097_v23, %v2096_v43 }
 0x12c   : > { %v3597_v8 = vadd.f32 %v1269_v50, %v959_v37  ;;  %v1899_v38 = vpack.c.b16 %v1891_v13, %v1890_v14 }
 0x12d   : > { %v784_v48 = vpop.f32.mrf.mxu2 }
 0x12e   : > { %2714 = vmatmul.msk.bf16.gmra.mxu3 %vm415_vm3, %v1898_v56  ;;  %v806_v61 = vadd.f32 %v784_v48, %v600_v47 }
 0x12f   : > { %v1272_v11 = vpop.f32.mrf.mxu0 }
 0x131   : > { %v938_v55 = vpop.f32.mrf.mxu3  ;;  %v604_v53 = vpop.f32.mrf.mxu1 }
 0x132   : > { %2739 = vmatmul.msk.bf16.gmra.mxu0 %vm415_vm3, %v2104_v49  ;;  %v960_v45 = vadd.f32 %v938_v55, %v806_v61  ;;  %v605_v24 = vadd.f32 %v604_v53, %v3338_v57  ;;  %v3631_v55 = vshrl.u32 %v2202_v26, 7 }
 0x134   : > { %2623 = vmatmul.msk.bf16.gmra.mxu1 %vm415_vm3, %v1411_v51  ;;  %v3609_v58 = vadd.f32 %v1272_v11, %v960_v45  ;;  %v3633_v45 = vstv %s2741_s22  ;;  %v2204_v0 = vadd.s32 8, %v3631_v55 }
 0x135   : > { %v786_v6 = vpop.f32.mrf.mxu2  ;;  %vm2220_vm8 = vcmp.lt.s32.totalorder %v3631_v55, %v3633_v45 }
 0x136   : > { %v807_v35 = vadd.f32 %v786_v6, %v602_v19  ;;  %vm2221_vm9 = vcmp.lt.s32.totalorder %v2204_v0, %v3633_v45 }
 0x137   : > { %v1274_v60 = vpop.f32.mrf.mxu0 }
 0x139   : > { %v940_v2 = vpop.f32.mrf.mxu3  ;;  %v606_v50 = vpop.f32.mrf.mxu1 }
 0x13a   : > { %v961_v4 = vadd.f32 %v940_v2, %v807_v35  ;;  %2682 = vmatmul.msk.bf16.gmra.mxu2 %vm415_vm3, %v2768_v20  ;;  %v607_v29 = vadd.f32 %v606_v50, %v3364_v25  ;;  %v2205_v2 = vadd.s32 16, %v3631_v55 }
 0x13c   : > { %v3618_v28 = vadd.f32 %v1274_v60, %v961_v4  ;;  %vm2222_vm10 = vcmp.lt.s32.totalorder %v2205_v2, %v3633_v45 }
 0x13d   : > { %v789_v59 = vpop.f32.mrf.mxu2 }
 0x13e   : > { %2715 = vmatmul.msk.bf16.gmra.mxu3 %vm415_vm3, %v1899_v38  ;;  %v808_v41 = vadd.f32 %v789_v59, %v605_v24 }
 0x13f   : > { %v1277_v33 = vpop.f32.mrf.mxu0 }
 0x141   : > { %v943_v15 = vpop.f32.mrf.mxu3  ;;  %v1448_v37 = vpop.f32.mrf.mxu1 }
 0x142   : > { %2740 = vmatmul.msk.bf16.gmra.mxu0 %vm415_vm3, %v2105_v30  ;;  %v962_v56 = vadd.f32 %v943_v15, %v808_v41  ;;  %v1488_v54 = vadd.f32 %v1448_v37, %v3395_v7  ;;  %v2206_v37 = vadd.s32 24, %v3631_v55 }
 0x144   : > { %v3624_v32 = vadd.f32 %v1277_v33, %v962_v56  ;;  %vm2223_vm11 = vcmp.lt.s32.totalorder %v2206_v37, %v3633_v45 }
 0x145   : > { %v791_v57 = vpop.f32.mrf.mxu2 }
 0x146   : > { %v809_v5 = vadd.f32 %v791_v57, %v607_v29 }
 0x147   : > { %v1279_v47 = vpop.f32.mrf.mxu0 }
 0x149   : > { %v945_v31 = vpop.f32.mrf.mxu3  ;;  %v1450_v27 = vpop.f32.mrf.mxu1 }
 0x14a   : > { %v963_v48 = vadd.f32 %v945_v31, %v809_v5  ;;  %v1489_v49 = vadd.f32 %v1450_v27, %v3412_v34 }
 0x14c   : > { %v3628_v61 = vadd.f32 %v1279_v47, %v963_v48 }
 0x14d   : > { %v1602_v42 = vpop.f32.mrf.mxu2 }
 0x14e   : > { %v1642_v11 = vadd.f32 %v1602_v42, %v1488_v54  ;;  %v2207_v42 = vadd.s32 32, %v3631_v55 }
 0x14f   : > { %v2142_v7 = vpop.f32.mrf.mxu0 }
 0x150   : > { %vm2224_vm12 = vcmp.lt.s32.totalorder %v2207_v42, %v3633_v45 }
 0x151   : > { %v1936_v25 = vpop.f32.mrf.mxu3  ;;  %v1453_v40 = vpop.f32.mrf.mxu1 }
 0x152   : > { %v1976_v39 = vadd.f32 %v1936_v25, %v1642_v11  ;;  %v1490_v51 = vadd.f32 %v1453_v40, %v3432_v44 }
 0x154   : > { %v2182_v10 = vadd.f32 %v2142_v7, %v1976_v39 }
 0x155   : > { %v1604_v53 = vpop.f32.mrf.mxu2 }
 0x156   : > { %v1643_v34 = vadd.f32 %v1604_v53, %v1489_v49  ;;  %v2268_v44 = vsel %vm2220_vm8, %v2182_v10, 0.0  ;;  %vm2342_vm8 = vcmask 1040384  }
 0x157   : > { %v2144_v62 = vpop.f32.mrf.mxu0  ;;  %v2305_v13 = vmul.f32 %v2268_v44, %v2268_v44 }
 0x159   : > { %v1938_v1 = vpop.f32.mrf.mxu3  ;;  %v1455_v21 = vpop.f32.mrf.mxu1 }
 0x15a   : > { %v1977_v63 = vadd.f32 %v1938_v1, %v1643_v34  ;;  %v1491_v19 = vadd.f32 %v1455_v21, %v3453_v52  ;;  %v2208_v1 = vadd.s32 40, %v3631_v55 }
 0x15c   : > { %v2183_v6 = vadd.f32 %v2144_v62, %v1977_v63  ;;  %vm2225_vm13 = vcmp.lt.s32.totalorder %v2208_v1, %v3633_v45 }
 0x15d   : > { %v1607_v35 = vpop.f32.mrf.mxu2 }
 0x15e   : > { %v2269_v20 = vsel %vm2221_vm9, %v2183_v6, 0.0  ;;  %v1644_v14 = vadd.f32 %v1607_v35, %v1490_v51  ;;  %vm2344_vm9 = vcmask 1041408  }
 0x15f   : > { %v2284_v60 = vadd.f32 %v2269_v20, %v2268_v44  ;;  %v2306_v22 = vmul.f32 %v2269_v20, %v2269_v20  ;;  %v2147_v36 = vpop.f32.mrf.mxu0 }
 0x161   : > { %v2321_v50 = vadd.f32 %v2306_v22, %v2305_v13  ;;  %v1941_v4 = vpop.f32.mrf.mxu3  ;;  %v1458_v38 = vpop.f32.mrf.mxu1 }
 0x162   : > { %v1978_v43 = vadd.f32 %v1941_v4, %v1644_v14  ;;  %v1492_v23 = vadd.f32 %v1458_v38, %v3471_v46 }
 0x164   : > { %v2184_v52 = vadd.f32 %v2147_v36, %v1978_v43  ;;  %v2209_v36 = vadd.s32 48, %v3631_v55 }
 0x165   : > { %v1609_v24 = vpop.f32.mrf.mxu2 }
 0x166   : > { %v2270_v59 = vsel %vm2222_vm10, %v2184_v52, 0.0  ;;  %v1645_v30 = vadd.f32 %v1609_v24, %v1491_v19  ;;  %vm2226_vm14 = vcmp.lt.s32.totalorder %v2209_v36, %v3633_v45 }
 0x167   : > { %v2285_v41 = vadd.f32 %v2284_v60, %v2270_v59  ;;  %v2307_v33 = vmul.f32 %v2270_v59, %v2270_v59  ;;  %v2149_v15 = vpop.f32.mrf.mxu0 }
 0x169   : > { %v2322_v56 = vadd.f32 %v2321_v50, %v2307_v33  ;;  %v1943_v54 = vpop.f32.mrf.mxu3  ;;  %v1460_v29 = vpop.f32.mrf.mxu1  ;;  %v2210_v33 = vadd.s32 56, %v3631_v55 }
 0x16a   : > { %v1979_v57 = vadd.f32 %v1943_v54, %v1645_v30  ;;  %v1493_v39 = vadd.f32 %v1460_v29, %v3494_v3 }
 0x16b   : > { %vm2227_vm15 = vcmp.lt.s32.totalorder %v2210_v33, %v3633_v45 }
 0x16c   : > { %v2185_v5 = vadd.f32 %v2149_v15, %v1979_v57 }
 0x16d   : > { %v1612_v47 = vpop.f32.mrf.mxu2 }
 0x16e   : > { %v2271_v46 = vsel %vm2223_vm11, %v2185_v5, 0.0  ;;  %v1646_v31 = vadd.f32 %v1612_v47, %v1492_v23 }
 0x16f   : > { %v2286_v27 = vadd.f32 %v2285_v41, %v2271_v46  ;;  %v2308_v48 = vmul.f32 %v2271_v46, %v2271_v46  ;;  %v2152_v49 = vpop.f32.mrf.mxu0 }
 0x171   : > { %v2323_v11 = vadd.f32 %v2322_v56, %v2308_v48  ;;  %v1946_v7 = vpop.f32.mrf.mxu3  ;;  %v1463_v25 = vpop.f32.mrf.mxu1  ;;  %v2211_v48 = vadd.s32 64, %v3631_v55 }
 0x172   : > { %v1980_v26 = vadd.f32 %v1946_v7, %v1646_v31  ;;  %v1494_v35 = vadd.f32 %v1463_v25, %v3508_v12 }
 0x173   : > { %vm2228_vm0 = vcmp.lt.s32.totalorder %v2211_v48, %v3633_v45 }
 0x174   : > { %v2186_v40 = vadd.f32 %v2152_v49, %v1980_v26 }
 0x175   : > { %v1614_v51 = vpop.f32.mrf.mxu2 }
 0x176   : > { %v2272_v10 = vsel %vm2224_vm12, %v2186_v40, 0.0  ;;  %v1647_v53 = vadd.f32 %v1614_v51, %v1493_v39 }
 0x177   : > { %v2287_v34 = vadd.f32 %v2286_v27, %v2272_v10  ;;  %v2309_v62 = vmul.f32 %v2272_v10, %v2272_v10  ;;  %v2154_v0 = vpop.f32.mrf.mxu0 }
 0x179   : > { %v2324_v21 = vadd.f32 %v2323_v11, %v2309_v62  ;;  %v1948_v63 = vpop.f32.mrf.mxu3  ;;  %v1465_v19 = vpop.f32.mrf.mxu1 }
 0x17a   : > { %v1981_v44 = vadd.f32 %v1948_v63, %v1647_v53  ;;  %v1495_v23 = vadd.f32 %v1465_v19, %v3530_v16 }
 0x17c   : > { %v2187_v6 = vadd.f32 %v2154_v0, %v1981_v44 }
 0x17d   : > { %v1617_v20 = vpop.f32.mrf.mxu2 }
 0x17e   : > { %v2273_v14 = vsel %vm2225_vm13, %v2187_v6, 0.0  ;;  %v1648_v3 = vadd.f32 %v1617_v20, %v1494_v35 }
 0x17f   : > { %v2288_v13 = vadd.f32 %v2287_v34, %v2273_v14  ;;  %v2310_v60 = vmul.f32 %v2273_v14, %v2273_v14  ;;  %v2157_v22 = vpop.f32.mrf.mxu0  ;;  %v2212_v34 = vadd.s32 72, %v3631_v55 }
 0x181   : > { %v2325_v2 = vadd.f32 %v2324_v21, %v2310_v60  ;;  %v1951_v50 = vpop.f32.mrf.mxu3  ;;  %v1468_v4 = vpop.f32.mrf.mxu1  ;;  %vm2229_vm1 = vcmp.lt.s32.totalorder %v2212_v34, %v3633_v45 }
 0x182   : > { %v1982_v38 = vadd.f32 %v1951_v50, %v1648_v3  ;;  %v1496_v57 = vadd.f32 %v1468_v4, %v3550_v18  ;;  %v2213_v3 = vadd.s32 80, %v3631_v55 }
 0x184   : > { %v2188_v43 = vadd.f32 %v2157_v22, %v1982_v38  ;;  %vm2230_vm2 = vcmp.lt.s32.totalorder %v2213_v3, %v3633_v45 }
 0x185   : > { %v1619_v52 = vpop.f32.mrf.mxu2 }
 0x186   : > { %v2274_v24 = vsel %vm2226_vm14, %v2188_v43, 0.0  ;;  %v1649_v12 = vadd.f32 %v1619_v52, %v1495_v23 }
 0x187   : > { %v2289_v59 = vadd.f32 %v2288_v13, %v2274_v24  ;;  %v2311_v30 = vmul.f32 %v2274_v24, %v2274_v24  ;;  %v2159_v41 = vpop.f32.mrf.mxu0  ;;  %v2214_v24 = vadd.s32 88, %v3631_v55 }
 0x189   : > { %v2326_v15 = vadd.f32 %v2325_v2, %v2311_v30  ;;  %v1953_v37 = vpop.f32.mrf.mxu3  ;;  %v1470_v56 = vpop.f32.mrf.mxu1  ;;  %vm2231_vm3 = vcmp.lt.s32.totalorder %v2214_v24, %v3633_v45 }
 0x18a   : > { %v1983_v54 = vadd.f32 %v1953_v37, %v1649_v12  ;;  %v1497_v26 = vadd.f32 %v1470_v56, %v3564_v9 }
 0x18c   : > { %v2189_v29 = vadd.f32 %v2159_v41, %v1983_v54 }
 0x18d   : > { %v1622_v5 = vpop.f32.mrf.mxu2 }
 0x18e   : > { %v2275_v47 = vsel %vm2227_vm15, %v2189_v29, 0.0  ;;  %v1650_v16 = vadd.f32 %v1622_v5, %v1496_v57  ;;  %v2215_v5 = vadd.s32 96, %v3631_v55 }
 0x18f   : > { %v2290_v46 = vadd.f32 %v2289_v59, %v2275_v47  ;;  %v2312_v31 = vmul.f32 %v2275_v47, %v2275_v47  ;;  %v2162_v27 = vpop.f32.mrf.mxu0 }
 0x190   : > { %vm2232_vm4 = vcmp.lt.s32.totalorder %v2215_v5, %v3633_v45 }
 0x191   : > { %v2327_v49 = vadd.f32 %v2326_v15, %v2312_v31  ;;  %v1956_v42 = vpop.f32.mrf.mxu3  ;;  %v1473_v11 = vpop.f32.mrf.mxu1 }
 0x192   : > { %v1984_v7 = vadd.f32 %v1956_v42, %v1650_v16  ;;  %v1498_v19 = vadd.f32 %v1473_v11, %v3583_v17 }
 0x194   : > { %v2190_v25 = vadd.f32 %v2162_v27, %v1984_v7 }
 0x195   : > { %v1624_v40 = vpop.f32.mrf.mxu2 }
 0x196   : > { %v2276_v39 = vsel %vm2228_vm0, %v2190_v25, 0.0  ;;  %v1651_v18 = vadd.f32 %v1624_v40, %v1497_v26  ;;  %v2216_v26 = vadd.s32 104, %v3631_v55 }
 0x197   : > { %v2291_v51 = vadd.f32 %v2290_v46, %v2276_v39  ;;  %v2313_v10 = vmul.f32 %v2276_v39, %v2276_v39  ;;  %v2164_v53 = vpop.f32.mrf.mxu0 }
 0x198   : > { %vm2233_vm5 = vcmp.lt.s32.totalorder %v2216_v26, %v3633_v45 }
 0x199   : > { %v2328_v62 = vadd.f32 %v2327_v49, %v2313_v10  ;;  %v1958_v0 = vpop.f32.mrf.mxu3  ;;  %v1475_v1 = vpop.f32.mrf.mxu1 }
 0x19a   : > { %v1985_v21 = vadd.f32 %v1958_v0, %v1651_v18  ;;  %v1499_v50 = vadd.f32 %v1475_v1, %v3597_v8  ;;  %v2217_v1 = vadd.s32 112, %v3631_v55 }
 0x19c   : > { %v2191_v63 = vadd.f32 %v2164_v53, %v1985_v21  ;;  %vm2234_vm6 = vcmp.lt.s32.totalorder %v2217_v1, %v3633_v45 }
 0x19d   : > { %v1627_v44 = vpop.f32.mrf.mxu2 }
 0x19e   : > { %v2277_v6 = vsel %vm2229_vm1, %v2191_v63, 0.0  ;;  %v1652_v9 = vadd.f32 %v1627_v44, %v1498_v19 }
 0x19f   : > { %v2292_v35 = vadd.f32 %v2291_v51, %v2277_v6  ;;  %v2314_v20 = vmul.f32 %v2277_v6, %v2277_v6  ;;  %v2167_v14 = vpop.f32.mrf.mxu0 }
 0x1a1   : > { %v2329_v13 = vadd.f32 %v2328_v62, %v2314_v20  ;;  %v1961_v60 = vpop.f32.mrf.mxu3  ;;  %v1478_v36 = vpop.f32.mrf.mxu1 }
 0x1a2   : > { %v1986_v22 = vadd.f32 %v1961_v60, %v1652_v9  ;;  %v1500_v33 = vadd.f32 %v1478_v36, %v3609_v58  ;;  %v2218_v60 = vadd.s32 120, %v3631_v55 }
 0x1a4   : > { %v2192_v2 = vadd.f32 %v2167_v14, %v1986_v22  ;;  %vm2235_vm7 = vcmp.lt.s32.totalorder %v2218_v60, %v3633_v45 }
 0x1a5   : > { %v1629_v4 = vpop.f32.mrf.mxu2 }
 0x1a6   : > { %v2278_v38 = vsel %vm2230_vm2, %v2192_v2, 0.0  ;;  %v1653_v17 = vadd.f32 %v1629_v4, %v1499_v50 }
 0x1a7   : > { %v2293_v43 = vadd.f32 %v2292_v35, %v2278_v38  ;;  %v2315_v23 = vmul.f32 %v2278_v38, %v2278_v38  ;;  %v2169_v52 = vpop.f32.mrf.mxu0 }
 0x1a9   : > { %v2330_v12 = vadd.f32 %v2329_v13, %v2315_v23  ;;  %v1963_v59 = vpop.f32.mrf.mxu3  ;;  %v1480_v15 = vpop.f32.mrf.mxu1 }
 0x1aa   : > { %v1987_v30 = vadd.f32 %v1963_v59, %v1653_v17  ;;  %v1501_v27 = vadd.f32 %v1480_v15, %v3618_v28 }
 0x1ac   : > { %v2193_v41 = vadd.f32 %v2169_v52, %v1987_v30 }
 0x1ad   : > { %v1632_v37 = vpop.f32.mrf.mxu2 }
 0x1ae   : > { %v2279_v56 = vsel %vm2231_vm3, %v2193_v41, 0.0  ;;  %v1654_v8 = vadd.f32 %v1632_v37, %v1500_v33 }
 0x1af   : > { %v2294_v54 = vadd.f32 %v2293_v43, %v2279_v56  ;;  %v2316_v29 = vmul.f32 %v2279_v56, %v2279_v56  ;;  %v2172_v57 = vpop.f32.mrf.mxu0 }
 0x1b1   : > { %v2331_v47 = vadd.f32 %v2330_v12, %v2316_v29  ;;  %v1966_v16 = vpop.f32.mrf.mxu3  ;;  %v1483_v42 = vpop.f32.mrf.mxu1 }
 0x1b2   : > { %v1988_v46 = vadd.f32 %v1966_v16, %v1654_v8  ;;  %v1502_v10 = vadd.f32 %v1483_v42, %v3624_v32 }
 0x1b4   : > { %v2194_v31 = vadd.f32 %v2172_v57, %v1988_v46 }
 0x1b5   : > { %v1634_v48 = vpop.f32.mrf.mxu2 }
 0x1b6   : > { %v2280_v49 = vsel %vm2232_vm4, %v2194_v31, 0.0  ;;  %v1655_v58 = vadd.f32 %v1634_v48, %v1501_v27 }
 0x1b7   : > { %v2295_v11 = vadd.f32 %v2294_v54, %v2280_v49  ;;  %v2317_v7 = vmul.f32 %v2280_v49, %v2280_v49  ;;  %v2174_v25 = vpop.f32.mrf.mxu0 }
 0x1b9   : > { %v2332_v40 = vadd.f32 %v2331_v47, %v2317_v7  ;;  %v1968_v39 = vpop.f32.mrf.mxu3  ;;  %v1485_v21 = vpop.f32.mrf.mxu1 }
 0x1ba   : > { %v1989_v18 = vadd.f32 %v1968_v39, %v1655_v58  ;;  %v1503_v35 = vadd.f32 %v1485_v21, %v3628_v61 }
 0x1bc   : > { %v2195_v51 = vadd.f32 %v2174_v25, %v1989_v18 }
 0x1bd   : > { %v1637_v53 = vpop.f32.mrf.mxu2 }
 0x1be   : > { %v2281_v34 = vsel %vm2233_vm5, %v2195_v51, 0.0  ;;  %v1656_v28 = vadd.f32 %v1637_v53, %v1502_v10 }
 0x1bf   : > { %v2296_v62 = vadd.f32 %v2295_v11, %v2281_v34  ;;  %v2318_v0 = vmul.f32 %v2281_v34, %v2281_v34  ;;  %v2177_v19 = vpop.f32.mrf.mxu0 }
 0x1c1   : > { %v2333_v63 = vadd.f32 %v2332_v40, %v2318_v0  ;;  %v1971_v44 = vpop.f32.mrf.mxu3 }
 0x1c2   : > { %v1990_v6 = vadd.f32 %v1971_v44, %v1656_v28 }
 0x1c4   : > { %v2196_v9 = vadd.f32 %v2177_v19, %v1990_v6 }
 0x1c5   : > { %v1639_v20 = vpop.f32.mrf.mxu2 }
 0x1c6   : > { %v2282_v32 = vsel %vm2234_vm6, %v2196_v9, 0.0  ;;  %v1657_v14 = vadd.f32 %v1639_v20, %v1503_v35 }
 0x1c7   : > { %v2297_v3 = vadd.f32 %v2296_v62, %v2282_v32  ;;  %v2319_v13 = vmul.f32 %v2282_v32, %v2282_v32  ;;  %v2179_v50 = vpop.f32.mrf.mxu0 }
 0x1c9   : > { %v2334_v22 = vadd.f32 %v2333_v63, %v2319_v13  ;;  %v1973_v36 = vpop.f32.mrf.mxu3 }
 0x1ca   : > { %v1991_v2 = vadd.f32 %v1973_v36, %v1657_v14 }
 0x1cc   : > { %v2197_v4 = vadd.f32 %v2179_v50, %v1991_v2 }
 0x1ce   : > { %v2283_v38 = vsel %vm2235_vm7, %v2197_v4, 0.0 }
 0x1cf   : > { %v2298_v17 = vadd.f32 %v2297_v3, %v2283_v38  ;;  %v2320_v43 = vmul.f32 %v2283_v38, %v2283_v38 }
 0x1d1   : > { %v2299_v61 = vrot.slane %v2298_v17, 4  ;;  %v2335_v23 = vadd.f32 %v2334_v22, %v2320_v43 }
 0x1d3   : > { %v2300_v52 = vadd.f32 %v2299_v61, %v2298_v17  ;;  %v2336_v24 = vrot.slane %v2335_v23, 4 }
 0x1d5   : > { %v2301_v12 = vrot.slane %v2300_v52, 2  ;;  %v2337_v59 = vadd.f32 %v2336_v24, %v2335_v23 }
 0x1d7   : > { %v2302_v55 = vadd.f32 %v2301_v12, %v2300_v52  ;;  %v2338_v30 = vrot.slane %v2337_v59, 2 }
 0x1d9   : > { %v2303_v41 = vrot.slane %v2302_v55, 1  ;;  %v2339_v33 = vadd.f32 %v2338_v30, %v2337_v59 }
 0x1db   : > { %v2340_v45 = vrot.slane %v2339_v33, 1  ;;  %v2304_v15 = vadd.f32 %v2303_v41, %v2302_v55 }
 0x1dd   : > { %v2341_v37 = vadd.f32 %v2340_v45, %v2339_v33 }
 0x1df   : > { %v2343_v56 = vsel %vm2342_vm8, %v2304_v15, %v2341_v37 }
 0x1e0   : > { %v2345_v8 = vsel %vm2344_vm9, %v2343_v56, 0.0 }
 0x1e1   : > { %2346 = vst [vmem:[%s161_s26] sm:$0xff] %v2345_v8 }
 0x1e2 PF: > { %s12_s13 = sadd.s32 1, %s2851_s13   ;;  %s3707_s9 = smov %s2843_s11 }
 0x1e3   : > { %p9_p8 = scmp.ge.s32.totalorder %s12_s13, 6   ;;  %s3708_s10 = smov %s2847_s12 }
 0x1e4   : > { %s3709_s11 = smov %s3712_s14  ;;  %s3710_s12 = smov %s3716_s15 }
 0x1e5   :  { %11 = sbr.rel (!%p9_p8) target bundleno = 3 (0x3), region = 69 }

</bundles_post_ra>
